<compile_context>
chip_gen: v7x
topology: tpu7x:2x2x1
jax: 0.10.0
libtpu: 0.0.40
codegen_flags: <defaults>
</compile_context>

<pallas_src>
import math
from functools import partial

import jax
import jax.numpy as jnp
from jax import lax
from jax.experimental import pallas as pl
from jax.experimental.pallas import tpu as pltpu


def _round_up(x, m):
    return ((x + m - 1) // m) * m


# --------------------------- fused decoder stack ----------------------------

def _decoder_stack_kernel(x_ref, enc_ref, tmask_ref, smask_ref,
                          w_qkv_ref, b_qkv_ref, wo1_ref, bo1_ref,
                          wq2_ref, bq2_ref, wkv2_ref, bkv2_ref,
                          wo2_ref, bo2_ref, w1_ref, b1_ref, w2_ref, b2_ref,
                          lng_ref, lnb_ref, wout_ref, bout_ref,
                          logits_ref, attn_ref, act_ref,
                          *, B, T, S, D, H, eps):
    """One grid step == one decoder layer.  The running activation lives in
    `act_ref` (VMEM scratch, persists across grid steps); the final grid step
    also runs the fc_out projection into the (lane-padded) logits output."""
    layer = pl.program_id(0)
    Dh = D // H

    @pl.when(layer == 0)
    def _():
        act_ref[...] = x_ref[...].astype(jnp.float32)

    x = act_ref[...]                                            # [M, D] f32

    ln_g = lng_ref[0]                                           # [3, D]
    ln_b = lnb_ref[0]

    def layer_norm(z, idx):
        mu = jnp.mean(z, axis=-1, keepdims=True)
        var = jnp.mean((z - mu) ** 2, axis=-1, keepdims=True)
        zn = (z - mu) * lax.rsqrt(var + eps)
        return zn * ln_g[idx:idx + 1, :] + ln_b[idx:idx + 1, :]

    def mha(qb, kb, vb, mask2d, t_k, store_b=None):
        """Per-batch multi-head attention on VMEM values.
        qb: [T, D] (scale already folded into W_q), kb/vb: [t_k, D],
        mask2d broadcastable to [T, t_k]."""
        masked = jnp.broadcast_to(mask2d, (T, t_k)) == 0.0      # hoisted per-batch
        # NOTE: static head unroll is fine at these head counts; at larger
        # H/T this should become a head-major batched dot_general to bound
        # vreg live ranges (perf-review note).
        heads = []
        for h in range(H):
            qh = qb[:, h * Dh:(h + 1) * Dh]
            kh = kb[:, h * Dh:(h + 1) * Dh]
            vh = vb[:, h * Dh:(h + 1) * Dh]
            # q @ k^T without an explicit transpose: contract the last dims.
            e = lax.dot_general(qh, kh, (((1,), (1,)), ((), ())),
                                preferred_element_type=jnp.float32)
            e = jnp.where(masked, jnp.float32(-1e10), e)
            e = e - jnp.max(e, axis=-1, keepdims=True)
            p = jnp.exp(e)
            p = p / jnp.sum(p, axis=-1, keepdims=True)          # exact softmax
            if store_b is not None:
                attn_ref[store_b, h] = p.astype(attn_ref.dtype)
            heads.append(jnp.dot(p, vh, preferred_element_type=jnp.float32))
        return jnp.concatenate(heads, axis=-1)                  # [T, D]

    # ---------------------------- self attention ----------------------------
    qkv = (jnp.dot(x, w_qkv_ref[0], preferred_element_type=jnp.float32)
           + b_qkv_ref[0])                                      # [M, 3D]
    tmask = tmask_ref[...]                                      # [B,1,Tm,T]
    ctx = []
    for b in range(B):
        rows = slice(b * T, (b + 1) * T)
        ctx.append(mha(qkv[rows, 0:D], qkv[rows, D:2 * D],
                       qkv[rows, 2 * D:3 * D], tmask[b, 0], T))
    ctx_sa = jnp.concatenate(ctx, axis=0)                       # [M, D]
    sa = (jnp.dot(ctx_sa, wo1_ref[0], preferred_element_type=jnp.float32)
          + bo1_ref[0])
    out1 = layer_norm(x + sa, 0)

    # --------------------------- cross attention ----------------------------
    q2 = (jnp.dot(out1, wq2_ref[0], preferred_element_type=jnp.float32)
          + bq2_ref[0])                                         # [M, D]
    w_kv = wkv2_ref[0]
    b_kv = bkv2_ref[0]
    smask = smask_ref[...]                                      # [B,1,1,S]
    ctx = []
    for b in range(B):
        kv_b = (jnp.dot(enc_ref[b], w_kv, preferred_element_type=jnp.float32)
                + b_kv)                                         # [S, 2D]
        ctx.append(mha(q2[b * T:(b + 1) * T, :], kv_b[:, 0:D],
                       kv_b[:, D:2 * D], smask[b, 0], S, store_b=b))
    ctx_ca = jnp.concatenate(ctx, axis=0)
    ca = (jnp.dot(ctx_ca, wo2_ref[0], preferred_element_type=jnp.float32)
          + bo2_ref[0])
    out2 = layer_norm(out1 + ca, 1)

    # ----------------------------- feed forward -----------------------------
    hdn = jnp.maximum(
        jnp.dot(out2, w1_ref[0], preferred_element_type=jnp.float32)
        + b1_ref[0], 0.0)
    ff = jnp.dot(hdn, w2_ref[0], preferred_element_type=jnp.float32) + b2_ref[0]
    out3 = layer_norm(out2 + ff, 2)

    act_ref[...] = out3                                         # carry to next layer

    # ------------------------ final vocab projection ------------------------
    @pl.when(layer == pl.num_programs(0) - 1)
    def _():
        logits_ref[...] = (
            jnp.dot(out3, wout_ref[...], preferred_element_type=jnp.float32)
            + bout_ref[...]).astype(logits_ref.dtype)


def decoder_stack(x2d, enc, trg_mask, src_mask, p, *, n_heads):
    """Single pallas_call over the whole layer stack (grid = (n_layers,))."""
    L, D, _ = p["w_qkv"].shape
    M = x2d.shape[0]
    B, S, _ = enc.shape
    T = M // B
    F = p["w1"].shape[2]
    Vp = p["w_out"].shape[1]
    H = n_heads

    c2 = lambda l: (0, 0)
    c3 = lambda l: (0, 0, 0)
    c4 = lambda l: (0, 0, 0, 0)
    sel = lambda l: (l, 0, 0)        # pick this layer's weight slab

    in_specs = [
        pl.BlockSpec((M, D), c2),                          # embeddings
        pl.BlockSpec((B, S, D), c3),                       # encoder output
        pl.BlockSpec(trg_mask.shape, c4),                  # target mask
        pl.BlockSpec(src_mask.shape, c4),                  # source mask
        pl.BlockSpec((1, D, 3 * D), sel), pl.BlockSpec((1, 1, 3 * D), sel),
        pl.BlockSpec((1, D, D), sel),     pl.BlockSpec((1, 1, D), sel),
        pl.BlockSpec((1, D, D), sel),     pl.BlockSpec((1, 1, D), sel),
        pl.BlockSpec((1, D, 2 * D), sel), pl.BlockSpec((1, 1, 2 * D), sel),
        pl.BlockSpec((1, D, D), sel),     pl.BlockSpec((1, 1, D), sel),
        pl.BlockSpec((1, D, F), sel),     pl.BlockSpec((1, 1, F), sel),
        pl.BlockSpec((1, F, D), sel),     pl.BlockSpec((1, 1, D), sel),
        pl.BlockSpec((1, 3, D), sel),     pl.BlockSpec((1, 3, D), sel),
        pl.BlockSpec((D, Vp), c2),        pl.BlockSpec((1, Vp), c2),
    ]
    out_shape = (jax.ShapeDtypeStruct((M, Vp), jnp.float32),
                 jax.ShapeDtypeStruct((B, H, T, S), jnp.float32))
    out_specs = (pl.BlockSpec((M, Vp), c2),
                 pl.BlockSpec((B, H, T, S), c4))

    kernel = partial(_decoder_stack_kernel, B=B, T=T, S=S, D=D, H=H, eps=1e-5)
    return pl.pallas_call(
        kernel,
        out_shape=out_shape,
        grid=(L,),
        in_specs=in_specs,
        out_specs=out_specs,
        scratch_shapes=[pltpu.VMEM((M, D), jnp.float32)],   # carried activation
        compiler_params=pltpu.CompilerParams(
            dimension_semantics=("arbitrary",)),             # layers carry state
    )(x2d, enc, trg_mask, src_mask,
      p["w_qkv"], p["b_qkv"], p["wo1"], p["bo1"],
      p["wq2"], p["bq2"], p["wkv2"], p["bkv2"], p["wo2"], p["bo2"],
      p["w1"], p["b1"], p["w2"], p["b2"],
      p["ln_g"], p["ln_b"], p["w_out"], p["b_out"])


# ------------------------------ model forward --------------------------------

def decoder_forward(trg, enc_out, trg_mask, src_mask, params, *, n_heads,
                    latent_dim, vocab_size):
    B, T = trg.shape
    D = latent_dim
    assert T <= params["pos_emb"].shape[0]   # pos table is indexed by position
    positions = jnp.broadcast_to(jnp.arange(T, dtype=trg.dtype)[None, :], (B, T))
    # PyTorch: sqrt(latent_dim).to(trg) with int64 trg -> integer truncation.
    emb_scale = float(int(math.sqrt(latent_dim)))
    # TODO(synk): token/position embedding gathers stay in plain JAX
    # (data-dependent gather); everything after them is one pallas_call.
    x = params["tok_emb"][trg] * emb_scale + params["pos_emb"][positions]
    x2d = x.reshape(B * T, D).astype(jnp.float32)

    logits_pad, attn = decoder_stack(
        x2d, enc_out.astype(jnp.float32),
        trg_mask.astype(jnp.float32), src_mask.astype(jnp.float32),
        params, n_heads=n_heads)
    logits = logits_pad[:, :vocab_size].reshape(B, T, vocab_size)
    return logits, attn


# -------------------------------- param init ---------------------------------

def init_params(key, vocab_size, latent_dim, n_layers, n_heads, pf_dim):
    D = latent_dim
    head_dim = D // n_heads
    inv_scale = 1.0 / math.sqrt(head_dim)   # folded into W_q / b_q
    v_pad = _round_up(vocab_size, 128)      # lane-dense logits output

    def dense(k, fi, fo):
        w = 0.02 * jax.random.normal(k, (fi, fo), jnp.float32)
        b = jnp.zeros((1, fo), jnp.float32)
        return w, b

    keys = jax.random.split(key, 3 + n_layers)
    params = {
        "tok_emb": 0.02 * jax.random.normal(keys[0], (vocab_size, D), jnp.float32),
        "pos_emb": 0.02 * jax.random.normal(keys[1], (vocab_size, D), jnp.float32),
    }
    w_out, b_out = dense(keys[2], D, vocab_size)
    params["w_out"] = jnp.pad(w_out, ((0, 0), (0, v_pad - vocab_size)))
    params["b_out"] = jnp.pad(b_out, ((0, 0), (0, v_pad - vocab_size)))

    names = ["w_qkv", "b_qkv", "wo1", "bo1", "wq2", "bq2", "wkv2", "bkv2",
             "wo2", "bo2", "w1", "b1", "w2", "b2", "ln_g", "ln_b"]
    per = {n: [] for n in names}
    for li in range(n_layers):
        lk = jax.random.split(keys[3 + li], 10)
        wq, bq = dense(lk[0], D, D)
        wk, bk = dense(lk[1], D, D)
        wv, bv = dense(lk[2], D, D)
        wo, bo = dense(lk[3], D, D)
        # Fused QKV projection; 1/sqrt(head_dim) pre-folded into the Q slice
        # (mathematically identical to dividing the attention energies).
        per["w_qkv"].append(jnp.concatenate([wq * inv_scale, wk, wv], axis=1))
        per["b_qkv"].append(jnp.concatenate([bq * inv_scale, bk, bv], axis=1))
        per["wo1"].append(wo); per["bo1"].append(bo)

        wq2, bq2 = dense(lk[4], D, D)
        wk2, bk2 = dense(lk[5], D, D)
        wv2, bv2 = dense(lk[6], D, D)
        wo2, bo2 = dense(lk[7], D, D)
        per["wq2"].append(wq2 * inv_scale); per["bq2"].append(bq2 * inv_scale)
        per["wkv2"].append(jnp.concatenate([wk2, wv2], axis=1))
        per["bkv2"].append(jnp.concatenate([bk2, bv2], axis=1))
        per["wo2"].append(wo2); per["bo2"].append(bo2)

        w1, b1 = dense(lk[8], D, pf_dim)
        w2, b2 = dense(lk[9], pf_dim, D)
        per["w1"].append(w1); per["b1"].append(b1)
        per["w2"].append(w2); per["b2"].append(b2)
        per["ln_g"].append(jnp.ones((3, D), jnp.float32))   # rows: ln1, ln2, ln3
        per["ln_b"].append(jnp.zeros((3, D), jnp.float32))

    for n in names:
        params[n] = jnp.stack(per[n], axis=0)
    return params


# ----------------------------------- main ------------------------------------

if __name__ == "__main__":
    vocab_size = 50
    latent_dim = 32
    n_layers = 2
    n_heads = 4
    pf_dim = 64
    B, trg_len, src_len = 2, 8, 10

    key = jax.random.PRNGKey(0)
    k_params, k_trg, k_enc = jax.random.split(key, 3)

    params = init_params(k_params, vocab_size, latent_dim, n_layers, n_heads,
                         pf_dim)

    trg = jax.random.randint(k_trg, (B, trg_len), 0, vocab_size, dtype=jnp.int32)
    enc_out = jax.random.normal(k_enc, (B, src_len, latent_dim), jnp.float32)

    # Causal target mask [B, 1, T, T]; source padding mask [B, 1, 1, S].
    trg_mask = jnp.broadcast_to(
        jnp.tril(jnp.ones((trg_len, trg_len), jnp.float32))[None, None],
        (B, 1, trg_len, trg_len))
    src_valid = jnp.concatenate(
        [jnp.ones((B, src_len - 2), jnp.float32),
         jnp.array([[1.0, 1.0], [0.0, 0.0]], jnp.float32)], axis=1)
    src_mask = src_valid[:, None, None, :]   # [B, 1, 1, S]

    fwd = jax.jit(partial(decoder_forward, n_heads=n_heads,
                          latent_dim=latent_dim, vocab_size=vocab_size))
    logits, attn = fwd(trg, enc_out, trg_mask, src_mask, params)
    jax.block_until_ready((logits, attn))

    assert logits.shape == (B, trg_len, vocab_size)
    assert attn.shape == (B, n_heads, trg_len, src_len)
    assert bool(jnp.all(jnp.isfinite(logits)))
    assert bool(jnp.all(jnp.isfinite(attn)))
    # attention rows over valid keys should sum to ~1 (exact softmax division)
    assert bool(jnp.all(jnp.abs(jnp.sum(attn, axis=-1) - 1.0) < 1e-3))
    print("KERNEL_OK")
</pallas_src>

<mosaic_0001>
module attributes {stable_mosaic.version = 11 : i64} {
  func.func @_decoder_stack_kernel(%arg0: i32, %arg1: memref<16x32xf32, #tpu.memory_space<vmem>>, %arg2: memref<2x10x32xf32, #tpu.memory_space<vmem>>, %arg3: memref<2x1x8x8xf32, #tpu.memory_space<vmem>>, %arg4: memref<2x1x1x10xf32, #tpu.memory_space<vmem>>, %arg5: memref<1x32x96xf32, #tpu.memory_space<vmem>>, %arg6: memref<1x1x96xf32, #tpu.memory_space<vmem>>, %arg7: memref<1x32x32xf32, #tpu.memory_space<vmem>>, %arg8: memref<1x1x32xf32, #tpu.memory_space<vmem>>, %arg9: memref<1x32x32xf32, #tpu.memory_space<vmem>>, %arg10: memref<1x1x32xf32, #tpu.memory_space<vmem>>, %arg11: memref<1x32x64xf32, #tpu.memory_space<vmem>>, %arg12: memref<1x1x64xf32, #tpu.memory_space<vmem>>, %arg13: memref<1x32x32xf32, #tpu.memory_space<vmem>>, %arg14: memref<1x1x32xf32, #tpu.memory_space<vmem>>, %arg15: memref<1x32x64xf32, #tpu.memory_space<vmem>>, %arg16: memref<1x1x64xf32, #tpu.memory_space<vmem>>, %arg17: memref<1x64x32xf32, #tpu.memory_space<vmem>>, %arg18: memref<1x1x32xf32, #tpu.memory_space<vmem>>, %arg19: memref<1x3x32xf32, #tpu.memory_space<vmem>>, %arg20: memref<1x3x32xf32, #tpu.memory_space<vmem>>, %arg21: memref<32x128xf32, #tpu.memory_space<vmem>>, %arg22: memref<1x128xf32, #tpu.memory_space<vmem>>, %arg23: memref<16x128xf32, #tpu.memory_space<vmem>>, %arg24: memref<2x4x8x10xf32, #tpu.memory_space<vmem>>, %arg25: memref<16x32xf32, #tpu.memory_space<vmem>>) attributes {dimension_semantics = [#tpu.dimension_semantics<arbitrary>], iteration_bounds = array<i64: 2>, scalar_prefetch = 0 : i64, scratch_operands = 1 : i64, tpu.core_type = #tpu.core_type<tc>, window_params = [{pipeline_mode = #tpu.pipeline_mode<synchronous>, transform_indices = @transform_0, window_bounds = array<i64: 16, 32>}, {pipeline_mode = #tpu.pipeline_mode<synchronous>, transform_indices = @transform_1, window_bounds = array<i64: 2, 10, 32>}, {pipeline_mode = #tpu.pipeline_mode<synchronous>, transform_indices = @transform_2, window_bounds = array<i64: 2, 1, 8, 8>}, {pipeline_mode = #tpu.pipeline_mode<synchronous>, transform_indices = @transform_3, window_bounds = array<i64: 2, 1, 1, 10>}, {transform_indices = @transform_4, window_bounds = array<i64: 1, 32, 96>}, {transform_indices = @transform_5, window_bounds = array<i64: 1, 1, 96>}, {transform_indices = @transform_6, window_bounds = array<i64: 1, 32, 32>}, {transform_indices = @transform_7, window_bounds = array<i64: 1, 1, 32>}, {transform_indices = @transform_8, window_bounds = array<i64: 1, 32, 32>}, {transform_indices = @transform_9, window_bounds = array<i64: 1, 1, 32>}, {transform_indices = @transform_10, window_bounds = array<i64: 1, 32, 64>}, {transform_indices = @transform_11, window_bounds = array<i64: 1, 1, 64>}, {transform_indices = @transform_12, window_bounds = array<i64: 1, 32, 32>}, {transform_indices = @transform_13, window_bounds = array<i64: 1, 1, 32>}, {transform_indices = @transform_14, window_bounds = array<i64: 1, 32, 64>}, {transform_indices = @transform_15, window_bounds = array<i64: 1, 1, 64>}, {transform_indices = @transform_16, window_bounds = array<i64: 1, 64, 32>}, {transform_indices = @transform_17, window_bounds = array<i64: 1, 1, 32>}, {transform_indices = @transform_18, window_bounds = array<i64: 1, 3, 32>}, {transform_indices = @transform_19, window_bounds = array<i64: 1, 3, 32>}, {pipeline_mode = #tpu.pipeline_mode<synchronous>, transform_indices = @transform_20, window_bounds = array<i64: 32, 128>}, {pipeline_mode = #tpu.pipeline_mode<synchronous>, transform_indices = @transform_21, window_bounds = array<i64: 1, 128>}, {pipeline_mode = #tpu.pipeline_mode<synchronous>, transform_indices = @transform_22, window_bounds = array<i64: 16, 128>}, {pipeline_mode = #tpu.pipeline_mode<synchronous>, transform_indices = @transform_23, window_bounds = array<i64: 2, 4, 8, 10>}]} {
    %c0_i32 = arith.constant 0 : i32
    %0 = arith.cmpi eq, %arg0, %c0_i32 : i32
    %1 = arith.extui %0 : i1 to i32
    %c0_i32_0 = arith.constant 0 : i32
    %2 = arith.cmpi ne, %1, %c0_i32_0 : i32
    scf.if %2 {
      %c0_203 = arith.constant 0 : index
      %c0_204 = arith.constant 0 : index
      %465 = vector.load %arg1[%c0_203, %c0_204] : memref<16x32xf32, #tpu.memory_space<vmem>>, vector<16x32xf32>
      %c0_205 = arith.constant 0 : index
      %c0_206 = arith.constant 0 : index
      %466 = vector.load %arg25[%c0_205, %c0_206] : memref<16x32xf32, #tpu.memory_space<vmem>>, vector<16x32xf32>
      tpu.vector_store %arg25[%c0_205, %c0_206], %465 {strides = array<i32>} : memref<16x32xf32, #tpu.memory_space<vmem>>, vector<16x32xf32>,
    } else {
    }
    %c0 = arith.constant 0 : index
    %c0_1 = arith.constant 0 : index
    %3 = vector.load %arg25[%c0, %c0_1] : memref<16x32xf32, #tpu.memory_space<vmem>>, vector<16x32xf32>
    %c0_2 = arith.constant 0 : index
    %c0_3 = arith.constant 0 : index
    %c0_4 = arith.constant 0 : index
    %4 = vector.load %arg19[%c0_2, %c0_3, %c0_4] : memref<1x3x32xf32, #tpu.memory_space<vmem>>, vector<1x3x32xf32>
    %5 = vector.shape_cast %4 : vector<1x3x32xf32> to vector<3x32xf32>
    %c0_5 = arith.constant 0 : index
    %c0_6 = arith.constant 0 : index
    %c0_7 = arith.constant 0 : index
    %6 = vector.load %arg20[%c0_5, %c0_6, %c0_7] : memref<1x3x32xf32, #tpu.memory_space<vmem>>, vector<1x3x32xf32>
    %7 = vector.shape_cast %6 : vector<1x3x32xf32> to vector<3x32xf32>
    %c0_8 = arith.constant 0 : index
    %c0_9 = arith.constant 0 : index
    %c0_10 = arith.constant 0 : index
    %8 = vector.load %arg5[%c0_8, %c0_9, %c0_10] : memref<1x32x96xf32, #tpu.memory_space<vmem>>, vector<1x32x96xf32>
    %9 = vector.shape_cast %8 : vector<1x32x96xf32> to vector<32x96xf32>
    %cst = arith.constant dense<0.000000e+00> : vector<16x96xf32>
    %10 = tpu.matmul %3, %9, %cst {dimension_numbers = #tpu.dot_dimension_numbers<[1], [0], [0], [1], [0, 0, 1, 1], [], []>} : vector<16x32xf32>, vector<32x96xf32>, vector<16x96xf32> -> vector<16x96xf32>
    %c0_11 = arith.constant 0 : index
    %c0_12 = arith.constant 0 : index
    %c0_13 = arith.constant 0 : index
    %11 = vector.load %arg6[%c0_11, %c0_12, %c0_13] : memref<1x1x96xf32, #tpu.memory_space<vmem>>, vector<1x1x96xf32>
    %12 = vector.shape_cast %11 : vector<1x1x96xf32> to vector<1x96xf32>
    %13 = vector.broadcast %12 : vector<1x96xf32> to vector<16x96xf32>
    %14 = arith.addf %10, %13 : vector<16x96xf32>
    %c0_14 = arith.constant 0 : index
    %c0_15 = arith.constant 0 : index
    %c0_16 = arith.constant 0 : index
    %c0_17 = arith.constant 0 : index
    %15 = vector.load %arg3[%c0_14, %c0_15, %c0_16, %c0_17] : memref<2x1x8x8xf32, #tpu.memory_space<vmem>>, vector<2x1x8x8xf32>
    %16 = vector.extract_strided_slice %14 {offsets = [0, 0], sizes = [8, 32], strides = [1, 1]} : vector<16x96xf32> to vector<8x32xf32>
    %17 = vector.extract_strided_slice %14 {offsets = [0, 32], sizes = [8, 32], strides = [1, 1]} : vector<16x96xf32> to vector<8x32xf32>
    %18 = vector.extract_strided_slice %14 {offsets = [0, 64], sizes = [8, 32], strides = [1, 1]} : vector<16x96xf32> to vector<8x32xf32>
    %19 = vector.extract_strided_slice %15 {offsets = [0, 0, 0, 0], sizes = [1, 1, 8, 8], strides = [1, 1, 1, 1]} : vector<2x1x8x8xf32> to vector<1x1x8x8xf32>
    %20 = vector.shape_cast %19 : vector<1x1x8x8xf32> to vector<8x8xf32>
    %cst_18 = arith.constant 0.000000e+00 : f32
    %21 = vector.broadcast %cst_18 : f32 to vector<8x8xf32>
    %22 = arith.cmpf oeq, %20, %21 : vector<8x8xf32>
    %23 = vector.extract_strided_slice %16 {offsets = [0, 0], sizes = [8, 8], strides = [1, 1]} : vector<8x32xf32> to vector<8x8xf32>
    %24 = vector.extract_strided_slice %17 {offsets = [0, 0], sizes = [8, 8], strides = [1, 1]} : vector<8x32xf32> to vector<8x8xf32>
    %25 = vector.extract_strided_slice %18 {offsets = [0, 0], sizes = [8, 8], strides = [1, 1]} : vector<8x32xf32> to vector<8x8xf32>
    %cst_19 = arith.constant dense<0.000000e+00> : vector<8x8xf32>
    %26 = tpu.matmul %23, %24, %cst_19 {dimension_numbers = #tpu.dot_dimension_numbers<[1], [1], [0], [0], [0, 0, 1, 0], [], []>} : vector<8x8xf32>, vector<8x8xf32>, vector<8x8xf32> -> vector<8x8xf32>
    %cst_20 = arith.constant -1.000000e+10 : f32
    %27 = vector.broadcast %cst_20 : f32 to vector<8x8xf32>
    %28 = arith.select %22, %27, %26 : vector<8x8xi1>, vector<8x8xf32>
    %cst_21 = arith.constant dense<0xFF800000> : vector<8xf32>
    %29 = vector.multi_reduction <maximumf>, %28, %cst_21 [1] : vector<8x8xf32> to vector<8xf32>
    %30 = vector.shape_cast %29 : vector<8xf32> to vector<8x1xf32>
    %31 = vector.broadcast %30 : vector<8x1xf32> to vector<8x8xf32>
    %32 = arith.subf %28, %31 : vector<8x8xf32>
    %33 = math.exp %32 : vector<8x8xf32>
    %cst_22 = arith.constant dense<0.000000e+00> : vector<8xf32>
    %34 = vector.multi_reduction <add>, %33, %cst_22 [1] : vector<8x8xf32> to vector<8xf32>
    %35 = vector.shape_cast %34 : vector<8xf32> to vector<8x1xf32>
    %36 = vector.broadcast %35 : vector<8x1xf32> to vector<8x8xf32>
    %37 = arith.divf %33, %36 : vector<8x8xf32>
    %cst_23 = arith.constant dense<0.000000e+00> : vector<8x8xf32>
    %38 = tpu.matmul %37, %25, %cst_23 {dimension_numbers = #tpu.dot_dimension_numbers<[1], [0], [0], [1], [0, 0, 1, 1], [], []>} : vector<8x8xf32>, vector<8x8xf32>, vector<8x8xf32> -> vector<8x8xf32>
    %39 = vector.extract_strided_slice %16 {offsets = [0, 8], sizes = [8, 8], strides = [1, 1]} : vector<8x32xf32> to vector<8x8xf32>
    %40 = vector.extract_strided_slice %17 {offsets = [0, 8], sizes = [8, 8], strides = [1, 1]} : vector<8x32xf32> to vector<8x8xf32>
    %41 = vector.extract_strided_slice %18 {offsets = [0, 8], sizes = [8, 8], strides = [1, 1]} : vector<8x32xf32> to vector<8x8xf32>
    %cst_24 = arith.constant dense<0.000000e+00> : vector<8x8xf32>
    %42 = tpu.matmul %39, %40, %cst_24 {dimension_numbers = #tpu.dot_dimension_numbers<[1], [1], [0], [0], [0, 0, 1, 0], [], []>} : vector<8x8xf32>, vector<8x8xf32>, vector<8x8xf32> -> vector<8x8xf32>
    %cst_25 = arith.constant -1.000000e+10 : f32
    %43 = vector.broadcast %cst_25 : f32 to vector<8x8xf32>
    %44 = arith.select %22, %43, %42 : vector<8x8xi1>, vector<8x8xf32>
    %cst_26 = arith.constant dense<0xFF800000> : vector<8xf32>
    %45 = vector.multi_reduction <maximumf>, %44, %cst_26 [1] : vector<8x8xf32> to vector<8xf32>
    %46 = vector.shape_cast %45 : vector<8xf32> to vector<8x1xf32>
    %47 = vector.broadcast %46 : vector<8x1xf32> to vector<8x8xf32>
    %48 = arith.subf %44, %47 : vector<8x8xf32>
    %49 = math.exp %48 : vector<8x8xf32>
    %cst_27 = arith.constant dense<0.000000e+00> : vector<8xf32>
    %50 = vector.multi_reduction <add>, %49, %cst_27 [1] : vector<8x8xf32> to vector<8xf32>
    %51 = vector.shape_cast %50 : vector<8xf32> to vector<8x1xf32>
    %52 = vector.broadcast %51 : vector<8x1xf32> to vector<8x8xf32>
    %53 = arith.divf %49, %52 : vector<8x8xf32>
    %cst_28 = arith.constant dense<0.000000e+00> : vector<8x8xf32>
    %54 = tpu.matmul %53, %41, %cst_28 {dimension_numbers = #tpu.dot_dimension_numbers<[1], [0], [0], [1], [0, 0, 1, 1], [], []>} : vector<8x8xf32>, vector<8x8xf32>, vector<8x8xf32> -> vector<8x8xf32>
    %55 = vector.extract_strided_slice %16 {offsets = [0, 16], sizes = [8, 8], strides = [1, 1]} : vector<8x32xf32> to vector<8x8xf32>
    %56 = vector.extract_strided_slice %17 {offsets = [0, 16], sizes = [8, 8], strides = [1, 1]} : vector<8x32xf32> to vector<8x8xf32>
    %57 = vector.extract_strided_slice %18 {offsets = [0, 16], sizes = [8, 8], strides = [1, 1]} : vector<8x32xf32> to vector<8x8xf32>
    %cst_29 = arith.constant dense<0.000000e+00> : vector<8x8xf32>
    %58 = tpu.matmul %55, %56, %cst_29 {dimension_numbers = #tpu.dot_dimension_numbers<[1], [1], [0], [0], [0, 0, 1, 0], [], []>} : vector<8x8xf32>, vector<8x8xf32>, vector<8x8xf32> -> vector<8x8xf32>
    %cst_30 = arith.constant -1.000000e+10 : f32
    %59 = vector.broadcast %cst_30 : f32 to vector<8x8xf32>
    %60 = arith.select %22, %59, %58 : vector<8x8xi1>, vector<8x8xf32>
    %cst_31 = arith.constant dense<0xFF800000> : vector<8xf32>
    %61 = vector.multi_reduction <maximumf>, %60, %cst_31 [1] : vector<8x8xf32> to vector<8xf32>
    %62 = vector.shape_cast %61 : vector<8xf32> to vector<8x1xf32>
    %63 = vector.broadcast %62 : vector<8x1xf32> to vector<8x8xf32>
    %64 = arith.subf %60, %63 : vector<8x8xf32>
    %65 = math.exp %64 : vector<8x8xf32>
    %cst_32 = arith.constant dense<0.000000e+00> : vector<8xf32>
    %66 = vector.multi_reduction <add>, %65, %cst_32 [1] : vector<8x8xf32> to vector<8xf32>
    %67 = vector.shape_cast %66 : vector<8xf32> to vector<8x1xf32>
    %68 = vector.broadcast %67 : vector<8x1xf32> to vector<8x8xf32>
    %69 = arith.divf %65, %68 : vector<8x8xf32>
    %cst_33 = arith.constant dense<0.000000e+00> : vector<8x8xf32>
    %70 = tpu.matmul %69, %57, %cst_33 {dimension_numbers = #tpu.dot_dimension_numbers<[1], [0], [0], [1], [0, 0, 1, 1], [], []>} : vector<8x8xf32>, vector<8x8xf32>, vector<8x8xf32> -> vector<8x8xf32>
    %71 = vector.extract_strided_slice %16 {offsets = [0, 24], sizes = [8, 8], strides = [1, 1]} : vector<8x32xf32> to vector<8x8xf32>
    %72 = vector.extract_strided_slice %17 {offsets = [0, 24], sizes = [8, 8], strides = [1, 1]} : vector<8x32xf32> to vector<8x8xf32>
    %73 = vector.extract_strided_slice %18 {offsets = [0, 24], sizes = [8, 8], strides = [1, 1]} : vector<8x32xf32> to vector<8x8xf32>
    %cst_34 = arith.constant dense<0.000000e+00> : vector<8x8xf32>
    %74 = tpu.matmul %71, %72, %cst_34 {dimension_numbers = #tpu.dot_dimension_numbers<[1], [1], [0], [0], [0, 0, 1, 0], [], []>} : vector<8x8xf32>, vector<8x8xf32>, vector<8x8xf32> -> vector<8x8xf32>
    %cst_35 = arith.constant -1.000000e+10 : f32
    %75 = vector.broadcast %cst_35 : f32 to vector<8x8xf32>
    %76 = arith.select %22, %75, %74 : vector<8x8xi1>, vector<8x8xf32>
    %cst_36 = arith.constant dense<0xFF800000> : vector<8xf32>
    %77 = vector.multi_reduction <maximumf>, %76, %cst_36 [1] : vector<8x8xf32> to vector<8xf32>
    %78 = vector.shape_cast %77 : vector<8xf32> to vector<8x1xf32>
    %79 = vector.broadcast %78 : vector<8x1xf32> to vector<8x8xf32>
    %80 = arith.subf %76, %79 : vector<8x8xf32>
    %81 = math.exp %80 : vector<8x8xf32>
    %cst_37 = arith.constant dense<0.000000e+00> : vector<8xf32>
    %82 = vector.multi_reduction <add>, %81, %cst_37 [1] : vector<8x8xf32> to vector<8xf32>
    %83 = vector.shape_cast %82 : vector<8xf32> to vector<8x1xf32>
    %84 = vector.broadcast %83 : vector<8x1xf32> to vector<8x8xf32>
    %85 = arith.divf %81, %84 : vector<8x8xf32>
    %cst_38 = arith.constant dense<0.000000e+00> : vector<8x8xf32>
    %86 = tpu.matmul %85, %73, %cst_38 {dimension_numbers = #tpu.dot_dimension_numbers<[1], [0], [0], [1], [0, 0, 1, 1], [], []>} : vector<8x8xf32>, vector<8x8xf32>, vector<8x8xf32> -> vector<8x8xf32>
    %87 = tpu.concatenate %38, %54, %70, %86 in 1 : vector<8x8xf32>, vector<8x8xf32>, vector<8x8xf32>, vector<8x8xf32> -> vector<8x32xf32>
    %88 = vector.extract_strided_slice %14 {offsets = [8, 0], sizes = [8, 32], strides = [1, 1]} : vector<16x96xf32> to vector<8x32xf32>
    %89 = vector.extract_strided_slice %14 {offsets = [8, 32], sizes = [8, 32], strides = [1, 1]} : vector<16x96xf32> to vector<8x32xf32>
    %90 = vector.extract_strided_slice %14 {offsets = [8, 64], sizes = [8, 32], strides = [1, 1]} : vector<16x96xf32> to vector<8x32xf32>
    %91 = vector.extract_strided_slice %15 {offsets = [1, 0, 0, 0], sizes = [1, 1, 8, 8], strides = [1, 1, 1, 1]} : vector<2x1x8x8xf32> to vector<1x1x8x8xf32>
    %92 = vector.shape_cast %91 : vector<1x1x8x8xf32> to vector<8x8xf32>
    %cst_39 = arith.constant 0.000000e+00 : f32
    %93 = vector.broadcast %cst_39 : f32 to vector<8x8xf32>
    %94 = arith.cmpf oeq, %92, %93 : vector<8x8xf32>
    %95 = vector.extract_strided_slice %88 {offsets = [0, 0], sizes = [8, 8], strides = [1, 1]} : vector<8x32xf32> to vector<8x8xf32>
    %96 = vector.extract_strided_slice %89 {offsets = [0, 0], sizes = [8, 8], strides = [1, 1]} : vector<8x32xf32> to vector<8x8xf32>
    %97 = vector.extract_strided_slice %90 {offsets = [0, 0], sizes = [8, 8], strides = [1, 1]} : vector<8x32xf32> to vector<8x8xf32>
    %cst_40 = arith.constant dense<0.000000e+00> : vector<8x8xf32>
    %98 = tpu.matmul %95, %96, %cst_40 {dimension_numbers = #tpu.dot_dimension_numbers<[1], [1], [0], [0], [0, 0, 1, 0], [], []>} : vector<8x8xf32>, vector<8x8xf32>, vector<8x8xf32> -> vector<8x8xf32>
    %cst_41 = arith.constant -1.000000e+10 : f32
    %99 = vector.broadcast %cst_41 : f32 to vector<8x8xf32>
    %100 = arith.select %94, %99, %98 : vector<8x8xi1>, vector<8x8xf32>
    %cst_42 = arith.constant dense<0xFF800000> : vector<8xf32>
    %101 = vector.multi_reduction <maximumf>, %100, %cst_42 [1] : vector<8x8xf32> to vector<8xf32>
    %102 = vector.shape_cast %101 : vector<8xf32> to vector<8x1xf32>
    %103 = vector.broadcast %102 : vector<8x1xf32> to vector<8x8xf32>
    %104 = arith.subf %100, %103 : vector<8x8xf32>
    %105 = math.exp %104 : vector<8x8xf32>
    %cst_43 = arith.constant dense<0.000000e+00> : vector<8xf32>
    %106 = vector.multi_reduction <add>, %105, %cst_43 [1] : vector<8x8xf32> to vector<8xf32>
    %107 = vector.shape_cast %106 : vector<8xf32> to vector<8x1xf32>
    %108 = vector.broadcast %107 : vector<8x1xf32> to vector<8x8xf32>
    %109 = arith.divf %105, %108 : vector<8x8xf32>
    %cst_44 = arith.constant dense<0.000000e+00> : vector<8x8xf32>
    %110 = tpu.matmul %109, %97, %cst_44 {dimension_numbers = #tpu.dot_dimension_numbers<[1], [0], [0], [1], [0, 0, 1, 1], [], []>} : vector<8x8xf32>, vector<8x8xf32>, vector<8x8xf32> -> vector<8x8xf32>
    %111 = vector.extract_strided_slice %88 {offsets = [0, 8], sizes = [8, 8], strides = [1, 1]} : vector<8x32xf32> to vector<8x8xf32>
    %112 = vector.extract_strided_slice %89 {offsets = [0, 8], sizes = [8, 8], strides = [1, 1]} : vector<8x32xf32> to vector<8x8xf32>
    %113 = vector.extract_strided_slice %90 {offsets = [0, 8], sizes = [8, 8], strides = [1, 1]} : vector<8x32xf32> to vector<8x8xf32>
    %cst_45 = arith.constant dense<0.000000e+00> : vector<8x8xf32>
    %114 = tpu.matmul %111, %112, %cst_45 {dimension_numbers = #tpu.dot_dimension_numbers<[1], [1], [0], [0], [0, 0, 1, 0], [], []>} : vector<8x8xf32>, vector<8x8xf32>, vector<8x8xf32> -> vector<8x8xf32>
    %cst_46 = arith.constant -1.000000e+10 : f32
    %115 = vector.broadcast %cst_46 : f32 to vector<8x8xf32>
    %116 = arith.select %94, %115, %114 : vector<8x8xi1>, vector<8x8xf32>
    %cst_47 = arith.constant dense<0xFF800000> : vector<8xf32>
    %117 = vector.multi_reduction <maximumf>, %116, %cst_47 [1] : vector<8x8xf32> to vector<8xf32>
    %118 = vector.shape_cast %117 : vector<8xf32> to vector<8x1xf32>
    %119 = vector.broadcast %118 : vector<8x1xf32> to vector<8x8xf32>
    %120 = arith.subf %116, %119 : vector<8x8xf32>
    %121 = math.exp %120 : vector<8x8xf32>
    %cst_48 = arith.constant dense<0.000000e+00> : vector<8xf32>
    %122 = vector.multi_reduction <add>, %121, %cst_48 [1] : vector<8x8xf32> to vector<8xf32>
    %123 = vector.shape_cast %122 : vector<8xf32> to vector<8x1xf32>
    %124 = vector.broadcast %123 : vector<8x1xf32> to vector<8x8xf32>
    %125 = arith.divf %121, %124 : vector<8x8xf32>
    %cst_49 = arith.constant dense<0.000000e+00> : vector<8x8xf32>
    %126 = tpu.matmul %125, %113, %cst_49 {dimension_numbers = #tpu.dot_dimension_numbers<[1], [0], [0], [1], [0, 0, 1, 1], [], []>} : vector<8x8xf32>, vector<8x8xf32>, vector<8x8xf32> -> vector<8x8xf32>
    %127 = vector.extract_strided_slice %88 {offsets = [0, 16], sizes = [8, 8], strides = [1, 1]} : vector<8x32xf32> to vector<8x8xf32>
    %128 = vector.extract_strided_slice %89 {offsets = [0, 16], sizes = [8, 8], strides = [1, 1]} : vector<8x32xf32> to vector<8x8xf32>
    %129 = vector.extract_strided_slice %90 {offsets = [0, 16], sizes = [8, 8], strides = [1, 1]} : vector<8x32xf32> to vector<8x8xf32>
    %cst_50 = arith.constant dense<0.000000e+00> : vector<8x8xf32>
    %130 = tpu.matmul %127, %128, %cst_50 {dimension_numbers = #tpu.dot_dimension_numbers<[1], [1], [0], [0], [0, 0, 1, 0], [], []>} : vector<8x8xf32>, vector<8x8xf32>, vector<8x8xf32> -> vector<8x8xf32>
    %cst_51 = arith.constant -1.000000e+10 : f32
    %131 = vector.broadcast %cst_51 : f32 to vector<8x8xf32>
    %132 = arith.select %94, %131, %130 : vector<8x8xi1>, vector<8x8xf32>
    %cst_52 = arith.constant dense<0xFF800000> : vector<8xf32>
    %133 = vector.multi_reduction <maximumf>, %132, %cst_52 [1] : vector<8x8xf32> to vector<8xf32>
    %134 = vector.shape_cast %133 : vector<8xf32> to vector<8x1xf32>
    %135 = vector.broadcast %134 : vector<8x1xf32> to vector<8x8xf32>
    %136 = arith.subf %132, %135 : vector<8x8xf32>
    %137 = math.exp %136 : vector<8x8xf32>
    %cst_53 = arith.constant dense<0.000000e+00> : vector<8xf32>
    %138 = vector.multi_reduction <add>, %137, %cst_53 [1] : vector<8x8xf32> to vector<8xf32>
    %139 = vector.shape_cast %138 : vector<8xf32> to vector<8x1xf32>
    %140 = vector.broadcast %139 : vector<8x1xf32> to vector<8x8xf32>
    %141 = arith.divf %137, %140 : vector<8x8xf32>
    %cst_54 = arith.constant dense<0.000000e+00> : vector<8x8xf32>
    %142 = tpu.matmul %141, %129, %cst_54 {dimension_numbers = #tpu.dot_dimension_numbers<[1], [0], [0], [1], [0, 0, 1, 1], [], []>} : vector<8x8xf32>, vector<8x8xf32>, vector<8x8xf32> -> vector<8x8xf32>
    %143 = vector.extract_strided_slice %88 {offsets = [0, 24], sizes = [8, 8], strides = [1, 1]} : vector<8x32xf32> to vector<8x8xf32>
    %144 = vector.extract_strided_slice %89 {offsets = [0, 24], sizes = [8, 8], strides = [1, 1]} : vector<8x32xf32> to vector<8x8xf32>
    %145 = vector.extract_strided_slice %90 {offsets = [0, 24], sizes = [8, 8], strides = [1, 1]} : vector<8x32xf32> to vector<8x8xf32>
    %cst_55 = arith.constant dense<0.000000e+00> : vector<8x8xf32>
    %146 = tpu.matmul %143, %144, %cst_55 {dimension_numbers = #tpu.dot_dimension_numbers<[1], [1], [0], [0], [0, 0, 1, 0], [], []>} : vector<8x8xf32>, vector<8x8xf32>, vector<8x8xf32> -> vector<8x8xf32>
    %cst_56 = arith.constant -1.000000e+10 : f32
    %147 = vector.broadcast %cst_56 : f32 to vector<8x8xf32>
    %148 = arith.select %94, %147, %146 : vector<8x8xi1>, vector<8x8xf32>
    %cst_57 = arith.constant dense<0xFF800000> : vector<8xf32>
    %149 = vector.multi_reduction <maximumf>, %148, %cst_57 [1] : vector<8x8xf32> to vector<8xf32>
    %150 = vector.shape_cast %149 : vector<8xf32> to vector<8x1xf32>
    %151 = vector.broadcast %150 : vector<8x1xf32> to vector<8x8xf32>
    %152 = arith.subf %148, %151 : vector<8x8xf32>
    %153 = math.exp %152 : vector<8x8xf32>
    %cst_58 = arith.constant dense<0.000000e+00> : vector<8xf32>
    %154 = vector.multi_reduction <add>, %153, %cst_58 [1] : vector<8x8xf32> to vector<8xf32>
    %155 = vector.shape_cast %154 : vector<8xf32> to vector<8x1xf32>
    %156 = vector.broadcast %155 : vector<8x1xf32> to vector<8x8xf32>
    %157 = arith.divf %153, %156 : vector<8x8xf32>
    %cst_59 = arith.constant dense<0.000000e+00> : vector<8x8xf32>
    %158 = tpu.matmul %157, %145, %cst_59 {dimension_numbers = #tpu.dot_dimension_numbers<[1], [0], [0], [1], [0, 0, 1, 1], [], []>} : vector<8x8xf32>, vector<8x8xf32>, vector<8x8xf32> -> vector<8x8xf32>
    %159 = tpu.concatenate %110, %126, %142, %158 in 1 : vector<8x8xf32>, vector<8x8xf32>, vector<8x8xf32>, vector<8x8xf32> -> vector<8x32xf32>
    %160 = tpu.concatenate %87, %159 in 0 : vector<8x32xf32>, vector<8x32xf32> -> vector<16x32xf32>
    %c0_60 = arith.constant 0 : index
    %c0_61 = arith.constant 0 : index
    %c0_62 = arith.constant 0 : index
    %161 = vector.load %arg7[%c0_60, %c0_61, %c0_62] : memref<1x32x32xf32, #tpu.memory_space<vmem>>, vector<1x32x32xf32>
    %162 = vector.shape_cast %161 : vector<1x32x32xf32> to vector<32x32xf32>
    %cst_63 = arith.constant dense<0.000000e+00> : vector<16x32xf32>
    %163 = tpu.matmul %160, %162, %cst_63 {dimension_numbers = #tpu.dot_dimension_numbers<[1], [0], [0], [1], [0, 0, 1, 1], [], []>} : vector<16x32xf32>, vector<32x32xf32>, vector<16x32xf32> -> vector<16x32xf32>
    %c0_64 = arith.constant 0 : index
    %c0_65 = arith.constant 0 : index
    %c0_66 = arith.constant 0 : index
    %164 = vector.load %arg8[%c0_64, %c0_65, %c0_66] : memref<1x1x32xf32, #tpu.memory_space<vmem>>, vector<1x1x32xf32>
    %165 = vector.shape_cast %164 : vector<1x1x32xf32> to vector<1x32xf32>
    %166 = vector.broadcast %165 : vector<1x32xf32> to vector<16x32xf32>
    %167 = arith.addf %163, %166 : vector<16x32xf32>
    %168 = arith.addf %3, %167 : vector<16x32xf32>
    %cst_67 = arith.constant dense<0.000000e+00> : vector<16xf32>
    %169 = vector.multi_reduction <add>, %168, %cst_67 [1] : vector<16x32xf32> to vector<16xf32>
    %170 = vector.shape_cast %169 : vector<16xf32> to vector<16x1xf32>
    %cst_68 = arith.constant 3.200000e+01 : f32
    %171 = vector.broadcast %cst_68 : f32 to vector<16x1xf32>
    %172 = arith.divf %170, %171 : vector<16x1xf32>
    %173 = vector.broadcast %172 : vector<16x1xf32> to vector<16x32xf32>
    %174 = arith.subf %168, %173 : vector<16x32xf32>
    %175 = arith.mulf %174, %174 : vector<16x32xf32>
    %cst_69 = arith.constant dense<0.000000e+00> : vector<16xf32>
    %176 = vector.multi_reduction <add>, %175, %cst_69 [1] : vector<16x32xf32> to vector<16xf32>
    %177 = vector.shape_cast %176 : vector<16xf32> to vector<16x1xf32>
    %cst_70 = arith.constant 3.200000e+01 : f32
    %178 = vector.broadcast %cst_70 : f32 to vector<16x1xf32>
    %179 = arith.divf %177, %178 : vector<16x1xf32>
    %180 = vector.broadcast %172 : vector<16x1xf32> to vector<16x32xf32>
    %181 = arith.subf %168, %180 : vector<16x32xf32>
    %cst_71 = arith.constant 9.99999974E-6 : f32
    %182 = vector.broadcast %cst_71 : f32 to vector<16x1xf32>
    %183 = arith.addf %179, %182 : vector<16x1xf32>
    %184 = math.rsqrt %183 : vector<16x1xf32>
    %185 = vector.broadcast %184 : vector<16x1xf32> to vector<16x32xf32>
    %186 = arith.mulf %181, %185 : vector<16x32xf32>
    %187 = vector.extract_strided_slice %5 {offsets = [0, 0], sizes = [1, 32], strides = [1, 1]} : vector<3x32xf32> to vector<1x32xf32>
    %188 = vector.broadcast %187 : vector<1x32xf32> to vector<16x32xf32>
    %189 = arith.mulf %186, %188 : vector<16x32xf32>
    %190 = vector.extract_strided_slice %7 {offsets = [0, 0], sizes = [1, 32], strides = [1, 1]} : vector<3x32xf32> to vector<1x32xf32>
    %191 = vector.broadcast %190 : vector<1x32xf32> to vector<16x32xf32>
    %192 = arith.addf %189, %191 : vector<16x32xf32>
    %c0_72 = arith.constant 0 : index
    %c0_73 = arith.constant 0 : index
    %c0_74 = arith.constant 0 : index
    %193 = vector.load %arg9[%c0_72, %c0_73, %c0_74] : memref<1x32x32xf32, #tpu.memory_space<vmem>>, vector<1x32x32xf32>
    %194 = vector.shape_cast %193 : vector<1x32x32xf32> to vector<32x32xf32>
    %cst_75 = arith.constant dense<0.000000e+00> : vector<16x32xf32>
    %195 = tpu.matmul %192, %194, %cst_75 {dimension_numbers = #tpu.dot_dimension_numbers<[1], [0], [0], [1], [0, 0, 1, 1], [], []>} : vector<16x32xf32>, vector<32x32xf32>, vector<16x32xf32> -> vector<16x32xf32>
    %c0_76 = arith.constant 0 : index
    %c0_77 = arith.constant 0 : index
    %c0_78 = arith.constant 0 : index
    %196 = vector.load %arg10[%c0_76, %c0_77, %c0_78] : memref<1x1x32xf32, #tpu.memory_space<vmem>>, vector<1x1x32xf32>
    %197 = vector.shape_cast %196 : vector<1x1x32xf32> to vector<1x32xf32>
    %198 = vector.broadcast %197 : vector<1x32xf32> to vector<16x32xf32>
    %199 = arith.addf %195, %198 : vector<16x32xf32>
    %c0_79 = arith.constant 0 : index
    %c0_80 = arith.constant 0 : index
    %c0_81 = arith.constant 0 : index
    %200 = vector.load %arg11[%c0_79, %c0_80, %c0_81] : memref<1x32x64xf32, #tpu.memory_space<vmem>>, vector<1x32x64xf32>
    %201 = vector.shape_cast %200 : vector<1x32x64xf32> to vector<32x64xf32>
    %c0_82 = arith.constant 0 : index
    %c0_83 = arith.constant 0 : index
    %c0_84 = arith.constant 0 : index
    %202 = vector.load %arg12[%c0_82, %c0_83, %c0_84] : memref<1x1x64xf32, #tpu.memory_space<vmem>>, vector<1x1x64xf32>
    %203 = vector.shape_cast %202 : vector<1x1x64xf32> to vector<1x64xf32>
    %c0_85 = arith.constant 0 : index
    %c0_86 = arith.constant 0 : index
    %c0_87 = arith.constant 0 : index
    %c0_88 = arith.constant 0 : index
    %204 = vector.load %arg4[%c0_85, %c0_86, %c0_87, %c0_88] : memref<2x1x1x10xf32, #tpu.memory_space<vmem>>, vector<2x1x1x10xf32>
    %c0_89 = arith.constant 0 : index
    %c0_90 = arith.constant 0 : index
    %c0_91 = arith.constant 0 : index
    %205 = vector.load %arg2[%c0_89, %c0_90, %c0_91] : memref<2x10x32xf32, #tpu.memory_space<vmem>>, vector<1x10x32xf32>
    %206 = vector.shape_cast %205 : vector<1x10x32xf32> to vector<10x32xf32>
    %cst_92 = arith.constant dense<0.000000e+00> : vector<10x64xf32>
    %207 = tpu.matmul %206, %201, %cst_92 {dimension_numbers = #tpu.dot_dimension_numbers<[1], [0], [0], [1], [0, 0, 1, 1], [], []>} : vector<10x32xf32>, vector<32x64xf32>, vector<10x64xf32> -> vector<10x64xf32>
    %208 = vector.broadcast %203 : vector<1x64xf32> to vector<10x64xf32>
    %209 = arith.addf %207, %208 : vector<10x64xf32>
    %210 = vector.extract_strided_slice %199 {offsets = [0, 0], sizes = [8, 32], strides = [1, 1]} : vector<16x32xf32> to vector<8x32xf32>
    %211 = vector.extract_strided_slice %209 {offsets = [0, 0], sizes = [10, 32], strides = [1, 1]} : vector<10x64xf32> to vector<10x32xf32>
    %212 = vector.extract_strided_slice %209 {offsets = [0, 32], sizes = [10, 32], strides = [1, 1]} : vector<10x64xf32> to vector<10x32xf32>
    %213 = vector.extract_strided_slice %204 {offsets = [0, 0, 0, 0], sizes = [1, 1, 1, 10], strides = [1, 1, 1, 1]} : vector<2x1x1x10xf32> to vector<1x1x1x10xf32>
    %214 = vector.shape_cast %213 : vector<1x1x1x10xf32> to vector<1x10xf32>
    %215 = vector.shape_cast %214 : vector<1x10xf32> to vector<1x10xf32>
    %216 = vector.broadcast %215 : vector<1x10xf32> to vector<8x10xf32>
    %cst_93 = arith.constant 0.000000e+00 : f32
    %217 = vector.broadcast %cst_93 : f32 to vector<8x10xf32>
    %218 = arith.cmpf oeq, %216, %217 : vector<8x10xf32>
    %219 = vector.extract_strided_slice %210 {offsets = [0, 0], sizes = [8, 8], strides = [1, 1]} : vector<8x32xf32> to vector<8x8xf32>
    %220 = vector.extract_strided_slice %211 {offsets = [0, 0], sizes = [10, 8], strides = [1, 1]} : vector<10x32xf32> to vector<10x8xf32>
    %221 = vector.extract_strided_slice %212 {offsets = [0, 0], sizes = [10, 8], strides = [1, 1]} : vector<10x32xf32> to vector<10x8xf32>
    %cst_94 = arith.constant dense<0.000000e+00> : vector<8x10xf32>
    %222 = tpu.matmul %219, %220, %cst_94 {dimension_numbers = #tpu.dot_dimension_numbers<[1], [1], [0], [0], [0, 0, 1, 0], [], []>} : vector<8x8xf32>, vector<10x8xf32>, vector<8x10xf32> -> vector<8x10xf32>
    %cst_95 = arith.constant -1.000000e+10 : f32
    %223 = vector.broadcast %cst_95 : f32 to vector<8x10xf32>
    %224 = arith.select %218, %223, %222 : vector<8x10xi1>, vector<8x10xf32>
    %cst_96 = arith.constant dense<0xFF800000> : vector<8xf32>
    %225 = vector.multi_reduction <maximumf>, %224, %cst_96 [1] : vector<8x10xf32> to vector<8xf32>
    %226 = vector.shape_cast %225 : vector<8xf32> to vector<8x1xf32>
    %227 = vector.broadcast %226 : vector<8x1xf32> to vector<8x10xf32>
    %228 = arith.subf %224, %227 : vector<8x10xf32>
    %229 = math.exp %228 : vector<8x10xf32>
    %cst_97 = arith.constant dense<0.000000e+00> : vector<8xf32>
    %230 = vector.multi_reduction <add>, %229, %cst_97 [1] : vector<8x10xf32> to vector<8xf32>
    %231 = vector.shape_cast %230 : vector<8xf32> to vector<8x1xf32>
    %232 = vector.broadcast %231 : vector<8x1xf32> to vector<8x10xf32>
    %233 = arith.divf %229, %232 : vector<8x10xf32>
    %c0_98 = arith.constant 0 : index
    %c0_99 = arith.constant 0 : index
    %c0_100 = arith.constant 0 : index
    %c0_101 = arith.constant 0 : index
    %234 = vector.load %arg24[%c0_98, %c0_99, %c0_100, %c0_101] : memref<2x4x8x10xf32, #tpu.memory_space<vmem>>, vector<1x1x8x10xf32>
    %235 = vector.shape_cast %234 : vector<1x1x8x10xf32> to vector<8x10xf32>
    %236 = vector.shape_cast %233 : vector<8x10xf32> to vector<1x1x8x10xf32>
    tpu.vector_store %arg24[%c0_98, %c0_99, %c0_100, %c0_101], %236 {strides = array<i32>} : memref<2x4x8x10xf32, #tpu.memory_space<vmem>>, vector<1x1x8x10xf32>,
    %cst_102 = arith.constant dense<0.000000e+00> : vector<8x8xf32>
    %237 = tpu.matmul %233, %221, %cst_102 {dimension_numbers = #tpu.dot_dimension_numbers<[1], [0], [0], [1], [0, 0, 1, 1], [], []>} : vector<8x10xf32>, vector<10x8xf32>, vector<8x8xf32> -> vector<8x8xf32>
    %238 = vector.extract_strided_slice %210 {offsets = [0, 8], sizes = [8, 8], strides = [1, 1]} : vector<8x32xf32> to vector<8x8xf32>
    %239 = vector.extract_strided_slice %211 {offsets = [0, 8], sizes = [10, 8], strides = [1, 1]} : vector<10x32xf32> to vector<10x8xf32>
    %240 = vector.extract_strided_slice %212 {offsets = [0, 8], sizes = [10, 8], strides = [1, 1]} : vector<10x32xf32> to vector<10x8xf32>
    %cst_103 = arith.constant dense<0.000000e+00> : vector<8x10xf32>
    %241 = tpu.matmul %238, %239, %cst_103 {dimension_numbers = #tpu.dot_dimension_numbers<[1], [1], [0], [0], [0, 0, 1, 0], [], []>} : vector<8x8xf32>, vector<10x8xf32>, vector<8x10xf32> -> vector<8x10xf32>
    %cst_104 = arith.constant -1.000000e+10 : f32
    %242 = vector.broadcast %cst_104 : f32 to vector<8x10xf32>
    %243 = arith.select %218, %242, %241 : vector<8x10xi1>, vector<8x10xf32>
    %cst_105 = arith.constant dense<0xFF800000> : vector<8xf32>
    %244 = vector.multi_reduction <maximumf>, %243, %cst_105 [1] : vector<8x10xf32> to vector<8xf32>
    %245 = vector.shape_cast %244 : vector<8xf32> to vector<8x1xf32>
    %246 = vector.broadcast %245 : vector<8x1xf32> to vector<8x10xf32>
    %247 = arith.subf %243, %246 : vector<8x10xf32>
    %248 = math.exp %247 : vector<8x10xf32>
    %cst_106 = arith.constant dense<0.000000e+00> : vector<8xf32>
    %249 = vector.multi_reduction <add>, %248, %cst_106 [1] : vector<8x10xf32> to vector<8xf32>
    %250 = vector.shape_cast %249 : vector<8xf32> to vector<8x1xf32>
    %251 = vector.broadcast %250 : vector<8x1xf32> to vector<8x10xf32>
    %252 = arith.divf %248, %251 : vector<8x10xf32>
    %c0_107 = arith.constant 0 : index
    %c1 = arith.constant 1 : index
    %c0_108 = arith.constant 0 : index
    %c0_109 = arith.constant 0 : index
    %253 = vector.load %arg24[%c0_107, %c1, %c0_108, %c0_109] : memref<2x4x8x10xf32, #tpu.memory_space<vmem>>, vector<1x1x8x10xf32>
    %254 = vector.shape_cast %253 : vector<1x1x8x10xf32> to vector<8x10xf32>
    %255 = vector.shape_cast %252 : vector<8x10xf32> to vector<1x1x8x10xf32>
    tpu.vector_store %arg24[%c0_107, %c1, %c0_108, %c0_109], %255 {strides = array<i32>} : memref<2x4x8x10xf32, #tpu.memory_space<vmem>>, vector<1x1x8x10xf32>,
    %cst_110 = arith.constant dense<0.000000e+00> : vector<8x8xf32>
    %256 = tpu.matmul %252, %240, %cst_110 {dimension_numbers = #tpu.dot_dimension_numbers<[1], [0], [0], [1], [0, 0, 1, 1], [], []>} : vector<8x10xf32>, vector<10x8xf32>, vector<8x8xf32> -> vector<8x8xf32>
    %257 = vector.extract_strided_slice %210 {offsets = [0, 16], sizes = [8, 8], strides = [1, 1]} : vector<8x32xf32> to vector<8x8xf32>
    %258 = vector.extract_strided_slice %211 {offsets = [0, 16], sizes = [10, 8], strides = [1, 1]} : vector<10x32xf32> to vector<10x8xf32>
    %259 = vector.extract_strided_slice %212 {offsets = [0, 16], sizes = [10, 8], strides = [1, 1]} : vector<10x32xf32> to vector<10x8xf32>
    %cst_111 = arith.constant dense<0.000000e+00> : vector<8x10xf32>
    %260 = tpu.matmul %257, %258, %cst_111 {dimension_numbers = #tpu.dot_dimension_numbers<[1], [1], [0], [0], [0, 0, 1, 0], [], []>} : vector<8x8xf32>, vector<10x8xf32>, vector<8x10xf32> -> vector<8x10xf32>
    %cst_112 = arith.constant -1.000000e+10 : f32
    %261 = vector.broadcast %cst_112 : f32 to vector<8x10xf32>
    %262 = arith.select %218, %261, %260 : vector<8x10xi1>, vector<8x10xf32>
    %cst_113 = arith.constant dense<0xFF800000> : vector<8xf32>
    %263 = vector.multi_reduction <maximumf>, %262, %cst_113 [1] : vector<8x10xf32> to vector<8xf32>
    %264 = vector.shape_cast %263 : vector<8xf32> to vector<8x1xf32>
    %265 = vector.broadcast %264 : vector<8x1xf32> to vector<8x10xf32>
    %266 = arith.subf %262, %265 : vector<8x10xf32>
    %267 = math.exp %266 : vector<8x10xf32>
    %cst_114 = arith.constant dense<0.000000e+00> : vector<8xf32>
    %268 = vector.multi_reduction <add>, %267, %cst_114 [1] : vector<8x10xf32> to vector<8xf32>
    %269 = vector.shape_cast %268 : vector<8xf32> to vector<8x1xf32>
    %270 = vector.broadcast %269 : vector<8x1xf32> to vector<8x10xf32>
    %271 = arith.divf %267, %270 : vector<8x10xf32>
    %c0_115 = arith.constant 0 : index
    %c2 = arith.constant 2 : index
    %c0_116 = arith.constant 0 : index
    %c0_117 = arith.constant 0 : index
    %272 = vector.load %arg24[%c0_115, %c2, %c0_116, %c0_117] : memref<2x4x8x10xf32, #tpu.memory_space<vmem>>, vector<1x1x8x10xf32>
    %273 = vector.shape_cast %272 : vector<1x1x8x10xf32> to vector<8x10xf32>
    %274 = vector.shape_cast %271 : vector<8x10xf32> to vector<1x1x8x10xf32>
    tpu.vector_store %arg24[%c0_115, %c2, %c0_116, %c0_117], %274 {strides = array<i32>} : memref<2x4x8x10xf32, #tpu.memory_space<vmem>>, vector<1x1x8x10xf32>,
    %cst_118 = arith.constant dense<0.000000e+00> : vector<8x8xf32>
    %275 = tpu.matmul %271, %259, %cst_118 {dimension_numbers = #tpu.dot_dimension_numbers<[1], [0], [0], [1], [0, 0, 1, 1], [], []>} : vector<8x10xf32>, vector<10x8xf32>, vector<8x8xf32> -> vector<8x8xf32>
    %276 = vector.extract_strided_slice %210 {offsets = [0, 24], sizes = [8, 8], strides = [1, 1]} : vector<8x32xf32> to vector<8x8xf32>
    %277 = vector.extract_strided_slice %211 {offsets = [0, 24], sizes = [10, 8], strides = [1, 1]} : vector<10x32xf32> to vector<10x8xf32>
    %278 = vector.extract_strided_slice %212 {offsets = [0, 24], sizes = [10, 8], strides = [1, 1]} : vector<10x32xf32> to vector<10x8xf32>
    %cst_119 = arith.constant dense<0.000000e+00> : vector<8x10xf32>
    %279 = tpu.matmul %276, %277, %cst_119 {dimension_numbers = #tpu.dot_dimension_numbers<[1], [1], [0], [0], [0, 0, 1, 0], [], []>} : vector<8x8xf32>, vector<10x8xf32>, vector<8x10xf32> -> vector<8x10xf32>
    %cst_120 = arith.constant -1.000000e+10 : f32
    %280 = vector.broadcast %cst_120 : f32 to vector<8x10xf32>
    %281 = arith.select %218, %280, %279 : vector<8x10xi1>, vector<8x10xf32>
    %cst_121 = arith.constant dense<0xFF800000> : vector<8xf32>
    %282 = vector.multi_reduction <maximumf>, %281, %cst_121 [1] : vector<8x10xf32> to vector<8xf32>
    %283 = vector.shape_cast %282 : vector<8xf32> to vector<8x1xf32>
    %284 = vector.broadcast %283 : vector<8x1xf32> to vector<8x10xf32>
    %285 = arith.subf %281, %284 : vector<8x10xf32>
    %286 = math.exp %285 : vector<8x10xf32>
    %cst_122 = arith.constant dense<0.000000e+00> : vector<8xf32>
    %287 = vector.multi_reduction <add>, %286, %cst_122 [1] : vector<8x10xf32> to vector<8xf32>
    %288 = vector.shape_cast %287 : vector<8xf32> to vector<8x1xf32>
    %289 = vector.broadcast %288 : vector<8x1xf32> to vector<8x10xf32>
    %290 = arith.divf %286, %289 : vector<8x10xf32>
    %c0_123 = arith.constant 0 : index
    %c3 = arith.constant 3 : index
    %c0_124 = arith.constant 0 : index
    %c0_125 = arith.constant 0 : index
    %291 = vector.load %arg24[%c0_123, %c3, %c0_124, %c0_125] : memref<2x4x8x10xf32, #tpu.memory_space<vmem>>, vector<1x1x8x10xf32>
    %292 = vector.shape_cast %291 : vector<1x1x8x10xf32> to vector<8x10xf32>
    %293 = vector.shape_cast %290 : vector<8x10xf32> to vector<1x1x8x10xf32>
    tpu.vector_store %arg24[%c0_123, %c3, %c0_124, %c0_125], %293 {strides = array<i32>} : memref<2x4x8x10xf32, #tpu.memory_space<vmem>>, vector<1x1x8x10xf32>,
    %cst_126 = arith.constant dense<0.000000e+00> : vector<8x8xf32>
    %294 = tpu.matmul %290, %278, %cst_126 {dimension_numbers = #tpu.dot_dimension_numbers<[1], [0], [0], [1], [0, 0, 1, 1], [], []>} : vector<8x10xf32>, vector<10x8xf32>, vector<8x8xf32> -> vector<8x8xf32>
    %295 = tpu.concatenate %237, %256, %275, %294 in 1 : vector<8x8xf32>, vector<8x8xf32>, vector<8x8xf32>, vector<8x8xf32> -> vector<8x32xf32>
    %c1_127 = arith.constant 1 : index
    %c0_128 = arith.constant 0 : index
    %c0_129 = arith.constant 0 : index
    %296 = vector.load %arg2[%c1_127, %c0_128, %c0_129] : memref<2x10x32xf32, #tpu.memory_space<vmem>>, vector<1x10x32xf32>
    %297 = vector.shape_cast %296 : vector<1x10x32xf32> to vector<10x32xf32>
    %cst_130 = arith.constant dense<0.000000e+00> : vector<10x64xf32>
    %298 = tpu.matmul %297, %201, %cst_130 {dimension_numbers = #tpu.dot_dimension_numbers<[1], [0], [0], [1], [0, 0, 1, 1], [], []>} : vector<10x32xf32>, vector<32x64xf32>, vector<10x64xf32> -> vector<10x64xf32>
    %299 = vector.broadcast %203 : vector<1x64xf32> to vector<10x64xf32>
    %300 = arith.addf %298, %299 : vector<10x64xf32>
    %301 = vector.extract_strided_slice %199 {offsets = [8, 0], sizes = [8, 32], strides = [1, 1]} : vector<16x32xf32> to vector<8x32xf32>
    %302 = vector.extract_strided_slice %300 {offsets = [0, 0], sizes = [10, 32], strides = [1, 1]} : vector<10x64xf32> to vector<10x32xf32>
    %303 = vector.extract_strided_slice %300 {offsets = [0, 32], sizes = [10, 32], strides = [1, 1]} : vector<10x64xf32> to vector<10x32xf32>
    %304 = vector.extract_strided_slice %204 {offsets = [1, 0, 0, 0], sizes = [1, 1, 1, 10], strides = [1, 1, 1, 1]} : vector<2x1x1x10xf32> to vector<1x1x1x10xf32>
    %305 = vector.shape_cast %304 : vector<1x1x1x10xf32> to vector<1x10xf32>
    %306 = vector.shape_cast %305 : vector<1x10xf32> to vector<1x10xf32>
    %307 = vector.broadcast %306 : vector<1x10xf32> to vector<8x10xf32>
    %cst_131 = arith.constant 0.000000e+00 : f32
    %308 = vector.broadcast %cst_131 : f32 to vector<8x10xf32>
    %309 = arith.cmpf oeq, %307, %308 : vector<8x10xf32>
    %310 = vector.extract_strided_slice %301 {offsets = [0, 0], sizes = [8, 8], strides = [1, 1]} : vector<8x32xf32> to vector<8x8xf32>
    %311 = vector.extract_strided_slice %302 {offsets = [0, 0], sizes = [10, 8], strides = [1, 1]} : vector<10x32xf32> to vector<10x8xf32>
    %312 = vector.extract_strided_slice %303 {offsets = [0, 0], sizes = [10, 8], strides = [1, 1]} : vector<10x32xf32> to vector<10x8xf32>
    %cst_132 = arith.constant dense<0.000000e+00> : vector<8x10xf32>
    %313 = tpu.matmul %310, %311, %cst_132 {dimension_numbers = #tpu.dot_dimension_numbers<[1], [1], [0], [0], [0, 0, 1, 0], [], []>} : vector<8x8xf32>, vector<10x8xf32>, vector<8x10xf32> -> vector<8x10xf32>
    %cst_133 = arith.constant -1.000000e+10 : f32
    %314 = vector.broadcast %cst_133 : f32 to vector<8x10xf32>
    %315 = arith.select %309, %314, %313 : vector<8x10xi1>, vector<8x10xf32>
    %cst_134 = arith.constant dense<0xFF800000> : vector<8xf32>
    %316 = vector.multi_reduction <maximumf>, %315, %cst_134 [1] : vector<8x10xf32> to vector<8xf32>
    %317 = vector.shape_cast %316 : vector<8xf32> to vector<8x1xf32>
    %318 = vector.broadcast %317 : vector<8x1xf32> to vector<8x10xf32>
    %319 = arith.subf %315, %318 : vector<8x10xf32>
    %320 = math.exp %319 : vector<8x10xf32>
    %cst_135 = arith.constant dense<0.000000e+00> : vector<8xf32>
    %321 = vector.multi_reduction <add>, %320, %cst_135 [1] : vector<8x10xf32> to vector<8xf32>
    %322 = vector.shape_cast %321 : vector<8xf32> to vector<8x1xf32>
    %323 = vector.broadcast %322 : vector<8x1xf32> to vector<8x10xf32>
    %324 = arith.divf %320, %323 : vector<8x10xf32>
    %c1_136 = arith.constant 1 : index
    %c0_137 = arith.constant 0 : index
    %c0_138 = arith.constant 0 : index
    %c0_139 = arith.constant 0 : index
    %325 = vector.load %arg24[%c1_136, %c0_137, %c0_138, %c0_139] : memref<2x4x8x10xf32, #tpu.memory_space<vmem>>, vector<1x1x8x10xf32>
    %326 = vector.shape_cast %325 : vector<1x1x8x10xf32> to vector<8x10xf32>
    %327 = vector.shape_cast %324 : vector<8x10xf32> to vector<1x1x8x10xf32>
    tpu.vector_store %arg24[%c1_136, %c0_137, %c0_138, %c0_139], %327 {strides = array<i32>} : memref<2x4x8x10xf32, #tpu.memory_space<vmem>>, vector<1x1x8x10xf32>,
    %cst_140 = arith.constant dense<0.000000e+00> : vector<8x8xf32>
    %328 = tpu.matmul %324, %312, %cst_140 {dimension_numbers = #tpu.dot_dimension_numbers<[1], [0], [0], [1], [0, 0, 1, 1], [], []>} : vector<8x10xf32>, vector<10x8xf32>, vector<8x8xf32> -> vector<8x8xf32>
    %329 = vector.extract_strided_slice %301 {offsets = [0, 8], sizes = [8, 8], strides = [1, 1]} : vector<8x32xf32> to vector<8x8xf32>
    %330 = vector.extract_strided_slice %302 {offsets = [0, 8], sizes = [10, 8], strides = [1, 1]} : vector<10x32xf32> to vector<10x8xf32>
    %331 = vector.extract_strided_slice %303 {offsets = [0, 8], sizes = [10, 8], strides = [1, 1]} : vector<10x32xf32> to vector<10x8xf32>
    %cst_141 = arith.constant dense<0.000000e+00> : vector<8x10xf32>
    %332 = tpu.matmul %329, %330, %cst_141 {dimension_numbers = #tpu.dot_dimension_numbers<[1], [1], [0], [0], [0, 0, 1, 0], [], []>} : vector<8x8xf32>, vector<10x8xf32>, vector<8x10xf32> -> vector<8x10xf32>
    %cst_142 = arith.constant -1.000000e+10 : f32
    %333 = vector.broadcast %cst_142 : f32 to vector<8x10xf32>
    %334 = arith.select %309, %333, %332 : vector<8x10xi1>, vector<8x10xf32>
    %cst_143 = arith.constant dense<0xFF800000> : vector<8xf32>
    %335 = vector.multi_reduction <maximumf>, %334, %cst_143 [1] : vector<8x10xf32> to vector<8xf32>
    %336 = vector.shape_cast %335 : vector<8xf32> to vector<8x1xf32>
    %337 = vector.broadcast %336 : vector<8x1xf32> to vector<8x10xf32>
    %338 = arith.subf %334, %337 : vector<8x10xf32>
    %339 = math.exp %338 : vector<8x10xf32>
    %cst_144 = arith.constant dense<0.000000e+00> : vector<8xf32>
    %340 = vector.multi_reduction <add>, %339, %cst_144 [1] : vector<8x10xf32> to vector<8xf32>
    %341 = vector.shape_cast %340 : vector<8xf32> to vector<8x1xf32>
    %342 = vector.broadcast %341 : vector<8x1xf32> to vector<8x10xf32>
    %343 = arith.divf %339, %342 : vector<8x10xf32>
    %c1_145 = arith.constant 1 : index
    %c1_146 = arith.constant 1 : index
    %c0_147 = arith.constant 0 : index
    %c0_148 = arith.constant 0 : index
    %344 = vector.load %arg24[%c1_145, %c1_146, %c0_147, %c0_148] : memref<2x4x8x10xf32, #tpu.memory_space<vmem>>, vector<1x1x8x10xf32>
    %345 = vector.shape_cast %344 : vector<1x1x8x10xf32> to vector<8x10xf32>
    %346 = vector.shape_cast %343 : vector<8x10xf32> to vector<1x1x8x10xf32>
    tpu.vector_store %arg24[%c1_145, %c1_146, %c0_147, %c0_148], %346 {strides = array<i32>} : memref<2x4x8x10xf32, #tpu.memory_space<vmem>>, vector<1x1x8x10xf32>,
    %cst_149 = arith.constant dense<0.000000e+00> : vector<8x8xf32>
    %347 = tpu.matmul %343, %331, %cst_149 {dimension_numbers = #tpu.dot_dimension_numbers<[1], [0], [0], [1], [0, 0, 1, 1], [], []>} : vector<8x10xf32>, vector<10x8xf32>, vector<8x8xf32> -> vector<8x8xf32>
    %348 = vector.extract_strided_slice %301 {offsets = [0, 16], sizes = [8, 8], strides = [1, 1]} : vector<8x32xf32> to vector<8x8xf32>
    %349 = vector.extract_strided_slice %302 {offsets = [0, 16], sizes = [10, 8], strides = [1, 1]} : vector<10x32xf32> to vector<10x8xf32>
    %350 = vector.extract_strided_slice %303 {offsets = [0, 16], sizes = [10, 8], strides = [1, 1]} : vector<10x32xf32> to vector<10x8xf32>
    %cst_150 = arith.constant dense<0.000000e+00> : vector<8x10xf32>
    %351 = tpu.matmul %348, %349, %cst_150 {dimension_numbers = #tpu.dot_dimension_numbers<[1], [1], [0], [0], [0, 0, 1, 0], [], []>} : vector<8x8xf32>, vector<10x8xf32>, vector<8x10xf32> -> vector<8x10xf32>
    %cst_151 = arith.constant -1.000000e+10 : f32
    %352 = vector.broadcast %cst_151 : f32 to vector<8x10xf32>
    %353 = arith.select %309, %352, %351 : vector<8x10xi1>, vector<8x10xf32>
    %cst_152 = arith.constant dense<0xFF800000> : vector<8xf32>
    %354 = vector.multi_reduction <maximumf>, %353, %cst_152 [1] : vector<8x10xf32> to vector<8xf32>
    %355 = vector.shape_cast %354 : vector<8xf32> to vector<8x1xf32>
    %356 = vector.broadcast %355 : vector<8x1xf32> to vector<8x10xf32>
    %357 = arith.subf %353, %356 : vector<8x10xf32>
    %358 = math.exp %357 : vector<8x10xf32>
    %cst_153 = arith.constant dense<0.000000e+00> : vector<8xf32>
    %359 = vector.multi_reduction <add>, %358, %cst_153 [1] : vector<8x10xf32> to vector<8xf32>
    %360 = vector.shape_cast %359 : vector<8xf32> to vector<8x1xf32>
    %361 = vector.broadcast %360 : vector<8x1xf32> to vector<8x10xf32>
    %362 = arith.divf %358, %361 : vector<8x10xf32>
    %c1_154 = arith.constant 1 : index
    %c2_155 = arith.constant 2 : index
    %c0_156 = arith.constant 0 : index
    %c0_157 = arith.constant 0 : index
    %363 = vector.load %arg24[%c1_154, %c2_155, %c0_156, %c0_157] : memref<2x4x8x10xf32, #tpu.memory_space<vmem>>, vector<1x1x8x10xf32>
    %364 = vector.shape_cast %363 : vector<1x1x8x10xf32> to vector<8x10xf32>
    %365 = vector.shape_cast %362 : vector<8x10xf32> to vector<1x1x8x10xf32>
    tpu.vector_store %arg24[%c1_154, %c2_155, %c0_156, %c0_157], %365 {strides = array<i32>} : memref<2x4x8x10xf32, #tpu.memory_space<vmem>>, vector<1x1x8x10xf32>,
    %cst_158 = arith.constant dense<0.000000e+00> : vector<8x8xf32>
    %366 = tpu.matmul %362, %350, %cst_158 {dimension_numbers = #tpu.dot_dimension_numbers<[1], [0], [0], [1], [0, 0, 1, 1], [], []>} : vector<8x10xf32>, vector<10x8xf32>, vector<8x8xf32> -> vector<8x8xf32>
    %367 = vector.extract_strided_slice %301 {offsets = [0, 24], sizes = [8, 8], strides = [1, 1]} : vector<8x32xf32> to vector<8x8xf32>
    %368 = vector.extract_strided_slice %302 {offsets = [0, 24], sizes = [10, 8], strides = [1, 1]} : vector<10x32xf32> to vector<10x8xf32>
    %369 = vector.extract_strided_slice %303 {offsets = [0, 24], sizes = [10, 8], strides = [1, 1]} : vector<10x32xf32> to vector<10x8xf32>
    %cst_159 = arith.constant dense<0.000000e+00> : vector<8x10xf32>
    %370 = tpu.matmul %367, %368, %cst_159 {dimension_numbers = #tpu.dot_dimension_numbers<[1], [1], [0], [0], [0, 0, 1, 0], [], []>} : vector<8x8xf32>, vector<10x8xf32>, vector<8x10xf32> -> vector<8x10xf32>
    %cst_160 = arith.constant -1.000000e+10 : f32
    %371 = vector.broadcast %cst_160 : f32 to vector<8x10xf32>
    %372 = arith.select %309, %371, %370 : vector<8x10xi1>, vector<8x10xf32>
    %cst_161 = arith.constant dense<0xFF800000> : vector<8xf32>
    %373 = vector.multi_reduction <maximumf>, %372, %cst_161 [1] : vector<8x10xf32> to vector<8xf32>
    %374 = vector.shape_cast %373 : vector<8xf32> to vector<8x1xf32>
    %375 = vector.broadcast %374 : vector<8x1xf32> to vector<8x10xf32>
    %376 = arith.subf %372, %375 : vector<8x10xf32>
    %377 = math.exp %376 : vector<8x10xf32>
    %cst_162 = arith.constant dense<0.000000e+00> : vector<8xf32>
    %378 = vector.multi_reduction <add>, %377, %cst_162 [1] : vector<8x10xf32> to vector<8xf32>
    %379 = vector.shape_cast %378 : vector<8xf32> to vector<8x1xf32>
    %380 = vector.broadcast %379 : vector<8x1xf32> to vector<8x10xf32>
    %381 = arith.divf %377, %380 : vector<8x10xf32>
    %c1_163 = arith.constant 1 : index
    %c3_164 = arith.constant 3 : index
    %c0_165 = arith.constant 0 : index
    %c0_166 = arith.constant 0 : index
    %382 = vector.load %arg24[%c1_163, %c3_164, %c0_165, %c0_166] : memref<2x4x8x10xf32, #tpu.memory_space<vmem>>, vector<1x1x8x10xf32>
    %383 = vector.shape_cast %382 : vector<1x1x8x10xf32> to vector<8x10xf32>
    %384 = vector.shape_cast %381 : vector<8x10xf32> to vector<1x1x8x10xf32>
    tpu.vector_store %arg24[%c1_163, %c3_164, %c0_165, %c0_166], %384 {strides = array<i32>} : memref<2x4x8x10xf32, #tpu.memory_space<vmem>>, vector<1x1x8x10xf32>,
    %cst_167 = arith.constant dense<0.000000e+00> : vector<8x8xf32>
    %385 = tpu.matmul %381, %369, %cst_167 {dimension_numbers = #tpu.dot_dimension_numbers<[1], [0], [0], [1], [0, 0, 1, 1], [], []>} : vector<8x10xf32>, vector<10x8xf32>, vector<8x8xf32> -> vector<8x8xf32>
    %386 = tpu.concatenate %328, %347, %366, %385 in 1 : vector<8x8xf32>, vector<8x8xf32>, vector<8x8xf32>, vector<8x8xf32> -> vector<8x32xf32>
    %387 = tpu.concatenate %295, %386 in 0 : vector<8x32xf32>, vector<8x32xf32> -> vector<16x32xf32>
    %c0_168 = arith.constant 0 : index
    %c0_169 = arith.constant 0 : index
    %c0_170 = arith.constant 0 : index
    %388 = vector.load %arg13[%c0_168, %c0_169, %c0_170] : memref<1x32x32xf32, #tpu.memory_space<vmem>>, vector<1x32x32xf32>
    %389 = vector.shape_cast %388 : vector<1x32x32xf32> to vector<32x32xf32>
    %cst_171 = arith.constant dense<0.000000e+00> : vector<16x32xf32>
    %390 = tpu.matmul %387, %389, %cst_171 {dimension_numbers = #tpu.dot_dimension_numbers<[1], [0], [0], [1], [0, 0, 1, 1], [], []>} : vector<16x32xf32>, vector<32x32xf32>, vector<16x32xf32> -> vector<16x32xf32>
    %c0_172 = arith.constant 0 : index
    %c0_173 = arith.constant 0 : index
    %c0_174 = arith.constant 0 : index
    %391 = vector.load %arg14[%c0_172, %c0_173, %c0_174] : memref<1x1x32xf32, #tpu.memory_space<vmem>>, vector<1x1x32xf32>
    %392 = vector.shape_cast %391 : vector<1x1x32xf32> to vector<1x32xf32>
    %393 = vector.broadcast %392 : vector<1x32xf32> to vector<16x32xf32>
    %394 = arith.addf %390, %393 : vector<16x32xf32>
    %395 = arith.addf %192, %394 : vector<16x32xf32>
    %cst_175 = arith.constant dense<0.000000e+00> : vector<16xf32>
    %396 = vector.multi_reduction <add>, %395, %cst_175 [1] : vector<16x32xf32> to vector<16xf32>
    %397 = vector.shape_cast %396 : vector<16xf32> to vector<16x1xf32>
    %cst_176 = arith.constant 3.200000e+01 : f32
    %398 = vector.broadcast %cst_176 : f32 to vector<16x1xf32>
    %399 = arith.divf %397, %398 : vector<16x1xf32>
    %400 = vector.broadcast %399 : vector<16x1xf32> to vector<16x32xf32>
    %401 = arith.subf %395, %400 : vector<16x32xf32>
    %402 = arith.mulf %401, %401 : vector<16x32xf32>
    %cst_177 = arith.constant dense<0.000000e+00> : vector<16xf32>
    %403 = vector.multi_reduction <add>, %402, %cst_177 [1] : vector<16x32xf32> to vector<16xf32>
    %404 = vector.shape_cast %403 : vector<16xf32> to vector<16x1xf32>
    %cst_178 = arith.constant 3.200000e+01 : f32
    %405 = vector.broadcast %cst_178 : f32 to vector<16x1xf32>
    %406 = arith.divf %404, %405 : vector<16x1xf32>
    %407 = vector.broadcast %399 : vector<16x1xf32> to vector<16x32xf32>
    %408 = arith.subf %395, %407 : vector<16x32xf32>
    %cst_179 = arith.constant 9.99999974E-6 : f32
    %409 = vector.broadcast %cst_179 : f32 to vector<16x1xf32>
    %410 = arith.addf %406, %409 : vector<16x1xf32>
    %411 = math.rsqrt %410 : vector<16x1xf32>
    %412 = vector.broadcast %411 : vector<16x1xf32> to vector<16x32xf32>
    %413 = arith.mulf %408, %412 : vector<16x32xf32>
    %414 = vector.extract_strided_slice %5 {offsets = [1, 0], sizes = [1, 32], strides = [1, 1]} : vector<3x32xf32> to vector<1x32xf32>
    %415 = vector.broadcast %414 : vector<1x32xf32> to vector<16x32xf32>
    %416 = arith.mulf %413, %415 : vector<16x32xf32>
    %417 = vector.extract_strided_slice %7 {offsets = [1, 0], sizes = [1, 32], strides = [1, 1]} : vector<3x32xf32> to vector<1x32xf32>
    %418 = vector.broadcast %417 : vector<1x32xf32> to vector<16x32xf32>
    %419 = arith.addf %416, %418 : vector<16x32xf32>
    %c0_180 = arith.constant 0 : index
    %c0_181 = arith.constant 0 : index
    %c0_182 = arith.constant 0 : index
    %420 = vector.load %arg15[%c0_180, %c0_181, %c0_182] : memref<1x32x64xf32, #tpu.memory_space<vmem>>, vector<1x32x64xf32>
    %421 = vector.shape_cast %420 : vector<1x32x64xf32> to vector<32x64xf32>
    %cst_183 = arith.constant dense<0.000000e+00> : vector<16x64xf32>
    %422 = tpu.matmul %419, %421, %cst_183 {dimension_numbers = #tpu.dot_dimension_numbers<[1], [0], [0], [1], [0, 0, 1, 1], [], []>} : vector<16x32xf32>, vector<32x64xf32>, vector<16x64xf32> -> vector<16x64xf32>
    %c0_184 = arith.constant 0 : index
    %c0_185 = arith.constant 0 : index
    %c0_186 = arith.constant 0 : index
    %423 = vector.load %arg16[%c0_184, %c0_185, %c0_186] : memref<1x1x64xf32, #tpu.memory_space<vmem>>, vector<1x1x64xf32>
    %424 = vector.shape_cast %423 : vector<1x1x64xf32> to vector<1x64xf32>
    %425 = vector.broadcast %424 : vector<1x64xf32> to vector<16x64xf32>
    %426 = arith.addf %422, %425 : vector<16x64xf32>
    %cst_187 = arith.constant 0.000000e+00 : f32
    %427 = vector.broadcast %cst_187 : f32 to vector<16x64xf32>
    %428 = arith.maximumf %426, %427 : vector<16x64xf32>
    %c0_188 = arith.constant 0 : index
    %c0_189 = arith.constant 0 : index
    %c0_190 = arith.constant 0 : index
    %429 = vector.load %arg17[%c0_188, %c0_189, %c0_190] : memref<1x64x32xf32, #tpu.memory_space<vmem>>, vector<1x64x32xf32>
    %430 = vector.shape_cast %429 : vector<1x64x32xf32> to vector<64x32xf32>
    %cst_191 = arith.constant dense<0.000000e+00> : vector<16x32xf32>
    %431 = tpu.matmul %428, %430, %cst_191 {dimension_numbers = #tpu.dot_dimension_numbers<[1], [0], [0], [1], [0, 0, 1, 1], [], []>} : vector<16x64xf32>, vector<64x32xf32>, vector<16x32xf32> -> vector<16x32xf32>
    %c0_192 = arith.constant 0 : index
    %c0_193 = arith.constant 0 : index
    %c0_194 = arith.constant 0 : index
    %432 = vector.load %arg18[%c0_192, %c0_193, %c0_194] : memref<1x1x32xf32, #tpu.memory_space<vmem>>, vector<1x1x32xf32>
    %433 = vector.shape_cast %432 : vector<1x1x32xf32> to vector<1x32xf32>
    %434 = vector.broadcast %433 : vector<1x32xf32> to vector<16x32xf32>
    %435 = arith.addf %431, %434 : vector<16x32xf32>
    %436 = arith.addf %419, %435 : vector<16x32xf32>
    %cst_195 = arith.constant dense<0.000000e+00> : vector<16xf32>
    %437 = vector.multi_reduction <add>, %436, %cst_195 [1] : vector<16x32xf32> to vector<16xf32>
    %438 = vector.shape_cast %437 : vector<16xf32> to vector<16x1xf32>
    %cst_196 = arith.constant 3.200000e+01 : f32
    %439 = vector.broadcast %cst_196 : f32 to vector<16x1xf32>
    %440 = arith.divf %438, %439 : vector<16x1xf32>
    %441 = vector.broadcast %440 : vector<16x1xf32> to vector<16x32xf32>
    %442 = arith.subf %436, %441 : vector<16x32xf32>
    %443 = arith.mulf %442, %442 : vector<16x32xf32>
    %cst_197 = arith.constant dense<0.000000e+00> : vector<16xf32>
    %444 = vector.multi_reduction <add>, %443, %cst_197 [1] : vector<16x32xf32> to vector<16xf32>
    %445 = vector.shape_cast %444 : vector<16xf32> to vector<16x1xf32>
    %cst_198 = arith.constant 3.200000e+01 : f32
    %446 = vector.broadcast %cst_198 : f32 to vector<16x1xf32>
    %447 = arith.divf %445, %446 : vector<16x1xf32>
    %448 = vector.broadcast %440 : vector<16x1xf32> to vector<16x32xf32>
    %449 = arith.subf %436, %448 : vector<16x32xf32>
    %cst_199 = arith.constant 9.99999974E-6 : f32
    %450 = vector.broadcast %cst_199 : f32 to vector<16x1xf32>
    %451 = arith.addf %447, %450 : vector<16x1xf32>
    %452 = math.rsqrt %451 : vector<16x1xf32>
    %453 = vector.broadcast %452 : vector<16x1xf32> to vector<16x32xf32>
    %454 = arith.mulf %449, %453 : vector<16x32xf32>
    %455 = vector.extract_strided_slice %5 {offsets = [2, 0], sizes = [1, 32], strides = [1, 1]} : vector<3x32xf32> to vector<1x32xf32>
    %456 = vector.broadcast %455 : vector<1x32xf32> to vector<16x32xf32>
    %457 = arith.mulf %454, %456 : vector<16x32xf32>
    %458 = vector.extract_strided_slice %7 {offsets = [2, 0], sizes = [1, 32], strides = [1, 1]} : vector<3x32xf32> to vector<1x32xf32>
    %459 = vector.broadcast %458 : vector<1x32xf32> to vector<16x32xf32>
    %460 = arith.addf %457, %459 : vector<16x32xf32>
    %c0_200 = arith.constant 0 : index
    %c0_201 = arith.constant 0 : index
    %461 = vector.load %arg25[%c0_200, %c0_201] : memref<16x32xf32, #tpu.memory_space<vmem>>, vector<16x32xf32>
    tpu.vector_store %arg25[%c0_200, %c0_201], %460 {strides = array<i32>} : memref<16x32xf32, #tpu.memory_space<vmem>>, vector<16x32xf32>,
    %c1_i32 = arith.constant 1 : i32
    %462 = arith.cmpi eq, %arg0, %c1_i32 : i32
    %463 = arith.extui %462 : i1 to i32
    %c0_i32_202 = arith.constant 0 : i32
    %464 = arith.cmpi ne, %463, %c0_i32_202 : i32
    scf.if %464 {
      %c0_203 = arith.constant 0 : index
      %c0_204 = arith.constant 0 : index
      %465 = vector.load %arg21[%c0_203, %c0_204] : memref<32x128xf32, #tpu.memory_space<vmem>>, vector<32x128xf32>
      %cst_205 = arith.constant dense<0.000000e+00> : vector<16x128xf32>
      %466 = tpu.matmul %460, %465, %cst_205 {dimension_numbers = #tpu.dot_dimension_numbers<[1], [0], [0], [1], [0, 0, 1, 1], [], []>} : vector<16x32xf32>, vector<32x128xf32>, vector<16x128xf32> -> vector<16x128xf32>
      %c0_206 = arith.constant 0 : index
      %c0_207 = arith.constant 0 : index
      %467 = vector.load %arg22[%c0_206, %c0_207] : memref<1x128xf32, #tpu.memory_space<vmem>>, vector<1x128xf32>
      %468 = vector.broadcast %467 : vector<1x128xf32> to vector<16x128xf32>
      %469 = arith.addf %466, %468 : vector<16x128xf32>
      %c0_208 = arith.constant 0 : index
      %c0_209 = arith.constant 0 : index
      %470 = vector.load %arg23[%c0_208, %c0_209] : memref<16x128xf32, #tpu.memory_space<vmem>>, vector<16x128xf32>
      tpu.vector_store %arg23[%c0_208, %c0_209], %469 {strides = array<i32>} : memref<16x128xf32, #tpu.memory_space<vmem>>, vector<16x128xf32>,
    } else {
    }
    return
  }
  func.func @transform_0(%arg0: i32) -> (i32, i32) {
    %c0_i32 = arith.constant 0 : i32
    %c0_i32_0 = arith.constant 0 : i32
    %c0_i32_1 = arith.constant 0 : i32
    return %c0_i32, %c0_i32_0 : i32, i32
  }
  func.func @transform_1(%arg0: i32) -> (i32, i32, i32) {
    %c0_i32 = arith.constant 0 : i32
    %c0_i32_0 = arith.constant 0 : i32
    %c0_i32_1 = arith.constant 0 : i32
    %c0_i32_2 = arith.constant 0 : i32
    return %c0_i32, %c0_i32_0, %c0_i32_1 : i32, i32, i32
  }
  func.func @transform_2(%arg0: i32) -> (i32, i32, i32, i32) {
    %c0_i32 = arith.constant 0 : i32
    %c0_i32_0 = arith.constant 0 : i32
    %c0_i32_1 = arith.constant 0 : i32
    %c0_i32_2 = arith.constant 0 : i32
    %c0_i32_3 = arith.constant 0 : i32
    return %c0_i32, %c0_i32_0, %c0_i32_1, %c0_i32_2 : i32, i32, i32, i32
  }
  func.func @transform_3(%arg0: i32) -> (i32, i32, i32, i32) {
    %c0_i32 = arith.constant 0 : i32
    %c0_i32_0 = arith.constant 0 : i32
    %c0_i32_1 = arith.constant 0 : i32
    %c0_i32_2 = arith.constant 0 : i32
    %c0_i32_3 = arith.constant 0 : i32
    return %c0_i32, %c0_i32_0, %c0_i32_1, %c0_i32_2 : i32, i32, i32, i32
  }
  func.func @transform_4(%arg0: i32) -> (i32, i32, i32) {
    %c0_i32 = arith.constant 0 : i32
    %c0_i32_0 = arith.constant 0 : i32
    %c0_i32_1 = arith.constant 0 : i32
    return %arg0, %c0_i32, %c0_i32_0 : i32, i32, i32
  }
  func.func @transform_5(%arg0: i32) -> (i32, i32, i32) {
    %c0_i32 = arith.constant 0 : i32
    %c0_i32_0 = arith.constant 0 : i32
    %c0_i32_1 = arith.constant 0 : i32
    return %arg0, %c0_i32, %c0_i32_0 : i32, i32, i32
  }
  func.func @transform_6(%arg0: i32) -> (i32, i32, i32) {
    %c0_i32 = arith.constant 0 : i32
    %c0_i32_0 = arith.constant 0 : i32
    %c0_i32_1 = arith.constant 0 : i32
    return %arg0, %c0_i32, %c0_i32_0 : i32, i32, i32
  }
  func.func @transform_7(%arg0: i32) -> (i32, i32, i32) {
    %c0_i32 = arith.constant 0 : i32
    %c0_i32_0 = arith.constant 0 : i32
    %c0_i32_1 = arith.constant 0 : i32
    return %arg0, %c0_i32, %c0_i32_0 : i32, i32, i32
  }
  func.func @transform_8(%arg0: i32) -> (i32, i32, i32) {
    %c0_i32 = arith.constant 0 : i32
    %c0_i32_0 = arith.constant 0 : i32
    %c0_i32_1 = arith.constant 0 : i32
    return %arg0, %c0_i32, %c0_i32_0 : i32, i32, i32
  }
  func.func @transform_9(%arg0: i32) -> (i32, i32, i32) {
    %c0_i32 = arith.constant 0 : i32
    %c0_i32_0 = arith.constant 0 : i32
    %c0_i32_1 = arith.constant 0 : i32
    return %arg0, %c0_i32, %c0_i32_0 : i32, i32, i32
  }
  func.func @transform_10(%arg0: i32) -> (i32, i32, i32) {
    %c0_i32 = arith.constant 0 : i32
    %c0_i32_0 = arith.constant 0 : i32
    %c0_i32_1 = arith.constant 0 : i32
    return %arg0, %c0_i32, %c0_i32_0 : i32, i32, i32
  }
  func.func @transform_11(%arg0: i32) -> (i32, i32, i32) {
    %c0_i32 = arith.constant 0 : i32
    %c0_i32_0 = arith.constant 0 : i32
    %c0_i32_1 = arith.constant 0 : i32
    return %arg0, %c0_i32, %c0_i32_0 : i32, i32, i32
  }
  func.func @transform_12(%arg0: i32) -> (i32, i32, i32) {
    %c0_i32 = arith.constant 0 : i32
    %c0_i32_0 = arith.constant 0 : i32
    %c0_i32_1 = arith.constant 0 : i32
    return %arg0, %c0_i32, %c0_i32_0 : i32, i32, i32
  }
  func.func @transform_13(%arg0: i32) -> (i32, i32, i32) {
    %c0_i32 = arith.constant 0 : i32
    %c0_i32_0 = arith.constant 0 : i32
    %c0_i32_1 = arith.constant 0 : i32
    return %arg0, %c0_i32, %c0_i32_0 : i32, i32, i32
  }
  func.func @transform_14(%arg0: i32) -> (i32, i32, i32) {
    %c0_i32 = arith.constant 0 : i32
    %c0_i32_0 = arith.constant 0 : i32
    %c0_i32_1 = arith.constant 0 : i32
    return %arg0, %c0_i32, %c0_i32_0 : i32, i32, i32
  }
  func.func @transform_15(%arg0: i32) -> (i32, i32, i32) {
    %c0_i32 = arith.constant 0 : i32
    %c0_i32_0 = arith.constant 0 : i32
    %c0_i32_1 = arith.constant 0 : i32
    return %arg0, %c0_i32, %c0_i32_0 : i32, i32, i32
  }
  func.func @transform_16(%arg0: i32) -> (i32, i32, i32) {
    %c0_i32 = arith.constant 0 : i32
    %c0_i32_0 = arith.constant 0 : i32
    %c0_i32_1 = arith.constant 0 : i32
    return %arg0, %c0_i32, %c0_i32_0 : i32, i32, i32
  }
  func.func @transform_17(%arg0: i32) -> (i32, i32, i32) {
    %c0_i32 = arith.constant 0 : i32
    %c0_i32_0 = arith.constant 0 : i32
    %c0_i32_1 = arith.constant 0 : i32
    return %arg0, %c0_i32, %c0_i32_0 : i32, i32, i32
  }
  func.func @transform_18(%arg0: i32) -> (i32, i32, i32) {
    %c0_i32 = arith.constant 0 : i32
    %c0_i32_0 = arith.constant 0 : i32
    %c0_i32_1 = arith.constant 0 : i32
    return %arg0, %c0_i32, %c0_i32_0 : i32, i32, i32
  }
  func.func @transform_19(%arg0: i32) -> (i32, i32, i32) {
    %c0_i32 = arith.constant 0 : i32
    %c0_i32_0 = arith.constant 0 : i32
    %c0_i32_1 = arith.constant 0 : i32
    return %arg0, %c0_i32, %c0_i32_0 : i32, i32, i32
  }
  func.func @transform_20(%arg0: i32) -> (i32, i32) {
    %c0_i32 = arith.constant 0 : i32
    %c0_i32_0 = arith.constant 0 : i32
    %c0_i32_1 = arith.constant 0 : i32
    return %c0_i32, %c0_i32_0 : i32, i32
  }
  func.func @transform_21(%arg0: i32) -> (i32, i32) {
    %c0_i32 = arith.constant 0 : i32
    %c0_i32_0 = arith.constant 0 : i32
    %c0_i32_1 = arith.constant 0 : i32
    return %c0_i32, %c0_i32_0 : i32, i32
  }
  func.func @transform_22(%arg0: i32) -> (i32, i32) {
    %c0_i32 = arith.constant 0 : i32
    %c0_i32_0 = arith.constant 0 : i32
    %c0_i32_1 = arith.constant 0 : i32
    return %c0_i32, %c0_i32_0 : i32, i32
  }
  func.func @transform_23(%arg0: i32) -> (i32, i32, i32, i32) {
    %c0_i32 = arith.constant 0 : i32
    %c0_i32_0 = arith.constant 0 : i32
    %c0_i32_1 = arith.constant 0 : i32
    %c0_i32_2 = arith.constant 0 : i32
    %c0_i32_3 = arith.constant 0 : i32
    return %c0_i32, %c0_i32_0, %c0_i32_1, %c0_i32_2 : i32, i32, i32, i32
  }
}

</mosaic_0001>

<bundles_post_ra>
// kernel: decoder_forward.1
= control target key start
LH: loop header
LB: loop body
LE: loop exit
PB: predicated region body
PF: predicated region fallthrough
CT: control target
= control target key end

     0   :  { %s6728_s0 = inlined_call_operand.vmem [shape: f32[16,32], index: 0, kind: input, shape index: {}]   ;;  %s6729_s1 = inlined_call_operand.vmem [shape: f32[2,10,32], index: 1, kind: input, shape index: {}]   ;;  %s6730_s2 = inlined_call_operand.vmem [shape: f32[2,1,8,8], index: 2, kind: input, shape index: {}]   ;;  %s6731_s3 = inlined_call_operand.vmem [shape: f32[2,1,1,10], index: 3, kind: input, shape index: {}]   ;;  %s6732_s4 = inlined_call_operand.vmem [shape: f32[2,32,96], index: 4, kind: input, shape index: {}]   ;;  %s6733_s5 = inlined_call_operand.vmem [shape: f32[2,1,96], index: 5, kind: input, shape index: {}]   ;;  %s6734_s6 = inlined_call_operand.vmem [shape: f32[2,32,32], index: 6, kind: input, shape index: {}]   ;;  %s6735_s7 = inlined_call_operand.vmem [shape: f32[2,1,32], index: 7, kind: input, shape index: {}]   ;;  %s6736_s8 = inlined_call_operand.vmem [shape: f32[2,32,32], index: 8, kind: input, shape index: {}]   ;;  %s6737_s9 = inlined_call_operand.vmem [shape: f32[2,1,32], index: 9, kind: input, shape index: {}]   ;;  %s6738_s10 = inlined_call_operand.vmem [shape: f32[2,32,64], index: 10, kind: input, shape index: {}]   ;;  %s6739_s11 = inlined_call_operand.vmem [shape: f32[2,1,64], index: 11, kind: input, shape index: {}]   ;;  %s6740_s12 = inlined_call_operand.vmem [shape: f32[2,32,32], index: 12, kind: input, shape index: {}]   ;;  %s6741_s13 = inlined_call_operand.vmem [shape: f32[2,1,32], index: 13, kind: input, shape index: {}]   ;;  %s6742_s14 = inlined_call_operand.vmem [shape: f32[2,32,64], index: 14, kind: input, shape index: {}]   ;;  %s6743_s15 = inlined_call_operand.vmem [shape: f32[2,1,64], index: 15, kind: input, shape index: {}]   ;;  %s6744_s16 = inlined_call_operand.vmem [shape: f32[2,64,32], index: 16, kind: input, shape index: {}]   ;;  %s6745_s17 = inlined_call_operand.vmem [shape: f32[2,1,32], index: 17, kind: input, shape index: {}]   ;;  %s6746_s18 = inlined_call_operand.vmem [shape: f32[2,3,32], index: 18, kind: input, shape index: {}]   ;;  %s6747_s19 = inlined_call_operand.vmem [shape: f32[2,3,32], index: 19, kind: input, shape index: {}]   ;;  %s6748_s20 = inlined_call_operand.vmem [shape: f32[32,128], index: 20, kind: input, shape index: {}]   ;;  %s6749_s21 = inlined_call_operand.vmem [shape: f32[1,128], index: 21, kind: input, shape index: {}]   ;;  %s6750_s22 = inlined_call_operand.vmem [shape: f32[16,128], index: 22, kind: output, shape index: {0}]   ;;  %s6751_s23 = inlined_call_operand.hbm [shape: f32[2,4,8,10], index: 23, kind: output, shape index: {1}]  }
   0x1   :  { %6764 = sst [smem:[#allocation8_spill]] %s6728_s0 }
   0x2   :  { %6765 = sst [smem:[#allocation9_spill]] %s6729_s1 }
   0x3   :  { %6766 = sst [smem:[#allocation10_spill]] %s6730_s2 }
   0x4   :  { %6767 = sst [smem:[#allocation11_spill]] %s6731_s3 }
   0x5   :  { %6768 = sst [smem:[#allocation12_spill]] %s6732_s4 }
   0x6   :  { %6769 = sst [smem:[#allocation13_spill]] %s6733_s5 }
   0x7   :  { %6770 = sst [smem:[#allocation14_spill]] %s6734_s6 }
   0x8   :  { %6771 = sst [smem:[#allocation15_spill]] %s6735_s7 }
   0x9   :  { %6772 = sst [smem:[#allocation16_spill]] %s6736_s8 }
   0xa   :  { %6773 = sst [smem:[#allocation17_spill]] %s6738_s10 }
   0xb   :  { %6774 = sst [smem:[#allocation18_spill]] %s6740_s12 }
   0xc   :  { %6775 = sst [smem:[#allocation19_spill]] %s6746_s18 }
   0xd   :  { %6776 = sst [smem:[#allocation20_spill]] %s6747_s19 }
   0xe   :  { %6777 = sst [smem:[#allocation21_spill]] %s6748_s20 }
   0xf   :  { %6778 = sst [smem:[#allocation22_spill]] %s6749_s21 }
  0x10   :  { %6779 = sst [smem:[#allocation23_spill]] %s6750_s22 }
  0x11   :  { %6780 = sst [smem:[#allocation24_spill]] %s6751_s23 }
  0x12   :  { %29 = vsyncpa [#allocation4], 0  ;;  %s6010_s4 = smov 0  }
  0x13 LB: > { %6781 = sst [smem:[#allocation6_spill]] %s5868_s4  ;;  %s6016_s30 = sadd.s32 4294967295, %s5868_s4   ;;  %s5868_s4 = sphi %s6010_s4, %s35_s4  }
  0x14   : > { %6782 = sst [smem:[#allocation7_spill]] %s6016_s30  ;;  %p4947_p0 = scmp.ge.s32.totalorder %s5868_s4, 1 }
  0x15   : > { %p765_p1 = scmp.lt.s32.totalorder %s5868_s4, 3 }
  0x17   : > { %p766_p2 = pnand %p4947_p0, %p765_p1 }
  0x18   : > { %p883_p3 = scmp.lt.s32.totalorder (!%p766_p2), %s6016_s30, 1  ;;  %s6784_s7 = sld [smem:[#allocation12_spill]] (!%p766_p2) }
  0x19   : > { %769 = sbr.rel (%p766_p2) target bundleno = 7598 (0x1dae), region = 108  ;;  %s6785_s0 = sld [smem:[#allocation14_spill]] (!%p766_p2) }
  0x1a   : > { %s6787_s8 = sld [smem:[#allocation16_spill]] (!%p766_p2)  ;;  %s6788_s10 = sld [smem:[#allocation17_spill]] (!%p766_p2) }
  0x1b   : > { %s6789_s12 = sld [smem:[#allocation18_spill]] (!%p766_p2)  ;;  %s6790_s5 = sld [smem:[#allocation19_spill]] (!%p766_p2) }
  0x1c   : > { %s6791_s6 = sld [smem:[#allocation20_spill]] (!%p766_p2)  ;;  %s6792_s2 = sld [smem:[#allocation7_spill]] (!%p766_p2) }
  0x20   : > { %s6022_s24 = scalar_select %p883_p3, %s6016_s30, 1 }
  0x22   : > { %s5064_s25 = sshll.u32 %s6022_s24, 5  ;;  %s5070_s29 = sshll.u32 %s6022_s24, 6 }
  0x23   : > { %s887_s28 = scalar_lea.vmem %s6784_s7, %s5064_s25  ;;  %s6035_s4 = scalar_lea.vmem %s6785_s0, %s5064_s25 }
  0x24   : > { %s6044_s18 = scalar_lea.vmem %s6787_s8, %s5064_s25  ;;  %s6053_s7 = scalar_lea.vmem %s6788_s10, %s5064_s25 }
  0x25   : > { %s6062_s23 = scalar_lea.vmem %s6789_s12, %s5064_s25  ;;  %s6071_s26 = scalar_lea.vmem %s6742_s14, %s5064_s25 }
  0x26   : > { %s6081_s22 = scalar_lea.vmem %s6744_s16, %s5070_s29  ;;  %s4962_s30 = sshll.u32 %s6022_s24, 2 }
  0x27   : > { %s6091_s25 = scalar_lea.vmem %s6790_s5, %s4962_s30  ;;  %s6096_s27 = scalar_lea.vmem %s6791_s6, %s4962_s30 }
  0x28   : > { %p4964_p4 = scmp.ne.s32.totalorder %s6792_s2, 0 }
  0x29   : > { %s6793_s3 = sld [smem:[#allocation8_spill]] (!%p4964_p4)  ;;  %vm953_vm0 = vcmask (!%p4964_p4), 261120  }
  0x2a   : > { %950 = sbr.rel (%p4964_p4) target bundleno = 49 (0x31), region = 112 }
  0x2f   : > { %v951_v0 = vld [vmem:[%s6793_s3] sm:$0xff] (!%p4964_p4)  ;;  %v952_v1 = vld [vmem:[%s6793_s3 + $0x8] sm:$0xff] (!%p4964_p4) }
  0x30   : > { %954 = vst.msk [vmem:[#allocation2] sm:$0xff] (!%p4964_p4), %vm953_vm0, %v951_v0  ;;  %955 = vst.msk [vmem:[#allocation2 + $0x8] sm:$0xff] (!%p4964_p4), %vm953_vm0, %v952_v1 }
  0x31 PF: > { %v960_v2 = vld [vmem:[%s887_s28] sm:$0xff]  ;;  %v961_v3 = vld [vmem:[%s887_s28 + $0x8] sm:$0xff]  ;;  %v962_v4 = vld [vmem:[%s887_s28 + $0x10] sm:$0xff]  ;;  %vm971_vm1 = vcmask 261120   ;;  %v5870_v10 = vmov 0.0   ;;  %vm5871_vm2 = vmmov 0  }
  0x32   : > { %v5508_v5 = vpack.c.bf16 %v961_v3, %v960_v2  ;;  %v963_v6 = vld [vmem:[%s887_s28 + $0x18] sm:$0xff]  ;;  %5230 = vmatprep.subr.mxu0 %v5870_v10  ;;  %5232 = vmatprep.mubr.msk.f32.mxu0 %vm5871_vm2, %v5870_v10  ;;  %s6794_s20 = sld [smem:[#allocation13_spill]]  ;;  %s5872_s28 = smov 120   ;;  %vm1059_vm3 = vcmask 64512   ;;  %vm1733_vm6 = vcmask 130048   ;;  %vm1735_vm7 = vcmask 195584  }
  0x33   : > { %v5512_v8 = vpack.c.bf16 %v963_v6, %v962_v4  ;;  %s5873_s30 = smov 96   ;;  %s5874_s5 = smov 80   ;;  %vm6378_vm8 = vmpackc.low %vm1059_vm3, %vm1059_vm3  ;;  %vm2824_vm10 = vcmask 80896   ;;  %vm2845_vm11 = vcmask 1041408   ;;  %vm5887_vm12 = vmmov 1  }
  0x34   : > { %5509 = vmatprep.subr.bf16.mxu1 %v5508_v5  ;;  %s5875_s1 = smov 88   ;;  %s5876_s6 = smov 72   ;;  %vm6424_vm13 = vmpackc.low %vm2845_vm11, %vm5887_vm12  ;;  %vm4509_vm15 = vcmask 523264  }
  0x35   : > { %5511 = vmatpush3.bf16.msra.mxu1 %v5508_v5  ;;  %s5877_s0 = smov 112   ;;  %s5878_s29 = smov 104  }
  0x36   : > { %5513 = vmatprep.subr.bf16.mxu1 %v5512_v8  ;;  %s5879_s8 = smov 56   ;;  %s5880_s21 = smov 64  }
  0x37   : > { %v6105_v7 = vld [vmem:[#allocation2] sm:$0xff]  ;;  %v6109_v9 = vld [vmem:[#allocation2 + $0x8] sm:$0xff]  ;;  %s5881_s12 = smov 40   ;;  %s6762_s10 = smov 24  }
  0x38   : > { %5217 = vmatprep.mubr.msk.f32.mxu1 %vm971_vm1, %v6105_v7  ;;  %s6795_s2 = scalar_lea.vmem %s6794_s20, %s6022_s24  ;;  %s6796_s20 = sld [smem:[#allocation10_spill]] }
  0x39   : > { %5515 = vmatpush3.bf16.msra.mxu1 %v5512_v8  ;;  %v4965_v11 = vld [vmem:[%s6795_s2] ss:$0 sm:$0xff]  ;;  %s5882_s2 = smov 48  }
  0x3a   : > { %5220 = vmatprep.subr.mxu1 %v5870_v10 }
  0x3c   : > { %5218 = vmatmul.mubr.msk.f32.vlgmr.msra.gmra.mrb[0].mxu1 %vm971_vm1, %v6109_v9 }
  0x3d   : > { %5222 = vmatprep.mubr.msk.f32.mxu1 %vm5871_vm2, %v5870_v10 }
  0x3e   : > { %v1053_v31 = vld [vmem:[%s6796_s20] sm:$0xff]  ;;  %v1054_v44 = vld [vmem:[%s6796_s20 + $0x8] sm:$0xff] }
  0x3f   : > { %vm1055_vm4 = vcmp.eq.f32.partialorder %v1053_v31, 0.0  ;;  %vm1737_vm5 = vcmp.eq.f32.partialorder %v1054_v44, 0.0 }
 0x10f   : > { %v5219_v12 = vpop.f32.mrb[0].mxu1 }
 0x110   : > { %v1044_v13 = vpop.f32.mrb[1].mxu1  ;;  %v6138_v15 = vadd.f32 %v5219_v12, %v4965_v11 }
 0x111   : > { %v6124_v14 = vadd.f32 %v4965_v11, %v1044_v13 }
 0x113   : > { %1222 = vrot.lane.b32.xlu1 %v6124_v14, %s5872_s28  ;;  %1057 = vrot.lane.b32.xlu0 %v6124_v14, %s5873_s30 }
 0x117   : > { %1390 = vrot.lane.b32.xlu1 %v6124_v14, %s5874_s5  ;;  %1224 = vrot.lane.b32.xlu0 %v6124_v14, %s5875_s1 }
 0x11b   : > { %1556 = vrot.lane.b32.xlu1 %v6124_v14, %s5876_s6  ;;  %1388 = vrot.lane.b32.xlu0 %v6124_v14, %s5877_s0 }
 0x11f   : > { %1739 = vrot.lane.b32.xlu1 %v6138_v15, %s5873_s30  ;;  %1554 = vrot.lane.b32.xlu0 %v6124_v14, %s5878_s29 }
 0x123   : > { %1903 = vrot.lane.b32.xlu1 %v6138_v15, %s5872_s28  ;;  %1905 = vrot.lane.b32.xlu0 %v6138_v15, %s5875_s1 }
 0x127   : > { %2069 = vrot.lane.b32.xlu1 %v6138_v15, %s5877_s0  ;;  %2071 = vrot.lane.b32.xlu0 %v6138_v15, %s5874_s5 }
 0x12b   : > { %2235 = vrot.lane.b32.xlu1 %v6138_v15, %s5878_s29  ;;  %2237 = vrot.lane.b32.xlu0 %v6138_v15, %s5876_s6 }
 0x12f   : > { %1312 = vrot.lane.b32.xlu1 %v6124_v14, %s5879_s8  ;;  %1146 = vrot.lane.b32.xlu0 %v6124_v14, %s5880_s21 }
 0x185   : > { %v1223_v16 = vpop.permute.xlu1 %1222  ;;  %v1058_v17 = vpop.permute.xlu0 %1057 }
 0x186   : > { %5221 = vmatpush3.xpose.msk.msra.mxu1 %vm1059_vm3, %v1058_v17 }
 0x187   : > { %5225 = vmatprep.subr.mxu1 %v5870_v10 }
 0x189   : > { %v1391_v18 = vpop.permute.xlu1 %1390  ;;  %5223 = vmatmul.mubr.msk.f32.vlgmr.msra.gmra.mrb[2].mxu1 %vm1059_vm3, %v6124_v14  ;;  %v1225_v19 = vpop.permute.xlu0 %1224 }
 0x18a   : > { %5231 = vmatpush3.xpose.msk.msra.mxu0 %vm1059_vm3, %v1225_v19  ;;  %5227 = vmatprep.mubr.msk.f32.mxu1 %vm5871_vm2, %v5870_v10 }
 0x18b   : > { %5240 = vmatprep.subr.mxu0 %v5870_v10 }
 0x18d   : > { %v1557_v20 = vpop.permute.xlu1 %1556  ;;  %5233 = vmatmul.mubr.msk.f32.vlgmr.msra.gmra.mrb[0].mxu0 %vm1059_vm3, %v1223_v16  ;;  %v1389_v21 = vpop.permute.xlu0 %1388 }
 0x18e   : > { %5241 = vmatpush3.xpose.msk.msra.mxu0 %vm1059_vm3, %v1391_v18  ;;  %5242 = vmatprep.mubr.msk.f32.mxu0 %vm5871_vm2, %v5870_v10 }
 0x18f   : > { %5250 = vmatprep.subr.mxu0 %v5870_v10 }
 0x191   : > { %5243 = vmatmul.mubr.msk.f32.vlgmr.msra.gmra.mrb[2].mxu0 %vm1059_vm3, %v1389_v21  ;;  %v1555_v22 = vpop.permute.xlu0 %1554  ;;  %v1740_v23 = vpop.permute.xlu1 %1739 }
 0x192   : > { %5251 = vmatpush3.xpose.msk.msra.mxu0 %vm1059_vm3, %v1557_v20  ;;  %5252 = vmatprep.mubr.msk.f32.mxu0 %vm5871_vm2, %v5870_v10 }
 0x193   : > { %5260 = vmatprep.subr.mxu0 %v5870_v10 }
 0x195   : > { %5253 = vmatmul.mubr.msk.f32.vlgmr.msra.gmra.mrb[4].mxu0 %vm1059_vm3, %v1555_v22  ;;  %v1906_v24 = vpop.permute.xlu0 %1905  ;;  %v1904_v25 = vpop.permute.xlu1 %1903 }
 0x196   : > { %5261 = vmatpush3.xpose.msk.msra.mxu0 %vm1059_vm3, %v1740_v23  ;;  %5262 = vmatprep.mubr.msk.f32.mxu0 %vm5871_vm2, %v5870_v10 }
 0x197   : > { %5270 = vmatprep.subr.mxu0 %v5870_v10 }
 0x199   : > { %5263 = vmatmul.mubr.msk.f32.vlgmr.msra.gmra.mrb[6].mxu0 %vm1059_vm3, %v6138_v15  ;;  %v2072_v26 = vpop.permute.xlu0 %2071  ;;  %v2070_v28 = vpop.permute.xlu1 %2069 }
 0x19a   : > { %5271 = vmatpush3.xpose.msk.msra.mxu0 %vm1059_vm3, %v1906_v24  ;;  %5272 = vmatprep.mubr.msk.f32.mxu0 %vm5871_vm2, %v5870_v10 }
 0x19b   : > { %5280 = vmatprep.subr.mxu0 %v5870_v10 }
 0x19d   : > { %5273 = vmatmul.mubr.msk.f32.vlgmr.msra.gmra.mrb[8].mxu0 %vm1059_vm3, %v1904_v25  ;;  %v2238_v27 = vpop.permute.xlu0 %2237  ;;  %v2236_v30 = vpop.permute.xlu1 %2235 }
 0x19e   : > { %5281 = vmatpush3.xpose.msk.msra.mxu0 %vm1059_vm3, %v2072_v26  ;;  %5282 = vmatprep.mubr.msk.f32.mxu0 %vm5871_vm2, %v5870_v10 }
 0x19f   : > { %5290 = vmatprep.subr.mxu0 %v5870_v10 }
 0x1a1   : > { %5283 = vmatmul.mubr.msk.f32.vlgmr.msra.gmra.mrb[10].mxu0 %vm1059_vm3, %v2070_v28  ;;  %v1147_v29 = vpop.permute.xlu0 %1146  ;;  %v6226_v1 = vpop.permute.xlu1 %1312 }
 0x1a2   : > { %5226 = vmatpush3.msra.mxu1 %v1147_v29  ;;  %5291 = vmatpush3.xpose.msk.msra.mxu0 %vm1059_vm3, %v2238_v27 }
 0x1a3   : > { %5292 = vmatprep.mubr.msk.f32.mxu0 %vm5871_vm2, %v5870_v10  ;;  %5235 = vmatprep.subr.mxu1 %v5870_v10 }
 0x1a5   : > { %5293 = vmatmul.mubr.msk.f32.vlgmr.msra.gmra.mrb[12].mxu0 %vm1059_vm3, %v2236_v30 }
 0x25c   : > { %v1130_v32 = vpop.f32.mrb[2].mxu1 }
 0x25d   : > { %v1134_v33 = vsel %vm1055_vm4, -1e+10, %v1130_v32  ;;  %v5224_v34 = vpop.f32.mrb[3].mxu1 }
 0x25e   : > { %v1135_v35 = vsel %vm1059_vm3, %v1134_v33, -inf }
 0x25f   : > { %1136 = vmax.xlane.f32.xlu0 %v1135_v35 }
 0x260   : > { %v1296_v36 = vpop.f32.mrb[0].mxu0 }
 0x261   : > { %v1300_v37 = vsel %vm1055_vm4, -1e+10, %v1296_v36  ;;  %v5234_v38 = vpop.f32.mrb[1].mxu0 }
 0x262   : > { %v1301_v39 = vsel %vm1059_vm3, %v1300_v37, -inf }
 0x263   : > { %1302 = vmax.xlane.f32.xlu1 %v1301_v39 }
 0x264   : > { %v1462_v40 = vpop.f32.mrb[2].mxu0 }
 0x265   : > { %v1466_v41 = vsel %vm1055_vm4, -1e+10, %v1462_v40  ;;  %v5244_v42 = vpop.f32.mrb[3].mxu0 }
 0x266   : > { %v1467_v43 = vsel %vm1059_vm3, %v1466_v41, -inf }
 0x267   : > { %1468 = vmax.xlane.f32.xlu0 %v1467_v43 }
 0x268   : > { %v1628_v45 = vpop.f32.mrb[4].mxu0 }
 0x269   : > { %v1632_v46 = vsel %vm1055_vm4, -1e+10, %v1628_v45  ;;  %v5254_v47 = vpop.f32.mrb[5].mxu0 }
 0x26a   : > { %v1633_v48 = vsel %vm1059_vm3, %v1632_v46, -inf }
 0x26b   : > { %1634 = vmax.xlane.f32.xlu0 %v1633_v48 }
 0x26c   : > { %v1811_v49 = vpop.f32.mrb[6].mxu0 }
 0x26d   : > { %v1815_v50 = vsel %vm1737_vm5, -1e+10, %v1811_v49  ;;  %v5264_v51 = vpop.f32.mrb[7].mxu0 }
 0x26e   : > { %v1816_v52 = vsel %vm1059_vm3, %v1815_v50, -inf }
 0x26f   : > { %1817 = vmax.xlane.f32.xlu1 %v1816_v52 }
 0x270   : > { %v1977_v53 = vpop.f32.mrb[8].mxu0 }
 0x271   : > { %v1981_v54 = vsel %vm1737_vm5, -1e+10, %v1977_v53  ;;  %v5274_v55 = vpop.f32.mrb[9].mxu0 }
 0x272   : > { %v1982_v56 = vsel %vm1059_vm3, %v1981_v54, -inf }
 0x273   : > { %1983 = vmax.xlane.f32.xlu0 %v1982_v56 }
 0x274   : > { %v2143_v57 = vpop.f32.mrb[10].mxu0 }
 0x275   : > { %v2147_v58 = vsel %vm1737_vm5, -1e+10, %v2143_v57  ;;  %v5284_v59 = vpop.f32.mrb[11].mxu0 }
 0x276   : > { %v2148_v60 = vsel %vm1059_vm3, %v2147_v58, -inf }
 0x277   : > { %2149 = vmax.xlane.f32.xlu1 %v2148_v60 }
 0x278   : > { %v2309_v61 = vpop.f32.mrb[12].mxu0 }
 0x279   : > { %v2313_v62 = vsel %vm1737_vm5, -1e+10, %v2309_v61  ;;  %v5294_v63 = vpop.f32.mrb[13].mxu0 }
 0x27a   : > { %v2314_v0 = vsel %vm1059_vm3, %v2313_v62, -inf }
 0x27b   : > { %2315 = vmax.xlane.f32.xlu0 %v2314_v0 }
 0x288   : > { %1644 = vrot.lane.b32.xlu1 %v6124_v14, %s5881_s12 }
 0x291   : > { %1478 = vrot.lane.b32.xlu0 %v6124_v14, %s5882_s2 }
 0x2ec   : > { %v1137_v2 = vpop.xlane.xlu0 %1136 }
 0x2ed   : > { %v1138_v3 = vsub.f32 %v1134_v33, %v1137_v2 }
 0x2ef   : > { %v1139_v4 = vmul.f32 1.442695, %v1138_v3 }
 0x2f0   : > { %v1303_v5 = vpop.xlane.xlu1 %1302 }
 0x2f1   : > { %5756 = vpow2.f32 %v1139_v4  ;;  %v1304_v6 = vsub.f32 %v1300_v37, %v1303_v5 }
 0x2f3   : > { %v1305_v8 = vmul.f32 1.442695, %v1304_v6 }
 0x2f4   : > { %v1469_v11 = vpop.xlane.xlu0 %1468 }
 0x2f5   : > { %5758 = vpow2.f32 %v1305_v8  ;;  %v1470_v12 = vsub.f32 %v1466_v41, %v1469_v11 }
 0x2f7   : > { %v1471_v13 = vmul.f32 1.442695, %v1470_v12 }
 0x2f8   : > { %v1635_v16 = vpop.xlane.xlu0 %1634 }
 0x2f9   : > { %5760 = vpow2.f32 %v1471_v13  ;;  %v1636_v17 = vsub.f32 %v1632_v46, %v1635_v16 }
 0x2fb   : > { %v5757_v18 = vpop.eup %5756  ;;  %v1637_v19 = vmul.f32 1.442695, %v1636_v17 }
 0x2fc   : > { %v1141_v14 = vsel %vm1059_vm3, %v5757_v18, 0.0  ;;  %v1818_v26 = vpop.xlane.xlu1 %1817 }
 0x2fd   : > { %5762 = vpow2.f32 %v1637_v19  ;;  %1142 = vadd.xlane.f32.xlu1 %v1141_v14  ;;  %v1819_v27 = vsub.f32 %v1815_v50, %v1818_v26  ;;  %v2418_v26 = vld [vmem:[%s6035_s4 + $0x10] sm:$0xff] }
 0x2ff   : > { %v5759_v20 = vpop.eup %5758  ;;  %v1820_v31 = vmul.f32 1.442695, %v1819_v27  ;;  %v2419_v27 = vld [vmem:[%s6035_s4 + $0x18] sm:$0xff] }
 0x300   : > { %v1307_v21 = vsel %vm1059_vm3, %v5759_v20, 0.0  ;;  %v1984_v28 = vpop.xlane.xlu0 %1983 }
 0x301   : > { %1308 = vadd.xlane.f32.xlu0 %v1307_v21  ;;  %v1985_v30 = vsub.f32 %v1981_v54, %v1984_v28  ;;  %5764 = vpow2.f32 %v1820_v31  ;;  %v5520_v28 = vpack.c.bf16 %v2419_v27, %v2418_v26 }
 0x303   : > { %v5761_v22 = vpop.eup %5760  ;;  %v1986_v34 = vmul.f32 1.442695, %v1985_v30 }
 0x304   : > { %v1473_v23 = vsel %vm1059_vm3, %v5761_v22, 0.0  ;;  %v2150_v29 = vpop.xlane.xlu1 %2149 }
 0x305   : > { %1474 = vadd.xlane.f32.xlu1 %v1473_v23  ;;  %v2151_v32 = vsub.f32 %v2147_v58, %v2150_v29  ;;  %5766 = vpow2.f32 %v1986_v34  ;;  %v2416_v23 = vld [vmem:[%s6035_s4] sm:$0xff] }
 0x307   : > { %v6231_v24 = vpop.eup %5762  ;;  %v2152_v35 = vmul.f32 1.442695, %v2151_v32 }
 0x308   : > { %v1639_v25 = vsel %vm1059_vm3, %v6231_v24, 0.0  ;;  %v2316_v33 = vpop.xlane.xlu0 %2315  ;;  %v1645_v46 = vpop.permute.xlu1 %1644 }
 0x309   : > { %1640 = vadd.xlane.f32.xlu0 %v1639_v25  ;;  %v2317_v36 = vsub.f32 %v2313_v62, %v2316_v33  ;;  %5768 = vpow2.f32 %v2152_v35 }
 0x30b   : > { %v2318_v37 = vmul.f32 1.442695, %v2317_v36  ;;  %v5765_v38 = vpop.eup %5764 }
 0x30c   : > { %v1822_v40 = vsel %vm1059_vm3, %v5765_v38, 0.0  ;;  %v1479_v47 = vpop.permute.xlu0 %1478 }
 0x30d   : > { %5770 = vpow2.f32 %v2318_v37 }
 0x30f   : > { %v6239_v39 = vpop.eup %5766 }
 0x310   : > { %v1988_v43 = vsel %vm1059_vm3, %v6239_v39, 0.0 }
 0x313   : > { %v6242_v41 = vpop.eup %5768 }
 0x314   : > { %v2154_v42 = vsel %vm1059_vm3, %v6242_v41, 0.0 }
 0x316   : > { %1993 = vrot.lane.b32.xlu1 %v6138_v15, %s5879_s8  ;;  %s5883_s8 = smov 8  }
 0x317   : > { %v6248_v44 = vpop.eup %5770 }
 0x318   : > { %v2320_v45 = vsel %vm1059_vm3, %v6248_v44, 0.0 }
 0x31f   : > { %1827 = vrot.lane.b32.xlu0 %v6138_v15, %s5880_s21  ;;  %s5884_s21 = smov 16  }
 0x33a   : > { %1823 = vadd.xlane.f32.xlu1 %v1822_v40 }
 0x33e   : > { %2155 = vadd.xlane.f32.xlu1 %v2154_v42  ;;  %1989 = vadd.xlane.f32.xlu0 %v1988_v43 }
 0x342   : > { %2321 = vadd.xlane.f32.xlu1 %v2320_v45 }
 0x353   : > { %2325 = vrot.lane.b32.xlu1 %v6138_v15, %s5881_s12  ;;  %s6799_s12 = sld [smem:[#allocation9_spill]] }
 0x354   : > { %2159 = vrot.lane.b32.xlu0 %v6138_v15, %s5882_s2  ;;  %s6797_s2 = sld [smem:[#allocation15_spill]] }
 0x35a   : > { %s6798_s19 = scalar_lea.vmem %s6797_s2, %s6022_s24 }
 0x38a   : > { %v1143_v48 = vpop.xlane.xlu1 %1142 }
 0x38b   : > { %5772 = vrcp.f32 %v1143_v48 }
 0x38e   : > { %v1309_v49 = vpop.xlane.xlu0 %1308 }
 0x38f   : > { %5774 = vrcp.f32 %v1309_v49  ;;  %v4992_v49 = vld [vmem:[%s6798_s19] ss:$0 sm:$0xff]  ;;  %s6803_s19 = scalar_lea.vmem %s6737_s9, %s6022_s24 }
 0x392   : > { %v1475_v50 = vpop.xlane.xlu1 %1474 }
 0x393   : > { %5776 = vrcp.f32 %v1475_v50 }
 0x395   : > { %v5773_v51 = vpop.eup %5772 }
 0x396   : > { %v1145_v52 = vmul.f32 %v5773_v51, %v5757_v18  ;;  %v1641_v53 = vpop.xlane.xlu0 %1640  ;;  %v1994_v60 = vpop.permute.xlu1 %1993 }
 0x397   : > { %5778 = vrcp.f32 %v1641_v53 }
 0x398   : > { %5228 = vmatmul.mubr.msk.f32.vlgmr.msra.gmra.mrb[4].mxu1 %vm1059_vm3, %v1145_v52 }
 0x399   : > { %v5775_v54 = vpop.eup %5774  ;;  %5236 = vmatpush3.msra.mxu1 %v6226_v1  ;;  %5237 = vmatprep.mubr.msk.f32.mxu1 %vm5871_vm2, %v5870_v10 }
 0x39a   : > { %v1311_v15 = vmul.f32 %v5775_v54, %v5759_v20  ;;  %5245 = vmatprep.subr.mxu1 %v5870_v10  ;;  %v1828_v59 = vpop.permute.xlu0 %1827 }
 0x39c   : > { %5238 = vmatmul.mubr.msk.f32.vlgmr.msra.gmra.mrb[6].mxu1 %vm1059_vm3, %v1311_v15 }
 0x39d   : > { %v5777_v55 = vpop.eup %5776  ;;  %5246 = vmatpush3.msra.mxu1 %v1479_v47  ;;  %5247 = vmatprep.mubr.msk.f32.mxu1 %vm5871_vm2, %v5870_v10 }
 0x39e   : > { %v1477_v56 = vmul.f32 %v5777_v55, %v5761_v22  ;;  %5255 = vmatprep.subr.mxu1 %v5870_v10 }
 0x3a0   : > { %5248 = vmatmul.mubr.msk.f32.vlgmr.msra.gmra.mrb[8].mxu1 %vm1059_vm3, %v1477_v56 }
 0x3a1   : > { %v5779_v57 = vpop.eup %5778  ;;  %5256 = vmatpush3.msra.mxu1 %v1645_v46  ;;  %5257 = vmatprep.mubr.msk.f32.mxu1 %vm5871_vm2, %v5870_v10 }
 0x3a2   : > { %v1643_v58 = vmul.f32 %v5779_v57, %v6231_v24  ;;  %5265 = vmatprep.subr.mxu1 %v5870_v10  ;;  %v2417_v24 = vld [vmem:[%s6035_s4 + $0x8] sm:$0xff] }
 0x3a3   : > { %v5516_v25 = vpack.c.bf16 %v2417_v24, %v2416_v23 }
 0x3a4   : > { %5258 = vmatmul.mubr.msk.f32.vlgmr.msra.gmra.mrb[10].mxu1 %vm1059_vm3, %v1643_v58 }
 0x3a5   : > { %5266 = vmatpush3.msra.mxu1 %v1828_v59  ;;  %5267 = vmatprep.mubr.msk.f32.mxu1 %vm5871_vm2, %v5870_v10 }
 0x3a6   : > { %5275 = vmatprep.subr.mxu1 %v5870_v10  ;;  %5517 = vmatprep.subr.bf16.mxu0 %v5516_v25 }
 0x3a7   : > { %5519 = vmatpush3.bf16.msra.mxu0 %v5516_v25 }
 0x3a8   : > { %5521 = vmatprep.subr.bf16.mxu0 %v5520_v28 }
 0x3ab   : > { %5523 = vmatpush3.bf16.msra.mxu0 %v5520_v28 }
 0x3c7   : > { %v1824_v61 = vpop.xlane.xlu1 %1823 }
 0x3c8   : > { %5780 = vrcp.f32 %v1824_v61 }
 0x3cb   : > { %v2156_v62 = vpop.xlane.xlu1 %2155  ;;  %v1990_v63 = vpop.xlane.xlu0 %1989 }
 0x3cc   : > { %5782 = vrcp.f32 %v1990_v63 }
 0x3cd   : > { %5784 = vrcp.f32 %v2156_v62 }
 0x3cf   : > { %v2322_v0 = vpop.xlane.xlu1 %2321  ;;  %v2160_v6 = vpop.permute.xlu0 %2159 }
 0x3d0   : > { %5786 = vrcp.f32 %v2322_v0 }
 0x3d2   : > { %v5781_v1 = vpop.eup %5780 }
 0x3d3   : > { %v1826_v2 = vmul.f32 %v5781_v1, %v5765_v38  ;;  %v2326_v12 = vpop.permute.xlu1 %2325  ;;  %v2641_v1 = vld [vmem:[%s6053_s7] sm:$0xff] }
 0x3d5   : > { %5268 = vmatmul.mubr.msk.f32.vlgmr.msra.gmra.mrb[12].mxu1 %vm1059_vm3, %v1826_v2  ;;  %v2642_v2 = vld [vmem:[%s6053_s7 + $0x8] sm:$0xff] }
 0x3d6   : > { %5276 = vmatpush3.msra.mxu1 %v1994_v60  ;;  %5277 = vmatprep.mubr.msk.f32.mxu1 %vm5871_vm2, %v5870_v10  ;;  %v5783_v3 = vpop.eup %5782 }
 0x3d7   : > { %5285 = vmatprep.subr.mxu1 %v5870_v10  ;;  %v1992_v4 = vmul.f32 %v5783_v3, %v6239_v39  ;;  %v5785_v5 = vpop.eup %5784  ;;  %v6320_v3 = vpack.c.bf16 %v2642_v2, %v2641_v1 }
 0x3d8   : > { %v2158_v8 = vmul.f32 %v5785_v5, %v6242_v41  ;;  %v2644_v5 = vld [vmem:[%s6053_s7 + $0x18] sm:$0xff] }
 0x3d9   : > { %5278 = vmatmul.mubr.msk.f32.vlgmr.msra.gmra.mrb[14].mxu1 %vm1059_vm3, %v1992_v4  ;;  %5533 = vmatprep.subr.bf16.mxu0 %v6320_v3  ;;  %v2643_v4 = vld [vmem:[%s6053_s7 + $0x10] sm:$0xff] }
 0x3da   : > { %5286 = vmatpush3.msra.mxu1 %v2160_v6  ;;  %5287 = vmatprep.mubr.msk.f32.mxu1 %vm5871_vm2, %v5870_v10  ;;  %v5787_v11 = vpop.eup %5786  ;;  %v6326_v6 = vpack.c.bf16 %v2644_v5, %v2643_v4 }
 0x3db   : > { %5295 = vmatprep.subr.mxu1 %v5870_v10  ;;  %v2324_v13 = vmul.f32 %v5787_v11, %v6248_v44  ;;  %v2649_v11 = vld [vmem:[%s6799_s12 + $0x8] sm:$0x3] }
 0x3dd   : > { %5288 = vmatmul.mubr.msk.f32.vlgmr.msra.gmra.mrb[16].mxu1 %vm1059_vm3, %v2158_v8  ;;  %v2648_v8 = vld [vmem:[%s6799_s12] sm:$0xff] }
 0x3de   : > { %5296 = vmatpush3.msra.mxu1 %v2326_v12  ;;  %5297 = vmatprep.mubr.msk.f32.mxu1 %vm5871_vm2, %v5870_v10  ;;  %v2549_v12 = vld [vmem:[%s6044_s18] sm:$0xff] }
 0x3e1   : > { %5298 = vmatmul.mubr.msk.f32.vlgmr.msra.gmra.mrb[18].mxu1 %vm1059_vm3, %v2324_v13  ;;  %v2550_v13 = vld [vmem:[%s6044_s18 + $0x8] sm:$0xff] }
 0x46b   : > { %v1218_v16 = vpop.f32.mrb[4].mxu1 }
 0x46c   : > { %v5229_v17 = vpop.f32.mrb[5].mxu1 }
 0x46d   : > { %v2551_v17 = vld [vmem:[%s6044_s18 + $0x10] sm:$0xff] }
 0x46f   : > { %v1384_v18 = vpop.f32.mrb[6].mxu1 }
 0x470   : > { %1721 = vrot.lane.b32.xlu0 %v1384_v18, %s5883_s8  ;;  %v5239_v19 = vpop.f32.mrb[7].mxu1  ;;  %v2552_v18 = vld [vmem:[%s6044_s18 + $0x18] sm:$0xff]  ;;  %s6804_s18 = sld [smem:[#allocation11_spill]] }
 0x471   : > { %v5528_v19 = vpack.c.bf16 %v2552_v18, %v2551_v17 }
 0x473   : > { %v1550_v14 = vpop.f32.mrb[8].mxu1 }
 0x474   : > { %1725 = vrot.lane.b32.xlu1 %v1550_v14, %s5884_s21  ;;  %v5249_v20 = vpop.f32.mrb[9].mxu1  ;;  %v5886_v14 = vmov 0.0|0.0  }
 0x477   : > { %v1716_v21 = vpop.f32.mrb[10].mxu1 }
 0x478   : > { %1729 = vrot.lane.b32.xlu1 %v1716_v21, %s6762_s10  ;;  %v5259_v22 = vpop.f32.mrb[11].mxu1 }
 0x479   : > { %v2537_v22 = vlaneseq }
 0x47b   : > { %v6346_v26 = vshrl.u32 %v2537_v22, 7 }
 0x47d   : > { %v2539_v28 = vsub.s32 0, %v6346_v26 }
 0x4a8   : > { %v1899_v29 = vpop.f32.mrb[12].mxu1 }
 0x4a9   : > { %v5269_v30 = vpop.f32.mrb[13].mxu1 }
 0x4aa   : > { %v6353_v30 = vld [vmem:[%s6096_s27] sm:$0x7] }
 0x4ac   : > { %v2065_v31 = vpop.f32.mrb[14].mxu1 }
 0x4ad   : > { %2402 = vrot.lane.b32.xlu0 %v2065_v31, %s5883_s8  ;;  %v5279_v32 = vpop.f32.mrb[15].mxu1 }
 0x4b0   : > { %v2231_v33 = vpop.f32.mrb[16].mxu1 }
 0x4b1   : > { %2406 = vrot.lane.b32.xlu0 %v2231_v33, %s5884_s21  ;;  %v5289_v34 = vpop.f32.mrb[17].mxu1 }
 0x4b2   : > { %v2546_v34 = vrot.slane %v6353_v30, %v2539_v28 }
 0x4b4   : > { %v2397_v35 = vpop.f32.mrb[18].mxu1 }
 0x4b5   : > { %2410 = vrot.lane.b32.xlu1 %v2397_v35, %s6762_s10  ;;  %v5299_v36 = vpop.f32.mrb[19].mxu1 }
 0x4e2   : > { %v1722_v37 = vpop.permute.xlu0 %1721 }
 0x4e3   : > { %v1732_v39 = vsel %vm1059_vm3, %v1218_v16, %v1722_v37  ;;  %v5524_v16 = vpack.c.bf16 %v2550_v13, %v2549_v12  ;;  %v4270_v12 = vld [vmem:[%s6062_s23 + $0x10] sm:$0xff] }
 0x4e5   : > { %5525 = vmatprep.subr.bf16.mxu1 %v5524_v16 }
 0x4e6   : > { %v1726_v38 = vpop.permute.xlu1 %1725  ;;  %5527 = vmatpush3.bf16.msra.mxu1 %v5524_v16 }
 0x4e7   : > { %v1734_v40 = vsel %vm1733_vm6, %v1732_v39, %v1726_v38  ;;  %5529 = vmatprep.subr.bf16.mxu1 %v5528_v19 }
 0x4ea   : > { %v1730_v41 = vpop.permute.xlu1 %1729  ;;  %5531 = vmatpush3.bf16.msra.mxu1 %v5528_v19 }
 0x4eb   : > { %v1736_v42 = vsel %vm1735_vm7, %v1734_v40, %v1730_v41  ;;  %5540 = vmatprep.subr.bf16.mxu1 %v5886_v14 }
 0x4ec   : > { %5308 = vmatprep.mubr.msk.f32.mxu0 %vm971_vm1, %v1736_v42 }
 0x51f   : > { %v2403_v43 = vpop.permute.xlu0 %2402 }
 0x520   : > { %v2413_v45 = vsel %vm1059_vm3, %v1899_v29, %v2403_v43  ;;  %v6350_v29 = vld [vmem:[%s6091_s25] sm:$0x7]  ;;  %s6800_s25 = scalar_lea.vmem %s6739_s11, %s6022_s24 }
 0x521   : > { %v2540_v31 = vrot.slane %v6350_v29, %v2539_v28  ;;  %v6372_v41 = vld [vmem:[%s6800_s25] ss:$0 sm:$0xff] }
 0x523   : > { %v2407_v44 = vpop.permute.xlu0 %2406 }
 0x524   : > { %v2414_v46 = vsel %vm1733_vm6, %v2413_v45, %v2407_v44 }
 0x527   : > { %v2411_v47 = vpop.permute.xlu1 %2410 }
 0x528   : > { %v2415_v48 = vsel %vm1735_vm7, %v2414_v46, %v2411_v47 }
 0x529   : > { %5309 = vmatmul.mubr.msk.f32.vlgmr.msra.gmra.mrb[14].mxu0 %vm971_vm1, %v2415_v48 }
 0x52a   : > { %5535 = vmatpush3.bf16.msra.mxu0 %v6320_v3  ;;  %5330 = vmatprep.mubr.msk.f32.mxu0 %vm971_vm1, %v2648_v8 }
 0x52b   : > { %5537 = vmatprep.subr.bf16.mxu0 %v6326_v6 }
 0x52e   : > { %5539 = vmatpush3.bf16.msra.mxu0 %v6326_v6 }
 0x52f   : > { %5544 = vmatprep.subr.bf16.mxu0 %v5886_v14 }
 0x531   : > { %5331 = vmatmul.mubr.msk.f32.vlgmr.msra.gmra.mrb[16].mxu0 %vm971_vm1, %v2649_v11 }
 0x532   : > { %5344 = vmatprep.mubr.msk.f32.mxu0 %vm5871_vm2, %v5870_v10 }
 0x5fc   : > { %v5310_v50 = vpop.f32.mrb[14].mxu0 }
 0x5fd   : > { %v2505_v51 = vadd.f32 %v5310_v50, %v4992_v49  ;;  %v2499_v52 = vpop.f32.mrb[15].mxu0 }
 0x5fe   : > { %v2500_v53 = vadd.f32 %v4992_v49, %v2499_v52  ;;  %v4995_v52 = vld [vmem:[%s6803_s19] ss:$0 sm:$0xff] }
 0x5ff   : > { %v2509_v54 = vadd.f32 %v2505_v51, %v6109_v9 }
 0x600   : > { %v2508_v15 = vadd.f32 %v2500_v53, %v6105_v7 }
 0x601   : > { %v2513_v55 = vsel %vm971_vm1, %v2509_v54, 0.0 }
 0x602   : > { %2514 = vadd.xlane.f32.xlu1 %v2513_v55  ;;  %v2510_v56 = vsel %vm971_vm1, %v2508_v15, 0.0 }
 0x603   : > { %2511 = vadd.xlane.f32.xlu0 %v2510_v56 }
 0x604   : > { %v5332_v42 = vpop.f32.mrb[16].mxu0 }
 0x605   : > { %v2734_v43 = vadd.f32 %v5332_v42, %v6372_v41  ;;  %v2728_v44 = vpop.f32.mrb[17].mxu0 }
 0x606   : > { %v2729_v45 = vadd.f32 %v6372_v41, %v2728_v44 }
 0x608   : > { %v6382_v47 = vpack.i.bf16 %v2734_v43, %v2729_v45  ;;  %v5541_v48 = vpack.c.bf16 %v2734_v43, %v2729_v45 }
 0x613   : > { %5687 = vrot.lane.b32.xlu1 %v6382_v47, %s5872_s28 }
 0x68f   : > { %v2515_v57 = vpop.xlane.xlu1 %2514 }
 0x690   : > { %v2518_v58 = vmul.f32 0.03125, %v2515_v57  ;;  %v2512_v59 = vpop.xlane.xlu0 %2511 }
 0x691   : > { %v2517_v60 = vmul.f32 0.03125, %v2512_v59 }
 0x692   : > { %v2520_v61 = vsub.f32 %v2509_v54, %v2518_v58  ;;  %v6413_v58 = vld [vmem:[%s6804_s18] ss:$0 sm:$0xff] }
 0x693   : > { %v2519_v62 = vsub.f32 %v2508_v15, %v2517_v60  ;;  %v5688_v49 = vpop.permute.xlu1 %5687  ;;  %vm2743_vm9 = vcmp.eq.f32.partialorder %v6413_v58, 0.0 }
 0x694   : > { %v2522_v7 = vmul.f32 %v2520_v61, %v2520_v61  ;;  %v5690_v50 = vunpack.i.h.bf16 %v5688_v49  ;;  %v5689_v51 = vunpack.i.l.bf16 %v5688_v49 }
 0x695   : > { %v2521_v63 = vmul.f32 %v2519_v62, %v2519_v62 }
 0x696   : > { %v2526_v0 = vsel %vm971_vm1, %v2522_v7, 0.0  ;;  %v5549_v55 = vpack.c.bf16 %v5690_v50, %v5689_v51 }
 0x697   : > { %v2523_v9 = vsel %vm971_vm1, %v2521_v63, 0.0 }
 0x698   : > { %2524 = vadd.xlane.f32.xlu0 %v2523_v9 }
 0x69c   : > { %2527 = vadd.xlane.f32.xlu0 %v2526_v0 }
 0x725   : > { %v2525_v20 = vpop.xlane.xlu0 %2524 }
 0x726   : > { %v2529_v21 = vmul.f32 0.03125, %v2525_v20 }
 0x728   : > { %v2531_v23 = vadd.f32 1e-05, %v2529_v21 }
 0x729   : > { %v2528_v24 = vpop.xlane.xlu0 %2527 }
 0x72a   : > { %5788 = vrsqrt.f32 %v2531_v23  ;;  %v2530_v25 = vmul.f32 0.03125, %v2528_v24 }
 0x72c   : > { %v2532_v27 = vadd.f32 1e-05, %v2530_v25 }
 0x72e   : > { %5790 = vrsqrt.f32 %v2532_v27 }
 0x734   : > { %v5789_v32 = vpop.eup %5788 }
 0x735   : > { %v2535_v33 = vmul.f32 %v5789_v32, %v2519_v62 }
 0x737   : > { %v2541_v35 = vmul.f32 %v2540_v31, %v2535_v33 }
 0x738   : > { %v5791_v36 = vpop.eup %5790 }
 0x739   : > { %v2536_v37 = vmul.f32 %v5791_v36, %v2520_v61  ;;  %v6357_v38 = vadd.f32 %v2546_v34, %v2541_v35 }
 0x73b   : > { %v2542_v39 = vmul.f32 %v2540_v31, %v2536_v37  ;;  %5319 = vmatprep.mubr.msk.f32.mxu1 %vm971_vm1, %v6357_v38 }
 0x73d   : > { %v6361_v40 = vadd.f32 %v2546_v34, %v2542_v39 }
 0x73f   : > { %5320 = vmatmul.mubr.msk.f32.vlgmr.msra.gmra.mrb[20].mxu1 %vm971_vm1, %v6361_v40 }
 0x740   : > { %5337 = vmatprep.mubr.msk.f32.mxu1 %vm5871_vm2, %v5870_v10  ;;  %5543 = vmatpush3.bf16.xpose.msk.msra.mxu1 %vm6378_vm8, %v5541_v48 }
 0x741   : > { %5548 = vmatprep.subr.bf16.mxu1 %v5886_v14 }
 0x812   : > { %v5321_v53 = vpop.f32.mrb[20].mxu1 }
 0x813   : > { %v6394_v54 = vadd.f32 %v5321_v53, %v4995_v52  ;;  %v2632_v15 = vpop.f32.mrb[21].mxu1 }
 0x814   : > { %v6396_v56 = vadd.f32 %v4995_v52, %v2632_v15 }
 0x816   : > { %2918 = vrot.lane.b32.xlu0 %v6396_v56, %s5872_s28  ;;  %5338 = vmatmul.mubr.msk.f32.vlgmr.msra.gmra.mrb[22].mxu1 %vm1059_vm3, %v6396_v56 }
 0x817   : > { %5551 = vmatpush3.bf16.xpose.msk.msra.mxu1 %vm6378_vm8, %v5549_v55  ;;  %5351 = vmatprep.mubr.msk.f32.mxu1 %vm5871_vm2, %v5870_v10 }
 0x818   : > { %5560 = vmatprep.subr.bf16.mxu1 %v5886_v14 }
 0x888   : > { %v2919_v57 = vpop.permute.xlu0 %2918 }
 0x889   : > { %5352 = vmatmul.mubr.msk.f32.vlgmr.msra.gmra.mrb[24].mxu1 %vm1059_vm3, %v2919_v57 }
 0x88a   : > { %5372 = vmatprep.mubr.msk.f32.mxu1 %vm5871_vm2, %v5870_v10 }
 0x8e9   : > { %v2819_v59 = vpop.f32.mrb[22].mxu1 }
 0x8ea   : > { %v2823_v60 = vsel %vm2743_vm9, -1e+10, %v2819_v59  ;;  %v5339_v61 = vpop.f32.mrb[23].mxu1 }
 0x8eb   : > { %v2825_v62 = vsel %vm2824_vm10, %v2823_v60, -inf }
 0x8ec   : > { %2826 = vmax.xlane.f32.xlu1 %v2825_v62 }
 0x8fd   : > { %5692 = vrot.lane.b32.xlu1 %v6382_v47, %s5873_s30 }
 0x95c   : > { %v2996_v63 = vpop.f32.mrb[24].mxu1 }
 0x95d   : > { %v3000_v9 = vsel %vm2743_vm9, -1e+10, %v2996_v63  ;;  %v5353_v7 = vpop.f32.mrb[25].mxu1 }
 0x95e   : > { %v3001_v0 = vsel %vm2824_vm10, %v3000_v9, -inf }
 0x95f   : > { %3002 = vmax.xlane.f32.xlu0 %v3001_v0 }
 0x979   : > { %v2827_v1 = vpop.xlane.xlu1 %2826 }
 0x97a   : > { %v2828_v2 = vsub.f32 %v2823_v60, %v2827_v1 }
 0x97c   : > { %v2829_v4 = vmul.f32 1.442695, %v2828_v2 }
 0x97d   : > { %v5693_v5 = vpop.permute.xlu1 %5692 }
 0x97e   : > { %5792 = vpow2.f32 %v2829_v4  ;;  %v5695_v8 = vunpack.i.h.bf16 %v5693_v5  ;;  %v5694_v11 = vunpack.i.l.bf16 %v5693_v5 }
 0x980   : > { %v5545_v13 = vpack.c.bf16 %v5695_v8, %v5694_v11 }
 0x982   : > { %5547 = vmatpush3.bf16.msk.msra.mxu0 %vm6424_vm13, %v5545_v13 }
 0x983   : > { %5552 = vmatprep.subr.bf16.mxu0 %v5886_v14 }
 0x988   : > { %v5793_v16 = vpop.eup %5792 }
 0x989   : > { %v2831_v17 = vsel %vm2824_vm10, %v5793_v16, 0.0 }
 0x98a   : > { %2832 = vadd.xlane.f32.xlu1 %v2831_v17 }
 0x99b   : > { %5702 = vrot.lane.b32.xlu1 %v6382_v47, %s5877_s0 }
 0x99f   : > { %3094 = vrot.lane.b32.xlu1 %v6396_v56, %s5877_s0 }
 0x9ec   : > { %v3003_v18 = vpop.xlane.xlu0 %3002 }
 0x9ed   : > { %v3004_v19 = vsub.f32 %v3000_v9, %v3003_v18 }
 0x9ef   : > { %v3005_v20 = vmul.f32 1.442695, %v3004_v19 }
 0x9f1   : > { %5794 = vpow2.f32 %v3005_v20 }
 0x9fb   : > { %v5795_v21 = vpop.eup %5794 }
 0x9fc   : > { %v3007_v22 = vsel %vm2824_vm10, %v5795_v21, 0.0 }
 0x9fd   : > { %3008 = vadd.xlane.f32.xlu0 %v3007_v22 }
 0xa13   : > { %5697 = vrot.lane.b32.xlu0 %v6382_v47, %s5875_s1 }
 0xa17   : > { %v2833_v23 = vpop.xlane.xlu1 %2832 }
 0xa18   : > { %5796 = vrcp.f32 %v2833_v23 }
 0xa1b   : > { %v5703_v34 = vpop.permute.xlu1 %5702 }
 0xa1c   : > { %v5705_v36 = vunpack.i.h.bf16 %v5703_v34  ;;  %v5704_v37 = vunpack.i.l.bf16 %v5703_v34  ;;  %v5022_v34 = vld [vmem:[%s6799_s12 + $0x10] sm:$0xff] }
 0xa1e   : > { %v5557_v42 = vpack.c.bf16 %v5705_v36, %v5704_v37 }
 0xa1f   : > { %v3095_v43 = vpop.permute.xlu1 %3094 }
 0xa22   : > { %v5797_v24 = vpop.eup %5796 }
 0xa23   : > { %v2835_v25 = vmul.f32 %v5797_v24, %v5793_v16 }
 0xa25   : > { %2836 = vst.msk [vmem:[#allocation3] sm:$0xff] %vm2824_vm10, %v2835_v25  ;;  %5345 = vmatmul.mubr.msk.f32.vlgmr.msra.gmra.mrb[18].mxu0 %vm2824_vm10, %v2835_v25 }
 0xa26   : > { %5358 = vmatprep.mubr.msk.f32.mxu0 %vm5871_vm2, %v5870_v10 }
 0xa8a   : > { %v3009_v27 = vpop.xlane.xlu0 %3008 }
 0xa8b   : > { %5798 = vrcp.f32 %v3009_v27 }
 0xa8e   : > { %v5698_v28 = vpop.permute.xlu0 %5697 }
 0xa8f   : > { %v5700_v31 = vunpack.i.h.bf16 %v5698_v28  ;;  %v5699_v32 = vunpack.i.l.bf16 %v5698_v28 }
 0xa91   : > { %v5553_v33 = vpack.c.bf16 %v5700_v31, %v5699_v32 }
 0xa93   : > { %5555 = vmatpush3.bf16.msk.msra.mxu0 %vm6424_vm13, %v5553_v33 }
 0xa94   : > { %5556 = vmatprep.subr.bf16.mxu0 %v5886_v14 }
 0xa95   : > { %v5799_v35 = vpop.eup %5798 }
 0xa96   : > { %v3011_v39 = vmul.f32 %v5799_v35, %v5795_v21 }
 0xa98   : > { %3013 = vst.msk [vmem:[#allocation3 + $0x8] sm:$0xff] %vm2824_vm10, %v3011_v39  ;;  %5359 = vmatmul.mubr.msk.f32.vlgmr.msra.gmra.mrb[20].mxu0 %vm2824_vm10, %v3011_v39 }
 0xa99   : > { %5365 = vmatprep.mubr.msk.f32.mxu0 %vm5871_vm2, %v5870_v10 }
 0xa9c   : > { %5559 = vmatpush3.bf16.xpose.msk.msra.mxu0 %vm6378_vm8, %v5557_v42 }
 0xa9d   : > { %5568 = vmatprep.subr.bf16.mxu0 %v5886_v14 }
 0xaa3   : > { %5366 = vmatmul.mubr.msk.f32.vlgmr.msra.gmra.mrb[22].mxu0 %vm1059_vm3, %v3095_v43 }
 0xaa4   : > { %5386 = vmatprep.mubr.msk.f32.mxu0 %vm5871_vm2, %v5870_v10 }
 0xaf8   : > { %v6456_v44 = vpop.f32.mrb[18].mxu0 }
 0xaf9   : > { %v5346_v45 = vpop.f32.mrb[19].mxu0 }
 0xb6b   : > { %v6458_v48 = vpop.f32.mrb[20].mxu0 }
 0xb6c   : > { %v5360_v49 = vpop.f32.mrb[21].mxu0 }
 0xb76   : > { %v3172_v50 = vpop.f32.mrb[22].mxu0 }
 0xb77   : > { %v3176_v51 = vsel %vm2743_vm9, -1e+10, %v3172_v50  ;;  %v5367_v52 = vpop.f32.mrb[23].mxu0 }
 0xb78   : > { %v3177_v53 = vsel %vm2824_vm10, %v3176_v51, -inf  ;;  %v6536_v52 = vld [vmem:[%s6804_s18 + $0x1] ss:$0 sm:$0xff] }
 0xb79   : > { %3178 = vmax.xlane.f32.xlu0 %v3177_v53  ;;  %vm3551_vm14 = vcmp.eq.f32.partialorder %v6536_v52, 0.0 }
 0xb8f   : > { %5707 = vrot.lane.b32.xlu0 %v6382_v47, %s5874_s5 }
 0xb93   : > { %3270 = vrot.lane.b32.xlu0 %v6396_v56, %s5878_s29 }
 0xc06   : > { %v3179_v15 = vpop.xlane.xlu0 %3178 }
 0xc07   : > { %v3180_v55 = vsub.f32 %v3176_v51, %v3179_v15 }
 0xc09   : > { %v3181_v57 = vmul.f32 1.442695, %v3180_v55 }
 0xc0a   : > { %v5708_v59 = vpop.permute.xlu0 %5707 }
 0xc0b   : > { %5800 = vpow2.f32 %v3181_v57  ;;  %v5710_v60 = vunpack.i.h.bf16 %v5708_v59  ;;  %v5709_v61 = vunpack.i.l.bf16 %v5708_v59 }
 0xc0d   : > { %v5561_v62 = vpack.c.bf16 %v5710_v60, %v5709_v61 }
 0xc0e   : > { %v3271_v8 = vpop.permute.xlu0 %3270 }
 0xc0f   : > { %5563 = vmatpush3.bf16.msk.msra.mxu1 %vm6424_vm13, %v5561_v62 }
 0xc10   : > { %5564 = vmatprep.subr.bf16.mxu1 %v5886_v14 }
 0xc15   : > { %v5801_v63 = vpop.eup %5800 }
 0xc16   : > { %v3183_v9 = vsel %vm2824_vm10, %v5801_v63, 0.0 }
 0xc17   : > { %3184 = vadd.xlane.f32.xlu1 %v3183_v9 }
 0xc28   : > { %5712 = vrot.lane.b32.xlu1 %v6382_v47, %s5878_s29 }
 0xca4   : > { %v3185_v56 = vpop.xlane.xlu1 %3184 }
 0xca5   : > { %5802 = vrcp.f32 %v3185_v56 }
 0xca8   : > { %v5713_v7 = vpop.permute.xlu1 %5712 }
 0xca9   : > { %v5715_v0 = vunpack.i.h.bf16 %v5713_v7  ;;  %v5714_v1 = vunpack.i.l.bf16 %v5713_v7 }
 0xcab   : > { %v5565_v5 = vpack.c.bf16 %v5715_v0, %v5714_v1 }
 0xcaf   : > { %v5803_v2 = vpop.eup %5802 }
 0xcb0   : > { %v3187_v4 = vmul.f32 %v5803_v2, %v5801_v63 }
 0xcb2   : > { %3189 = vst.msk [vmem:[#allocation3 + $0x10] sm:$0xff] %vm2824_vm10, %v3187_v4  ;;  %5373 = vmatmul.mubr.msk.f32.vlgmr.msra.gmra.mrb[26].mxu1 %vm2824_vm10, %v3187_v4 }
 0xcb3   : > { %5567 = vmatpush3.bf16.xpose.msk.msra.mxu1 %vm6378_vm8, %v5565_v5  ;;  %5379 = vmatprep.mubr.msk.f32.mxu1 %vm5871_vm2, %v5870_v10 }
 0xcb4   : > { %5580 = vmatprep.subr.bf16.mxu1 %v5886_v14 }
 0xcba   : > { %5380 = vmatmul.mubr.msk.f32.vlgmr.msra.gmra.mrb[28].mxu1 %vm1059_vm3, %v3271_v8 }
 0xcbb   : > { %5404 = vmatprep.mubr.msk.f32.mxu1 %vm5871_vm2, %v5870_v10 }
 0xd85   : > { %v6483_v11 = vpop.f32.mrb[26].mxu1 }
 0xd86   : > { %v5374_v13 = vpop.f32.mrb[27].mxu1 }
 0xd8d   : > { %v3348_v16 = vpop.f32.mrb[28].mxu1 }
 0xd8e   : > { %v3352_v17 = vsel %vm2743_vm9, -1e+10, %v3348_v16  ;;  %v5381_v18 = vpop.f32.mrb[29].mxu1 }
 0xd8f   : > { %v3353_v19 = vsel %vm2824_vm10, %v3352_v17, -inf }
 0xd90   : > { %3354 = vmax.xlane.f32.xlu1 %v3353_v19 }
 0xe1d   : > { %v3355_v20 = vpop.xlane.xlu1 %3354 }
 0xe1e   : > { %v3356_v21 = vsub.f32 %v3352_v17, %v3355_v20 }
 0xe20   : > { %v3357_v22 = vmul.f32 1.442695, %v3356_v21 }
 0xe22   : > { %5804 = vpow2.f32 %v3357_v22 }
 0xe2c   : > { %v5805_v23 = vpop.eup %5804 }
 0xe2d   : > { %v3359_v24 = vsel %vm2824_vm10, %v5805_v23, 0.0 }
 0xe2e   : > { %3360 = vadd.xlane.f32.xlu0 %v3359_v24 }
 0xe44   : > { %5717 = vrot.lane.b32.xlu0 %v6382_v47, %s5876_s6  ;;  %v5023_v47 = vld [vmem:[%s6799_s12 + $0x18] sm:$0x3] }
 0xebb   : > { %v3361_v25 = vpop.xlane.xlu0 %3360 }
 0xebc   : > { %5806 = vrcp.f32 %v3361_v25 }
 0xebf   : > { %v5718_v27 = vpop.permute.xlu0 %5717 }
 0xec0   : > { %v5720_v58 = vunpack.i.h.bf16 %v5718_v27  ;;  %v5719_v28 = vunpack.i.l.bf16 %v5718_v27 }
 0xec2   : > { %v5569_v31 = vpack.c.bf16 %v5720_v58, %v5719_v28 }
 0xec4   : > { %5571 = vmatpush3.bf16.msk.msra.mxu0 %vm6424_vm13, %v5569_v31 }
 0xec5   : > { %5573 = vmatprep.subr.bf16.mxu0 %v6320_v3 }
 0xec6   : > { %v5807_v32 = vpop.eup %5806 }
 0xec7   : > { %v3363_v33 = vmul.f32 %v5807_v32, %v5805_v23 }
 0xec9   : > { %3365 = vst.msk [vmem:[#allocation3 + $0x18] sm:$0xff] %vm2824_vm10, %v3363_v33  ;;  %5387 = vmatmul.mubr.msk.f32.vlgmr.msra.gmra.mrb[24].mxu0 %vm2824_vm10, %v3363_v33 }
 0xeca   : > { %5575 = vmatpush3.bf16.msra.mxu0 %v6320_v3  ;;  %5397 = vmatprep.mubr.msk.f32.mxu0 %vm971_vm1, %v5022_v34 }
 0xecb   : > { %5577 = vmatprep.subr.bf16.mxu0 %v6326_v6 }
 0xece   : > { %5579 = vmatpush3.bf16.msra.mxu0 %v6326_v6 }
 0xecf   : > { %5584 = vmatprep.subr.bf16.mxu0 %v5886_v14 }
 0xed1   : > { %5398 = vmatmul.mubr.msk.f32.vlgmr.msra.gmra.mrb[26].mxu0 %vm971_vm1, %v5023_v47 }
 0xed2   : > { %5411 = vmatprep.mubr.msk.f32.mxu0 %vm5871_vm2, %v5870_v10 }
 0xf9c   : > { %v6510_v35 = vpop.f32.mrb[24].mxu0 }
 0xf9d   : > { %v5388_v3 = vpop.f32.mrb[25].mxu0 }
 0xfa4   : > { %v5399_v36 = vpop.f32.mrb[26].mxu0 }
 0xfa5   : > { %v3542_v37 = vadd.f32 %v5399_v36, %v6372_v41  ;;  %v3536_v39 = vpop.f32.mrb[27].mxu0 }
 0xfa6   : > { %v3537_v6 = vadd.f32 %v6372_v41, %v3536_v39 }
 0xfa8   : > { %v6514_v42 = vpack.i.bf16 %v3542_v37, %v3537_v6  ;;  %v5581_v43 = vpack.c.bf16 %v3542_v37, %v3537_v6 }
 0xfaa   : > { %5722 = vrot.lane.b32.xlu1 %v6514_v42, %s5872_s28  ;;  %5583 = vmatpush3.bf16.xpose.msk.msra.mxu1 %vm6378_vm8, %v5581_v43 }
 0xfab   : > { %5588 = vmatprep.subr.bf16.mxu1 %v5886_v14 }
 0xfae   : > { %3725 = vrot.lane.b32.xlu1 %v6394_v54, %s5872_s28 }
 0xfb1   : > { %5405 = vmatmul.mubr.msk.f32.vlgmr.msra.gmra.mrb[30].mxu1 %vm1059_vm3, %v6394_v54 }
 0xfb2   : > { %5418 = vmatprep.mubr.msk.f32.mxu1 %vm5871_vm2, %v5870_v10 }
0x101c   : > { %v5723_v41 = vpop.permute.xlu1 %5722 }
0x101d   : > { %v5725_v45 = vunpack.i.h.bf16 %v5723_v41  ;;  %v5724_v49 = vunpack.i.l.bf16 %v5723_v41 }
0x101f   : > { %v5589_v50 = vpack.c.bf16 %v5725_v45, %v5724_v49 }
0x1020   : > { %v3726_v51 = vpop.permute.xlu1 %3725 }
0x1021   : > { %5591 = vmatpush3.bf16.xpose.msk.msra.mxu1 %vm6378_vm8, %v5589_v50 }
0x1022   : > { %5600 = vmatprep.subr.bf16.mxu1 %v5886_v14 }
0x1028   : > { %5419 = vmatmul.mubr.msk.f32.vlgmr.msra.gmra.mrb[32].mxu1 %vm1059_vm3, %v3726_v51 }
0x1029   : > { %5439 = vmatprep.mubr.msk.f32.mxu1 %vm5871_vm2, %v5870_v10 }
0x1084   : > { %v3627_v53 = vpop.f32.mrb[30].mxu1 }
0x1085   : > { %v3631_v15 = vsel %vm3551_vm14, -1e+10, %v3627_v53  ;;  %v5406_v55 = vpop.f32.mrb[31].mxu1 }
0x1086   : > { %v3632_v57 = vsel %vm2824_vm10, %v3631_v15, -inf }
0x1087   : > { %3633 = vmax.xlane.f32.xlu0 %v3632_v57 }
0x10fb   : > { %v3803_v59 = vpop.f32.mrb[32].mxu1 }
0x10fc   : > { %v3807_v60 = vsel %vm3551_vm14, -1e+10, %v3803_v59  ;;  %v5420_v61 = vpop.f32.mrb[33].mxu1 }
0x10fd   : > { %v3808_v62 = vsel %vm2824_vm10, %v3807_v60, -inf }
0x10fe   : > { %3809 = vmax.xlane.f32.xlu1 %v3808_v62 }
0x110f   : > { %5727 = vrot.lane.b32.xlu1 %v6514_v42, %s5873_s30  ;;  %s6807_s30 = smov 24  }
0x1113   : > { %5737 = vrot.lane.b32.xlu1 %v6514_v42, %s5877_s0 }
0x1114   : > { %v3634_v63 = vpop.xlane.xlu0 %3633 }
0x1115   : > { %v3635_v9 = vsub.f32 %v3631_v15, %v3634_v63 }
0x1117   : > { %v3636_v56 = vmul.f32 1.442695, %v3635_v9  ;;  %3901 = vrot.lane.b32.xlu1 %v6394_v54, %s5877_s0  ;;  %s6809_s0 = scalar_lea.vmem %s6743_s15, %s6022_s24 }
0x1119   : > { %5808 = vpow2.f32 %v3636_v56 }
0x1123   : > { %v5809_v7 = vpop.eup %5808 }
0x1124   : > { %v3638_v0 = vsel %vm2824_vm10, %v5809_v7, 0.0 }
0x1125   : > { %3639 = vadd.xlane.f32.xlu0 %v3638_v0 }
0x118b   : > { %v3810_v1 = vpop.xlane.xlu1 %3809 }
0x118c   : > { %v3811_v2 = vsub.f32 %v3807_v60, %v3810_v1 }
0x118e   : > { %v3812_v4 = vmul.f32 1.442695, %v3811_v2 }
0x118f   : > { %v5728_v5 = vpop.permute.xlu1 %5727 }
0x1190   : > { %5810 = vpow2.f32 %v3812_v4  ;;  %v5730_v8 = vunpack.i.h.bf16 %v5728_v5  ;;  %v5729_v13 = vunpack.i.l.bf16 %v5728_v5 }
0x1192   : > { %v5585_v16 = vpack.c.bf16 %v5730_v8, %v5729_v13 }
0x1193   : > { %v5738_v58 = vpop.permute.xlu1 %5737 }
0x1194   : > { %5587 = vmatpush3.bf16.msk.msra.mxu0 %vm6424_vm13, %v5585_v16  ;;  %v5740_v31 = vunpack.i.h.bf16 %v5738_v58  ;;  %v5739_v32 = vunpack.i.l.bf16 %v5738_v58  ;;  %v4269_v58 = vld [vmem:[%s6062_s23 + $0x8] sm:$0xff] }
0x1195   : > { %5592 = vmatprep.subr.bf16.mxu0 %v5886_v14 }
0x1196   : > { %v5597_v34 = vpack.c.bf16 %v5740_v31, %v5739_v32  ;;  %v4271_v31 = vld [vmem:[%s6062_s23 + $0x18] sm:$0xff] }
0x1197   : > { %v3902_v47 = vpop.permute.xlu1 %3901  ;;  %v5616_v32 = vpack.c.bf16 %v4271_v31, %v4270_v12  ;;  %v4500_v31 = vld [vmem:[%s6081_s22 + $0x30] sm:$0xff] }
0x119a   : > { %v5811_v17 = vpop.eup %5810 }
0x119b   : > { %v3814_v18 = vsel %vm2824_vm10, %v5811_v17, 0.0 }
0x119c   : > { %3815 = vadd.xlane.f32.xlu0 %v3814_v18 }
0x11b2   : > { %v3640_v19 = vpop.xlane.xlu0 %3639  ;;  %5732 = vrot.lane.b32.xlu0 %v6514_v42, %s5875_s1  ;;  %s6808_s1 = scalar_lea.vmem %s6741_s13, %s6022_s24 }
0x11b3   : > { %5812 = vrcp.f32 %v3640_v19 }
0x11bd   : > { %v5813_v20 = vpop.eup %5812 }
0x11be   : > { %v3642_v21 = vmul.f32 %v5813_v20, %v5809_v7 }
0x11c0   : > { %3644 = vst.msk [vmem:[#allocation3 + $0x20] sm:$0xff] %vm2824_vm10, %v3642_v21  ;;  %5412 = vmatmul.mubr.msk.f32.vlgmr.msra.gmra.mrb[28].mxu0 %vm2824_vm10, %v3642_v21 }
0x11c1   : > { %5425 = vmatprep.mubr.msk.f32.mxu0 %vm5871_vm2, %v5870_v10 }
0x1229   : > { %v3816_v22 = vpop.xlane.xlu0 %3815 }
0x122a   : > { %5814 = vrcp.f32 %v3816_v22 }
0x122d   : > { %v5733_v23 = vpop.permute.xlu0 %5732 }
0x122e   : > { %v5735_v24 = vunpack.i.h.bf16 %v5733_v23  ;;  %v5734_v25 = vunpack.i.l.bf16 %v5733_v23 }
0x1230   : > { %v5593_v27 = vpack.c.bf16 %v5735_v24, %v5734_v25 }
0x1232   : > { %5595 = vmatpush3.bf16.msk.msra.mxu0 %vm6424_vm13, %v5593_v27  ;;  %v4268_v27 = vld [vmem:[%s6062_s23] sm:$0xff] }
0x1233   : > { %5596 = vmatprep.subr.bf16.mxu0 %v5886_v14 }
0x1234   : > { %v5815_v28 = vpop.eup %5814 }
0x1235   : > { %v3818_v33 = vmul.f32 %v5815_v28, %v5811_v17  ;;  %v5612_v28 = vpack.c.bf16 %v4269_v58, %v4268_v27 }
0x1237   : > { %3820 = vst.msk [vmem:[#allocation3 + $0x28] sm:$0xff] %vm2824_vm10, %v3818_v33  ;;  %5426 = vmatmul.mubr.msk.f32.vlgmr.msra.gmra.mrb[30].mxu0 %vm2824_vm10, %v3818_v33 }
0x1238   : > { %5432 = vmatprep.mubr.msk.f32.mxu0 %vm5871_vm2, %v5870_v10 }
0x123b   : > { %5599 = vmatpush3.bf16.xpose.msk.msra.mxu0 %vm6378_vm8, %v5597_v34 }
0x123c   : > { %5608 = vmatprep.subr.bf16.mxu0 %v5886_v14 }
0x1242   : > { %5433 = vmatmul.mubr.msk.f32.vlgmr.msra.gmra.mrb[32].mxu0 %vm1059_vm3, %v3902_v47 }
0x1243   : > { %5453 = vmatprep.mubr.msk.f32.mxu0 %vm5871_vm2, %v5870_v10 }
0x1293   : > { %v6575_v3 = vpop.f32.mrb[28].mxu0 }
0x1294   : > { %v5413_v36 = vpop.f32.mrb[29].mxu0 }
0x130a   : > { %v3897_v37 = vpop.f32.mrb[30].mxu0 }
0x130b   : > { %v5427_v39 = vpop.f32.mrb[31].mxu0 }
0x1315   : > { %v3979_v6 = vpop.f32.mrb[32].mxu0 }
0x1316   : > { %v3983_v43 = vsel %vm3551_vm14, -1e+10, %v3979_v6  ;;  %v5434_v41 = vpop.f32.mrb[33].mxu0 }
0x1317   : > { %v3984_v45 = vsel %vm2824_vm10, %v3983_v43, -inf }
0x1318   : > { %3985 = vmax.xlane.f32.xlu0 %v3984_v45 }
0x132e   : > { %5742 = vrot.lane.b32.xlu0 %v6514_v42, %s5874_s5 }
0x1332   : > { %4077 = vrot.lane.b32.xlu0 %v6394_v54, %s5878_s29 }
0x13a5   : > { %v3986_v49 = vpop.xlane.xlu0 %3985 }
0x13a6   : > { %v3987_v50 = vsub.f32 %v3983_v43, %v3986_v49  ;;  %v5047_v43 = vld [vmem:[%s6808_s1] ss:$0 sm:$0xff] }
0x13a8   : > { %v3988_v51 = vmul.f32 1.442695, %v3987_v50 }
0x13a9   : > { %v5743_v53 = vpop.permute.xlu0 %5742 }
0x13aa   : > { %5816 = vpow2.f32 %v3988_v51  ;;  %v5745_v15 = vunpack.i.h.bf16 %v5743_v53  ;;  %v5744_v55 = vunpack.i.l.bf16 %v5743_v53 }
0x13ac   : > { %v5601_v57 = vpack.c.bf16 %v5745_v15, %v5744_v55 }
0x13ae   : > { %5603 = vmatpush3.bf16.msk.msra.mxu1 %vm6424_vm13, %v5601_v57 }
0x13af   : > { %5604 = vmatprep.subr.bf16.mxu1 %v5886_v14  ;;  %v4078_v14 = vpop.permute.xlu0 %4077 }
0x13b4   : > { %v5817_v59 = vpop.eup %5816 }
0x13b5   : > { %v3990_v60 = vsel %vm2824_vm10, %v5817_v59, 0.0 }
0x13b6   : > { %3991 = vadd.xlane.f32.xlu1 %v3990_v60 }
0x13c7   : > { %5747 = vrot.lane.b32.xlu1 %v6514_v42, %s5878_s29 }
0x1443   : > { %v3992_v54 = vpop.xlane.xlu1 %3991 }
0x1444   : > { %5818 = vrcp.f32 %v3992_v54 }
0x1447   : > { %v5748_v61 = vpop.permute.xlu1 %5747 }
0x1448   : > { %v5750_v62 = vunpack.i.h.bf16 %v5748_v61  ;;  %v5749_v63 = vunpack.i.l.bf16 %v5748_v61 }
0x144a   : > { %v5605_v7 = vpack.c.bf16 %v5750_v62, %v5749_v63 }
0x144e   : > { %v5819_v9 = vpop.eup %5818 }
0x144f   : > { %v3994_v56 = vmul.f32 %v5819_v9, %v5817_v59  ;;  %v4400_v9 = vld [vmem:[%s6071_s26] sm:$0xff] }
0x1451   : > { %3996 = vst.msk [vmem:[#allocation3 + $0x30] sm:$0xff] %vm2824_vm10, %v3994_v56  ;;  %5440 = vmatmul.mubr.msk.f32.vlgmr.msra.gmra.mrb[34].mxu1 %vm2824_vm10, %v3994_v56  ;;  %v4401_v56 = vld [vmem:[%s6071_s26 + $0x8] sm:$0xff] }
0x1452   : > { %5607 = vmatpush3.bf16.xpose.msk.msra.mxu1 %vm6378_vm8, %v5605_v7  ;;  %5446 = vmatprep.mubr.msk.f32.mxu1 %vm5871_vm2, %v5870_v10  ;;  %v5620_v7 = vpack.c.bf16 %v4401_v56, %v4400_v9 }
0x1454   : > { %5621 = vmatprep.subr.bf16.mxu1 %v5620_v7 }
0x1459   : > { %5447 = vmatmul.mubr.msk.f32.vlgmr.msra.gmra.mrb[36].mxu1 %vm1059_vm3, %v4078_v14  ;;  %v4402_v14 = vld [vmem:[%s6071_s26 + $0x10] sm:$0xff] }
0x145a   : > { %5623 = vmatpush3.bf16.msra.mxu1 %v5620_v7 }
0x1524   : > { %v4073_v0 = vpop.f32.mrb[34].mxu1 }
0x1525   : > { %v5441_v1 = vpop.f32.mrb[35].mxu1 }
0x152c   : > { %v4155_v2 = vpop.f32.mrb[36].mxu1 }
0x152d   : > { %v4159_v4 = vsel %vm3551_vm14, -1e+10, %v4155_v2  ;;  %v5448_v5 = vpop.f32.mrb[37].mxu1  ;;  %v4494_v2 = vld [vmem:[%s6081_s22] sm:$0xff] }
0x152e   : > { %v4160_v8 = vsel %vm2824_vm10, %v4159_v4, -inf  ;;  %v4496_v5 = vld [vmem:[%s6081_s22 + $0x10] sm:$0xff] }
0x152f   : > { %4161 = vmax.xlane.f32.xlu1 %v4160_v8 }
0x1540   : > { %3447 = vrot.lane.b32.xlu1 %v6458_v48, %s5883_s8 }
0x1544   : > { %3451 = vrot.lane.b32.xlu1 %v6483_v11, %s5884_s21 }
0x1548   : > { %3455 = vrot.lane.b32.xlu1 %v6510_v35, %s6807_s30 }
0x15bc   : > { %v4162_v10 = vpop.xlane.xlu1 %4161 }
0x15bd   : > { %v4163_v46 = vsub.f32 %v4159_v4, %v4162_v10  ;;  %v4495_v4 = vld [vmem:[%s6081_s22 + $0x8] sm:$0xff]  ;;  %v4497_v10 = vld [vmem:[%s6081_s22 + $0x18] sm:$0xff] }
0x15be   : > { %v5628_v8 = vpack.c.bf16 %v4495_v4, %v4494_v2  ;;  %v4621_v2 = vsub.s32 2, %v6346_v26 }
0x15bf   : > { %v4164_v13 = vmul.f32 1.442695, %v4163_v46  ;;  %v5632_v46 = vpack.c.bf16 %v4497_v10, %v4496_v5 }
0x15c0   : > { %v3448_v48 = vpop.permute.xlu1 %3447  ;;  %v4622_v4 = vrot.slane %v6350_v29, %v4621_v2  ;;  %v4628_v10 = vrot.slane %v6353_v30, %v4621_v2 }
0x15c1   : > { %5820 = vpow2.f32 %v4164_v13  ;;  %v3458_v22 = vsel %vm1059_vm3, %v6456_v44, %v3448_v48  ;;  %v4498_v13 = vld [vmem:[%s6081_s22 + $0x20] sm:$0xff] }
0x15c4   : > { %v3452_v17 = vpop.permute.xlu1 %3451 }
0x15c5   : > { %v3459_v24 = vsel %vm1733_vm6, %v3458_v22, %v3452_v17 }
0x15c8   : > { %v3456_v21 = vpop.permute.xlu1 %3455 }
0x15c9   : > { %v3460_v25 = vsel %vm1735_vm7, %v3459_v24, %v3456_v21 }
0x15cb   : > { %v5821_v16 = vpop.eup %5820 }
0x15cc   : > { %v4166_v52 = vsel %vm2824_vm10, %v5821_v16, 0.0 }
0x15cd   : > { %4167 = vadd.xlane.f32.xlu0 %v4166_v52 }
0x15e3   : > { %5752 = vrot.lane.b32.xlu0 %v6514_v42, %s5876_s6 }
0x15e7   : > { %4254 = vrot.lane.b32.xlu0 %v3897_v37, %s5883_s8 }
0x15eb   : > { %4258 = vrot.lane.b32.xlu0 %v4073_v0, %s5884_s21  ;;  %v4403_v0 = vld [vmem:[%s6071_s26 + $0x18] sm:$0xff] }
0x15ec   : > { %v5624_v1 = vpack.c.bf16 %v4403_v0, %v4402_v14 }
0x15ee   : > { %5625 = vmatprep.subr.bf16.mxu1 %v5624_v1 }
0x15ef   : > { %5627 = vmatpush3.bf16.msra.mxu1 %v5624_v1 }
0x165a   : > { %v4168_v11 = vpop.xlane.xlu0 %4167 }
0x165b   : > { %5822 = vrcp.f32 %v4168_v11 }
0x165e   : > { %v5753_v35 = vpop.permute.xlu0 %5752 }
0x165f   : > { %v5755_v18 = vunpack.i.h.bf16 %v5753_v35  ;;  %v5754_v19 = vunpack.i.l.bf16 %v5753_v35 }
0x1661   : > { %v5609_v20 = vpack.c.bf16 %v5755_v18, %v5754_v19 }
0x1662   : > { %v4255_v34 = vpop.permute.xlu0 %4254 }
0x1663   : > { %5611 = vmatpush3.bf16.msk.msra.mxu0 %vm6424_vm13, %v5609_v20  ;;  %v4265_v36 = vsel %vm1059_vm3, %v6575_v3, %v4255_v34  ;;  %v4390_v20 = vsub.s32 1, %v6346_v26 }
0x1664   : > { %5613 = vmatprep.subr.bf16.mxu0 %v5612_v28 }
0x1665   : > { %v5823_v42 = vpop.eup %5822 }
0x1666   : > { %v4170_v23 = vmul.f32 %v5823_v42, %v5821_v16  ;;  %v4259_v47 = vpop.permute.xlu0 %4258  ;;  %v4499_v16 = vld [vmem:[%s6081_s22 + $0x28] sm:$0xff]  ;;  %v4391_v42 = vrot.slane %v6350_v29, %v4390_v20 }
0x1667   : > { %v4266_v37 = vsel %vm1733_vm6, %v4265_v36, %v4259_v47  ;;  %v5636_v52 = vpack.c.bf16 %v4499_v16, %v4498_v13 }
0x1668   : > { %4172 = vst.msk [vmem:[#allocation3 + $0x38] sm:$0xff] %vm2824_vm10, %v4170_v23  ;;  %5454 = vmatmul.mubr.msk.f32.vlgmr.msra.gmra.mrb[34].mxu0 %vm2824_vm10, %v4170_v23  ;;  %v4397_v23 = vrot.slane %v6353_v30, %v4390_v20 }
0x1669   : > { %5464 = vmatprep.mubr.msk.f32.mxu0 %vm971_vm1, %v3460_v25  ;;  %5615 = vmatpush3.bf16.msra.mxu0 %v5612_v28 }
0x166a   : > { %5617 = vmatprep.subr.bf16.mxu0 %v5616_v32 }
0x166d   : > { %5619 = vmatpush3.bf16.msra.mxu0 %v5616_v32  ;;  %v4501_v32 = vld [vmem:[%s6081_s22 + $0x38] sm:$0xff]  ;;  %s6810_s22 = scalar_lea.vmem %s6745_s17, %s6022_s24  ;;  %s6811_s24 = sld [smem:[#allocation7_spill]] }
0x166e   : > { %5629 = vmatprep.subr.bf16.mxu0 %v5628_v8 }
0x1673   : > { %p5056_p5 = scmp.ne.s32.totalorder %s6811_s24, 1 }
0x1674   : > { %s6812_s7 = sld [smem:[#allocation21_spill]] (!%p5056_p5)  ;;  %s6813_s1 = sld [smem:[#allocation22_spill]] (!%p5056_p5) }
0x167a   : > { %v4637_v26 = vld [vmem:[%s6812_s7] sm:$0xff] (!%p5056_p5)  ;;  %v4638_v29 = vld [vmem:[%s6812_s7 + $0x8] sm:$0xff] (!%p5056_p5)  ;;  %v4639_v30 = vld [vmem:[%s6812_s7 + $0x10] sm:$0xff] (!%p5056_p5) }
0x173b   : > { %v4249_v44 = vpop.f32.mrb[34].mxu0 }
0x173c   : > { %4262 = vrot.lane.b32.xlu1 %v4249_v44, %s6807_s30  ;;  %v5455_v33 = vpop.f32.mrb[35].mxu0  ;;  %v5640_v44 = vpack.c.bf16 %v4501_v32, %v4500_v31 }
0x173d   : > { %v5050_v33 = vld [vmem:[%s6809_s0] ss:$0 sm:$0xff]  ;;  %s6814_s0 = sld [smem:[#allocation23_spill]] (!%p5056_p5) }
0x17ae   : > { %v4263_v39 = vpop.permute.xlu1 %4262 }
0x17af   : > { %v4267_v6 = vsel %vm1735_vm7, %v4266_v37, %v4263_v39 }
0x17b0   : > { %5465 = vmatmul.mubr.msk.f32.vlgmr.msra.gmra.mrb[36].mxu0 %vm971_vm1, %v4267_v6 }
0x17b1   : > { %5631 = vmatpush3.bf16.msra.mxu0 %v5628_v8 }
0x17b2   : > { %5633 = vmatprep.subr.bf16.mxu0 %v5632_v46 }
0x17b5   : > { %5635 = vmatpush3.bf16.msra.mxu0 %v5632_v46 }
0x17b6   : > { %5637 = vmatprep.subr.bf16.mxu0 %v5636_v52 }
0x17b9   : > { %5639 = vmatpush3.bf16.msra.mxu0 %v5636_v52 }
0x17ba   : > { %5641 = vmatprep.subr.bf16.mxu0 %v5640_v44 }
0x17bd   : > { %5643 = vmatpush3.bf16.msra.mxu0 %v5640_v44 }
0x1883   : > { %v5466_v41 = vpop.f32.mrb[36].mxu0 }
0x1884   : > { %v4357_v45 = vadd.f32 %v5466_v41, %v5047_v43  ;;  %v4351_v49 = vpop.f32.mrb[37].mxu0 }
0x1885   : > { %v4352_v50 = vadd.f32 %v5047_v43, %v4351_v49  ;;  %v5053_v43 = vld [vmem:[%s6810_s22] ss:$0 sm:$0xff] }
0x1886   : > { %v4361_v51 = vadd.f32 %v4357_v45, %v6361_v40 }
0x1887   : > { %v4360_v3 = vadd.f32 %v4352_v50, %v6357_v38 }
0x1888   : > { %v4365_v53 = vsel %vm971_vm1, %v4361_v51, 0.0 }
0x1889   : > { %4366 = vadd.xlane.f32.xlu1 %v4365_v53  ;;  %v4362_v15 = vsel %vm971_vm1, %v4360_v3, 0.0 }
0x188a   : > { %4363 = vadd.xlane.f32.xlu0 %v4362_v15 }
0x1916   : > { %v4367_v55 = vpop.xlane.xlu1 %4366 }
0x1917   : > { %v4369_v57 = vmul.f32 0.03125, %v4367_v55  ;;  %v4364_v59 = vpop.xlane.xlu0 %4363 }
0x1918   : > { %v4368_v60 = vmul.f32 0.03125, %v4364_v59 }
0x1919   : > { %v4371_v54 = vsub.f32 %v4361_v51, %v4369_v57 }
0x191a   : > { %v4370_v61 = vsub.f32 %v4360_v3, %v4368_v60 }
0x191b   : > { %v4373_v40 = vmul.f32 %v4371_v54, %v4371_v54 }
0x191c   : > { %v4372_v62 = vmul.f32 %v4370_v61, %v4370_v61 }
0x191d   : > { %v4377_v63 = vsel %vm971_vm1, %v4373_v40, 0.0 }
0x191e   : > { %v4374_v38 = vsel %vm971_vm1, %v4372_v62, 0.0 }
0x191f   : > { %4375 = vadd.xlane.f32.xlu0 %v4374_v38 }
0x1923   : > { %4378 = vadd.xlane.f32.xlu0 %v4377_v63 }
0x19ac   : > { %v4376_v48 = vpop.xlane.xlu0 %4375 }
0x19ad   : > { %v4380_v11 = vmul.f32 0.03125, %v4376_v48 }
0x19af   : > { %v4382_v35 = vadd.f32 1e-05, %v4380_v11 }
0x19b0   : > { %v4379_v17 = vpop.xlane.xlu0 %4378 }
0x19b1   : > { %5824 = vrsqrt.f32 %v4382_v35  ;;  %v4381_v18 = vmul.f32 0.03125, %v4379_v17  ;;  %v5644_v35 = vpack.c.bf16 (!%p5056_p5), %v4638_v29, %v4637_v26  ;;  %v4640_v17 = vld [vmem:[%s6812_s7 + $0x18] sm:$0xff] (!%p5056_p5) }
0x19b3   : > { %v4383_v19 = vadd.f32 1e-05, %v4381_v18  ;;  %v5648_v18 = vpack.c.bf16 (!%p5056_p5), %v4640_v17, %v4639_v30  ;;  %5645 = vmatprep.subr.bf16.mxu0 (!%p5056_p5), %v5644_v35 }
0x19b5   : > { %5826 = vrsqrt.f32 %v4383_v19  ;;  %v5057_v19 = vld [vmem:[%s6813_s1] ss:$0 sm:$0xff] (!%p5056_p5) }
0x19bb   : > { %v5825_v21 = vpop.eup %5824 }
0x19bc   : > { %v4386_v22 = vmul.f32 %v5825_v21, %v4370_v61 }
0x19be   : > { %v4392_v24 = vmul.f32 %v4391_v42, %v4386_v22 }
0x19bf   : > { %v5827_v25 = vpop.eup %5826 }
0x19c0   : > { %v4387_v27 = vmul.f32 %v5827_v25, %v4371_v54  ;;  %v4398_v58 = vadd.f32 %v4397_v23, %v4392_v24 }
0x19c2   : > { %v4393_v12 = vmul.f32 %v4391_v42, %v4387_v27  ;;  %5475 = vmatprep.mubr.msk.f32.mxu1 %vm971_vm1, %v4398_v58 }
0x19c4   : > { %v4399_v28 = vadd.f32 %v4397_v23, %v4393_v12 }
0x19c6   : > { %5476 = vmatmul.mubr.msk.f32.vlgmr.msra.gmra.mrb[38].mxu1 %vm971_vm1, %v4399_v28 }
0x1a99   : > { %v5477_v34 = vpop.f32.mrb[38].mxu1 }
0x1a9a   : > { %v4489_v47 = vadd.f32 %v5477_v34, %v5050_v33  ;;  %v4483_v36 = vpop.f32.mrb[39].mxu1 }
0x1a9b   : > { %v4484_v37 = vadd.f32 %v5050_v33, %v4483_v36 }
0x1a9c   : > { %v4493_v6 = vmax.f32 %v4489_v47, 0.0 }
0x1a9d   : > { %v4492_v39 = vmax.f32 %v4484_v37, 0.0 }
0x1a9f   : > { %5494 = vmatprep.mubr.msk.f32.mxu0 %vm4509_vm15, %v4492_v39 }
0x1aa0   : > { %5495 = vmatmul.mubr.msk.f32.vlgmr.msra.gmra.mrb[38].mxu0 %vm4509_vm15, %v4493_v6 }
0x1aa1   : > { %5647 = vmatpush3.bf16.msra.mxu0 (!%p5056_p5), %v5644_v35 }
0x1aa2   : > { %5649 = vmatprep.subr.bf16.mxu0 (!%p5056_p5), %v5648_v18 }
0x1aa5   : > { %5651 = vmatpush3.bf16.msra.mxu0 (!%p5056_p5), %v5648_v18 }
0x1b73   : > { %v5496_v41 = vpop.f32.mrb[38].mxu0 }
0x1b74   : > { %v4588_v45 = vadd.f32 %v5496_v41, %v5053_v43  ;;  %v4582_v49 = vpop.f32.mrb[39].mxu0 }
0x1b75   : > { %v4583_v50 = vadd.f32 %v5053_v43, %v4582_v49 }
0x1b76   : > { %v4592_v51 = vadd.f32 %v4588_v45, %v4399_v28 }
0x1b77   : > { %v4591_v3 = vadd.f32 %v4583_v50, %v4398_v58 }
0x1b78   : > { %v4596_v53 = vsel %vm971_vm1, %v4592_v51, 0.0 }
0x1b79   : > { %4597 = vadd.xlane.f32.xlu0 %v4596_v53  ;;  %v4593_v15 = vsel %vm971_vm1, %v4591_v3, 0.0 }
0x1b7a   : > { %4594 = vadd.xlane.f32.xlu1 %v4593_v15 }
0x1c06   : > { %v4598_v55 = vpop.xlane.xlu0 %4597 }
0x1c07   : > { %v4600_v57 = vmul.f32 0.03125, %v4598_v55  ;;  %v4595_v59 = vpop.xlane.xlu1 %4594 }
0x1c08   : > { %v4599_v60 = vmul.f32 0.03125, %v4595_v59 }
0x1c09   : > { %v4602_v54 = vsub.f32 %v4592_v51, %v4600_v57 }
0x1c0a   : > { %v4601_v61 = vsub.f32 %v4591_v3, %v4599_v60 }
0x1c0b   : > { %v4604_v62 = vmul.f32 %v4602_v54, %v4602_v54 }
0x1c0c   : > { %v4603_v38 = vmul.f32 %v4601_v61, %v4601_v61 }
0x1c0d   : > { %v4608_v40 = vsel %vm971_vm1, %v4604_v62, 0.0 }
0x1c0e   : > { %4609 = vadd.xlane.f32.xlu0 %v4608_v40  ;;  %v4605_v63 = vsel %vm971_vm1, %v4603_v38, 0.0 }
0x1c0f   : > { %4606 = vadd.xlane.f32.xlu1 %v4605_v63 }
0x1c9b   : > { %v4610_v9 = vpop.xlane.xlu0 %4609 }
0x1c9c   : > { %v4612_v56 = vmul.f32 0.03125, %v4610_v9  ;;  %v4607_v7 = vpop.xlane.xlu1 %4606 }
0x1c9d   : > { %v4611_v14 = vmul.f32 0.03125, %v4607_v7 }
0x1c9e   : > { %v4614_v0 = vadd.f32 1e-05, %v4612_v56 }
0x1c9f   : > { %v4613_v1 = vadd.f32 1e-05, %v4611_v14 }
0x1ca0   : > { %5828 = vrsqrt.f32 %v4614_v0 }
0x1ca1   : > { %5830 = vrsqrt.f32 %v4613_v1 }
0x1caa   : > { %v5829_v5 = vpop.eup %5828 }
0x1cab   : > { %v5831_v8 = vpop.eup %5830  ;;  %v4618_v46 = vmul.f32 %v5829_v5, %v4602_v54 }
0x1cac   : > { %v4617_v13 = vmul.f32 %v5831_v8, %v4601_v61  ;;  %4636 = sbr.rel (%p5056_p5) target bundleno = 7563 (0x1d8b), region = 116 }
0x1cad   : > { %v4624_v16 = vmul.f32 %v4622_v4, %v4618_v46 }
0x1cae   : > { %v4623_v52 = vmul.f32 %v4622_v4, %v4617_v13 }
0x1caf   : > { %v4630_v48 = vadd.f32 %v4628_v10, %v4624_v16 }
0x1cb0   : > { %v4629_v11 = vadd.f32 %v4628_v10, %v4623_v52 }
0x1cb1   : > { %4632 = vst.msk [vmem:[#allocation2 + $0x8] sm:$0xff] %vm971_vm1, %v4630_v48 }
0x1cb2   : > { %4631 = vst.msk [vmem:[#allocation2] sm:$0xff] %vm971_vm1, %v4629_v11  ;;  %5505 = vmatprep.mubr.msk.f32.mxu0 (!%p5056_p5), %vm971_vm1, %v4629_v11 }
0x1cb3   : > { %5506 = vmatmul.mubr.msk.f32.vlgmr.msra.gmra.mrb[0].mxu0 %vm971_vm1, %v4630_v48 }
0x1d86   : > { %v5507_v20 = vpop.f32.mrb[0].mxu0 }
0x1d87   : > { %v4726_v42 = vadd.f32 %v5507_v20, %v5057_v19  ;;  %v4720_v21 = vpop.f32.mrb[1].mxu0 }
0x1d88   : > { %v4721_v22 = vadd.f32 %v5057_v19, %v4720_v21 }
0x1d89   : > { %4730 = vst [vmem:[%s6814_s0 + $0x8] sm:$0xff] %v4726_v42 }
0x1d8a   : > { %4729 = vst [vmem:[%s6814_s0] sm:$0xff] %v4721_v22 }
0x1d8b PF: > { %s6815_s22 = sld [smem:[#allocation7_spill]]  ;;  %s5888_s24 = smov [#allocation3]  }
0x1d8c   : > { %s4740_s4 = sshll.u32 %s5888_s24, 4  ;;  %s4741_s4 = int_to_ptr.vmem [resolvable:$true] %s4740_s4 }
0x1d8d   : > { %s5832_s2 = scalar_lea.vmem %s4741_s4, 1024  ;;  %p5839_p10 = scmp.lt.s32.totalorder %s4741_s4, %s4741_s4 }
0x1d8e   : > { %p5833_p7 = scmp.ne.s32.totalorder %s4741_s4, %s5832_s2  ;;  %p5840_p11 = scmp.lt.s32.totalorder %s5832_s2, %s5832_s2 }
0x1d90   : > { %p5841_p12 = por %p5840_p11, %p5839_p10 }
0x1d91   : > { %p5656_p6 = scmp.eq.s32.totalorder %s6815_s22, 1 }
0x1d93   : > { %p5834_p8 = pnand %p5833_p7, %p5656_p6 }
0x1d95   : > { %p5835_p9 = pneg %p5834_p8 }
0x1d97   : > { %p5842_p13 = pnand %p5841_p12, %p5835_p9 }
0x1d99   : > { %5845 = shalt.err (!%p5842_p13)
}
0x1d9a   : > { %s6816_s10 = sld [smem:[#allocation24_spill]] }
0x1da0   : > { %s5846_s28 = scalar_lea.hbm %s6816_s10, 1024 }
0x1da1   : > { %p5847_p0 = scmp.ne.s32.totalorder %s6816_s10, %s5846_s28  ;;  %p5852_p3 = scmp.lt.u32.totalorder %s5846_s28, %s6816_s10 }
0x1da3   : > { %p5848_p1 = pnand %p5847_p0, %p5656_p6 }
0x1da5   : > { %p5849_p2 = pneg %p5848_p1 }
0x1da7   : > { %p5854_p4 = pnand %p5852_p3, %p5849_p2 }
0x1da9   : > { %5857 = shalt.err (!%p5854_p4)
}
0x1daa   : > { %s5889_s1 = smov 128  }
0x1dab   : > { %5653 = dma.vmem_to_hbm [thread:$0]  (%p5656_p6), %s4741_s4, 1024, %s6816_s10, [#allocation4], %s5889_s1, %s5889_s1, %s5883_s8  }
0x1dac   : > { %5863 = dma.done.wait (%p5656_p6), [#allocation4], 1024  }
0x1dad   : > { %5865 = vsyncadd (%p5656_p6), [#allocation4], 4294966272 }
0x1dae PF: > { %s6817_s29 = sld [smem:[#allocation6_spill]] }
0x1db4   : > { %s35_s4 = sadd.s32 1, %s6817_s29  }
0x1db5   : > { %p32_p5 = scmp.ge.s32.totalorder %s35_s4, 4  }
0x1db7   :  { %34 = sbr.rel (!%p32_p5) target bundleno = 19 (0x13), region = 204 }
0x1dbe   :  { %4759 = vsyncpa [#allocation4], 1 }
0x1dbf   :  { %4761 = vsyncpa [#allocation4 + $0x1], 1 }

</bundles_post_ra>
